<compile_context>
chip_gen: v7x
topology: tpu7x:2x2x1
jax: 0.10.0
libtpu: 0.0.40
codegen_flags: <defaults>
</compile_context>

<pallas_src>
from functools import partial

import numpy as np
import jax
import jax.numpy as jnp
from jax.experimental import pallas as pl
from jax.experimental.pallas import tpu as pltpu

_EPS = 1e-8  # torch.nn.CosineSimilarity default eps


def _round_up(x, m=128):
    return ((x + m - 1) // m) * m


# ----------------------------------------------------------------------------
# Kernel: one grid step = one batch block; the whole T-step recurrence runs
# inside the body with a fori_loop, outputs stay resident in VMEM until the end.
# ----------------------------------------------------------------------------
def _ntm_scan_kernel(h0_ref, C0_ref,
                     wh_ref, bh_ref,        # fused, lane-padded [k | gh(3H) | beta]
                     wih_ref, bih_ref,      # GRU input->hidden (3H padded to GHp)
                     wev_ref, bev_ref,      # fused, lane-padded [e | v]
                     h_seq_ref, C_ref, k_seq_ref, r_seq_ref):
    T = h_seq_ref.shape[0]
    Nb, H = h0_ref.shape
    C1, C2 = C0_ref.shape[1], C0_ref.shape[2]
    C2p = _round_up(C2)
    GHp = _round_up(3 * H)
    gh_off = C2p
    b_off = C2p + GHp

    # Weights: loaded from their (resident) VMEM blocks once per call.
    wh, bh = wh_ref[...], bh_ref[...]
    wih, bih = wih_ref[...], bih_ref[...]
    wev, bev = wev_ref[...], bev_ref[...]
    mxu_dt = wh.dtype   # f32, or bf16 for the v6e/v7x MXU-operand optimization

    # Memory C accumulates in its resident output block (aliased with the input).
    C_ref[...] = C0_ref[...]

    def step(t, h):
        C = C_ref[...]                                             # (Nb, C1, C2)

        # ---- fused h-driven projections: [k | gh(3H) | beta_pre] ------------
        proj = jnp.dot(h.astype(mxu_dt), wh,
                       preferred_element_type=jnp.float32) + bh    # (Nb, Dh)
        k = proj[:, :C2]                                           # (Nb, C2)
        gh = proj[:, gh_off:gh_off + GHp]                          # (Nb, GHp)
        beta_pre = proj[:, b_off:b_off + 1]                        # (Nb, 1)
        # torch: log1p(exp(min(x,0))) + max(x,0) + log1p(exp(-max(x,0))) + 1 - log2
        #      == softplus(x) + 1  (stable form below is identical)
        beta = (jnp.maximum(beta_pre, 0.0)
                + jnp.log1p(jnp.exp(-jnp.abs(beta_pre))) + 1.0)

        # ---- content addressing: cosine similarity along features (dim=2) ---
        # M=1 per batch element -> VPU broadcast-multiply + lane reduce instead
        # of re-pushing the C tile into the MXU every step.
        dots = jnp.sum(C * k[:, None, :], axis=2)                  # (Nb, C1)
        c_sq = jnp.sum(C * C, axis=2)                              # (Nb, C1)
        k_sq = jnp.sum(k * k, axis=1, keepdims=True)               # (Nb, 1)
        inv_nrm = jax.lax.rsqrt(jnp.maximum(c_sq, _EPS * _EPS) *
                                jnp.maximum(k_sq, _EPS * _EPS))    # EUP rsqrt
        s = dots * inv_nrm

        # ---- attention weights: softmax over the memory-slot axis (dim=1) ---
        scaled = s * beta
        m = jnp.max(scaled, axis=1, keepdims=True)
        es = jnp.exp(scaled - m)
        w = es * pl.reciprocal(jnp.sum(es, axis=1, keepdims=True),
                               approx=True)                        # (Nb, C1)

        # ---- read vector r = w @ C (VPU mult + sublane reduce) ---------------
        r = jnp.sum(C * w[:, :, None], axis=1)                     # (Nb, C2)

        # ---- GRU cell: h_new = GRU(r, h) --------------------------------------
        gi = jnp.dot(r.astype(mxu_dt), wih,
                     preferred_element_type=jnp.float32) + bih     # (Nb, GHp)
        g = gi + gh                                                # fused gates
        rz = jax.nn.sigmoid(g[:, :2 * H])
        rg, zg = rz[:, :H], rz[:, H:2 * H]
        # i_n + rg*h_n == (i_n + h_n) + (rg - 1)*h_n
        ng = jnp.tanh(g[:, 2 * H:3 * H] + (rg - 1.0) * gh[:, 2 * H:3 * H])
        h_new = (1.0 - zg) * ng + zg * h                           # (Nb, H)

        # ---- memory erase / write (fused, lane-padded e|v projection) --------
        ev = jnp.dot(h_new.astype(mxu_dt), wev,
                     preferred_element_type=jnp.float32) + bev     # (Nb, 2*C2p)
        e = jax.nn.sigmoid(ev[:, :C2])                             # (Nb, C2)
        v = ev[:, C2p:C2p + C2]                                    # (Nb, C2)
        w_col = w[:, :, None]                                      # (Nb, C1, 1)
        C_ref[...] = C * (1.0 - w_col * e[:, None, :]) + w_col * v[:, None, :]

        # ---- per-step outputs: VMEM-resident, one HBM writeback at the end ---
        h_seq_ref[t] = h_new
        k_seq_ref[t] = k
        r_seq_ref[t] = r
        return h_new

    jax.lax.fori_loop(0, T, step, h0_ref[...], unroll=min(T, 8))


# ----------------------------------------------------------------------------
# Wrappers
# ----------------------------------------------------------------------------
@partial(jax.jit, static_argnums=(3,))
def ntm_cell_scan(h_o_prev, C, fused, num_steps):
    """Run `num_steps` NTM cell updates in one kernel launch.

    Returns (h_seq (T,N,H), C_final (N,C1,C2), k_seq (T,N,C2), r_seq (T,N,C2)).
    """
    N, H = h_o_prev.shape
    _, C1, C2 = C.shape
    T = num_steps
    Dh = fused['w_h'].shape[1]
    GHp = fused['w_ih'].shape[1]
    Dev = fused['w_ev'].shape[1]

    # Batch block: 8 rows fills the f32 sublanes; one block per grid step so the
    # "parallel" axis can be split across TensorCores (v7x).
    nb = min(8, N)
    assert N % nb == 0, "batch must be a multiple of the batch block (8)"
    n_blk = N // nb

    grid_spec = pltpu.PrefetchScalarGridSpec(
        num_scalar_prefetch=0,
        grid=(n_blk,),
        in_specs=[
            pl.BlockSpec((nb, H), lambda b: (b, 0)),             # h0 (per block)
            pl.BlockSpec((nb, C1, C2), lambda b: (b, 0, 0)),     # C0 (per block)
            pl.BlockSpec((H, Dh), lambda b: (0, 0)),             # W_h  (resident)
            pl.BlockSpec((1, Dh), lambda b: (0, 0)),             # b_h
            pl.BlockSpec((C2, GHp), lambda b: (0, 0)),           # W_ih
            pl.BlockSpec((1, GHp), lambda b: (0, 0)),            # b_ih
            pl.BlockSpec((H, Dev), lambda b: (0, 0)),            # W_ev
            pl.BlockSpec((1, Dev), lambda b: (0, 0)),            # b_ev
        ],
        out_specs=(
            pl.BlockSpec((T, nb, H), lambda b: (0, b, 0)),       # h_seq (resident)
            pl.BlockSpec((nb, C1, C2), lambda b: (b, 0, 0)),     # C (resident, aliased)
            pl.BlockSpec((T, nb, C2), lambda b: (0, b, 0)),      # k_seq (resident)
            pl.BlockSpec((T, nb, C2), lambda b: (0, b, 0)),      # r_seq (resident)
        ),
        scratch_shapes=[],
    )

    out_shape = (
        jax.ShapeDtypeStruct((T, N, H), jnp.float32),
        jax.ShapeDtypeStruct((N, C1, C2), jnp.float32),
        jax.ShapeDtypeStruct((T, N, C2), jnp.float32),
        jax.ShapeDtypeStruct((T, N, C2), jnp.float32),
    )

    return pl.pallas_call(
        _ntm_scan_kernel,
        grid_spec=grid_spec,
        out_shape=out_shape,
        input_output_aliases={1: 1},   # C written back in place
        compiler_params=pltpu.CompilerParams(
            dimension_semantics=("parallel",)),   # batch blocks are independent
    )(h_o_prev, C, fused['w_h'], fused['b_h'],
      fused['w_ih'], fused['b_ih'], fused['w_ev'], fused['b_ev'])


def ntm_cell(h_o_prev, C, fused):
    """Single-step forward matching the PyTorch module: returns (h_o, C, k, r)."""
    h_seq, C_new, k_seq, r_seq = ntm_cell_scan(h_o_prev, C, fused, 1)
    return h_seq[0], C_new, k_seq[0], r_seq[0]


def fuse_params(params, mxu_dtype=jnp.float32):
    """Fuse per-layer weights into 3 lane-padded matmul operands.

    Every segment starts on a 128-lane boundary so in-kernel slices are aligned.
    `mxu_dtype=jnp.bfloat16` casts the weight matrices only (v6e/v7x MXU
    operands); biases and all elementwise math stay f32.
    """
    wk, whh, wb = params['wk'], params['whh'], params['wb']
    H, C2 = wk.shape
    C2p = _round_up(C2)
    GHp = _round_up(3 * H)
    Dh = C2p + GHp + 128

    w_h = jnp.zeros((H, Dh), jnp.float32)
    w_h = w_h.at[:, :C2].set(wk)
    w_h = w_h.at[:, C2p:C2p + 3 * H].set(whh)
    w_h = w_h.at[:, C2p + GHp:C2p + GHp + 1].set(wb)
    b_h = jnp.zeros((1, Dh), jnp.float32)
    b_h = b_h.at[:, :C2].set(params['bk'])
    b_h = b_h.at[:, C2p:C2p + 3 * H].set(params['bhh'])
    b_h = b_h.at[:, C2p + GHp:C2p + GHp + 1].set(params['bb'])

    w_ih = jnp.zeros((C2, GHp), jnp.float32).at[:, :3 * H].set(params['wih'])
    b_ih = jnp.zeros((1, GHp), jnp.float32).at[:, :3 * H].set(params['bih'])

    w_ev = jnp.zeros((H, 2 * C2p), jnp.float32)
    w_ev = w_ev.at[:, :C2].set(params['we']).at[:, C2p:C2p + C2].set(params['wv'])
    b_ev = jnp.zeros((1, 2 * C2p), jnp.float32)
    b_ev = b_ev.at[:, :C2].set(params['be']).at[:, C2p:C2p + C2].set(params['bv'])

    cast = lambda w: w.astype(mxu_dtype)
    return {'w_h': cast(w_h), 'b_h': b_h,
            'w_ih': cast(w_ih), 'b_ih': b_ih,
            'w_ev': cast(w_ev), 'b_ev': b_ev}


def _init_params(key, dim_h_o, dim_c2_2):
    """Deterministic PyTorch-style (uniform +-1/sqrt(fan_in)) initialization."""
    ks = jax.random.split(key, 12)

    def u(k, shape, fan_in):
        b = 1.0 / np.sqrt(fan_in)
        return jax.random.uniform(k, shape, jnp.float32, -b, b)

    H, C2 = dim_h_o, dim_c2_2
    return {
        # nn.Linear(dim_h_o, dim_C2_2) for k / e / v; nn.Linear(dim_h_o, 1) for b
        'wk': u(ks[0], (H, C2), H),  'bk': u(ks[1], (1, C2), H),
        'wb': u(ks[2], (H, 1), H),   'bb': u(ks[3], (1, 1), H),
        'we': u(ks[4], (H, C2), H),  'be': u(ks[5], (1, C2), H),
        'wv': u(ks[6], (H, C2), H),  'bv': u(ks[7], (1, C2), H),
        # nn.GRUCell(dim_C2_2, dim_h_o): weights stored transposed (in, out)
        'wih': u(ks[8], (C2, 3 * H), H),  'bih': u(ks[9], (1, 3 * H), H),
        'whh': u(ks[10], (H, 3 * H), H),  'bhh': u(ks[11], (1, 3 * H), H),
    }


# ----------------------------------------------------------------------------
# Pure-JAX reference (single step, literal PyTorch formulation).
# ----------------------------------------------------------------------------
def _ref_step(h, C, p):
    hp = jax.lax.Precision.HIGHEST
    H = h.shape[1]
    k = jnp.dot(h, p['wk'], precision=hp) + p['bk']
    beta_pre = jnp.dot(h, p['wb'], precision=hp) + p['bb']
    beta_pos = jnp.maximum(beta_pre, 0.0)
    beta_neg = jnp.minimum(beta_pre, 0.0)
    beta = (jnp.log1p(jnp.exp(beta_neg)) + beta_pos
            + jnp.log1p(jnp.exp(-beta_pos)) + (1.0 - np.log(2.0)))
    dots = jnp.einsum('ncd,nd->nc', C, k, precision=hp)
    c_norm = jnp.sqrt(jnp.sum(C * C, axis=2))
    k_norm = jnp.sqrt(jnp.sum(k * k, axis=1, keepdims=True))
    s = dots / (jnp.maximum(c_norm, _EPS) * jnp.maximum(k_norm, _EPS))
    w = jax.nn.softmax(s * beta, axis=1)
    r = jnp.einsum('nc,ncd->nd', w, C, precision=hp)
    gi = jnp.dot(r, p['wih'], precision=hp) + p['bih']
    gh = jnp.dot(h, p['whh'], precision=hp) + p['bhh']
    i_r, i_z, i_n = gi[:, :H], gi[:, H:2 * H], gi[:, 2 * H:]
    h_r, h_z, h_n = gh[:, :H], gh[:, H:2 * H], gh[:, 2 * H:]
    rg = jax.nn.sigmoid(i_r + h_r)
    zg = jax.nn.sigmoid(i_z + h_z)
    ng = jnp.tanh(i_n + rg * h_n)
    h_new = (1.0 - zg) * ng + zg * h
    e = jax.nn.sigmoid(jnp.dot(h_new, p['we'], precision=hp) + p['be'])
    v = jnp.dot(h_new, p['wv'], precision=hp) + p['bv']
    w3 = w[:, :, None]
    C_new = C * (1.0 - w3 * e[:, None, :]) + w3 * v[:, None, :]
    return h_new, C_new, k, r


def _ref_scan(h, C, p, T):
    hs, ks, rs = [], [], []
    for _ in range(T):
        h, C, k, r = _ref_step(h, C, p)
        hs.append(h); ks.append(k); rs.append(r)
    return jnp.stack(hs), C, jnp.stack(ks), jnp.stack(rs)


if __name__ == "__main__":
    # Shapes consistent with the module: dim_h_o = 32, dim_C2_1 = 64,
    # dim_C2_2 = 128.  Batch is packed to >= 8 cells per call (perf review).
    H, C1, C2, T = 32, 64, 128, 8

    key = jax.random.PRNGKey(0)
    k_h, k_c, k_p, k_h2, k_c2 = jax.random.split(key, 5)

    params = _init_params(k_p, H, C2)
    fused = fuse_params(params)                       # f32 weights

    # ---- single step (exactly the PyTorch module's forward), N = 8 ----------
    N = 8
    h0 = jax.random.normal(k_h, (N, H), jnp.float32)
    make_C = lambda: jax.random.normal(k_c, (N, C1, C2), jnp.float32)

    h_o, C_new, k_out, r_out = ntm_cell(h0, make_C(), fused)
    jax.block_until_ready((h_o, C_new, k_out, r_out))
    assert h_o.shape == (N, H) and C_new.shape == (N, C1, C2)
    assert k_out.shape == (N, C2) and r_out.shape == (N, C2)

    h_r, C_r, k_r, r_r = _ref_step(h0, make_C(), params)
    # tolerance covers EUP approx reciprocal / rsqrt on the softmax path
    for got, want in ((h_o, h_r), (C_new, C_r), (k_out, k_r), (r_out, r_r)):
        assert bool(jnp.allclose(got, want, atol=3e-3, rtol=3e-3))

    # ---- multi-step recurrence inside ONE kernel launch, 2 batch blocks -----
    # (grid=(2,), "parallel" -> both TensorCores on v7x)
    N2 = 16
    h0_2 = jax.random.normal(k_h2, (N2, H), jnp.float32)
    make_C2 = lambda: jax.random.normal(k_c2, (N2, C1, C2), jnp.float32)

    h_seq, C_fin, k_seq, r_seq = ntm_cell_scan(h0_2, make_C2(), fused, T)
    jax.block_until_ready((h_seq, C_fin, k_seq, r_seq))
    assert h_seq.shape == (T, N2, H) and C_fin.shape == (N2, C1, C2)
    assert k_seq.shape == (T, N2, C2) and r_seq.shape == (T, N2, C2)

    h_seq_r, C_fin_r, k_seq_r, r_seq_r = _ref_scan(h0_2, make_C2(), params, T)
    for got, want in ((h_seq, h_seq_r), (C_fin, C_fin_r),
                      (k_seq, k_seq_r), (r_seq, r_seq_r)):
        assert bool(jnp.allclose(got, want, atol=1.5e-2, rtol=1.5e-2))

    # ---- bf16 MXU-operand variant (v6e / v7x optimization) ------------------
    fused_bf16 = fuse_params(params, mxu_dtype=jnp.bfloat16)
    outs_bf16 = ntm_cell_scan(h0_2, make_C2(), fused_bf16, T)
    jax.block_until_ready(outs_bf16)
    for o in outs_bf16:
        assert bool(jnp.all(jnp.isfinite(o)))

    # TODO(synk): the `o.v > 0` att/mem visualization buffers and smd.norm_grad
    # (backward-only gradient hooks) have no forward effect and are not modeled.
    print("KERNEL_OK")
</pallas_src>

<mosaic_0001>
module attributes {stable_mosaic.version = 11 : i64} {
  func.func @_ntm_scan_kernel(%arg0: i32, %arg1: memref<8x32xf32, #tpu.memory_space<vmem>>, %arg2: memref<8x64x128xf32, #tpu.memory_space<vmem>>, %arg3: memref<32x384xf32, #tpu.memory_space<vmem>>, %arg4: memref<1x384xf32, #tpu.memory_space<vmem>>, %arg5: memref<128x128xf32, #tpu.memory_space<vmem>>, %arg6: memref<1x128xf32, #tpu.memory_space<vmem>>, %arg7: memref<32x256xf32, #tpu.memory_space<vmem>>, %arg8: memref<1x256xf32, #tpu.memory_space<vmem>>, %arg9: memref<1x8x32xf32, #tpu.memory_space<vmem>>, %arg10: memref<8x64x128xf32, #tpu.memory_space<vmem>>, %arg11: memref<1x8x128xf32, #tpu.memory_space<vmem>>, %arg12: memref<1x8x128xf32, #tpu.memory_space<vmem>>) attributes {dimension_semantics = [#tpu.dimension_semantics<parallel>], iteration_bounds = array<i64: 1>, scalar_prefetch = 0 : i64, scratch_operands = 0 : i64, tpu.core_type = #tpu.core_type<tc>, window_params = [{transform_indices = @transform_0, window_bounds = array<i64: 8, 32>}, {transform_indices = @transform_1, window_bounds = array<i64: 8, 64, 128>}, {pipeline_mode = #tpu.pipeline_mode<synchronous>, transform_indices = @transform_2, window_bounds = array<i64: 32, 384>}, {pipeline_mode = #tpu.pipeline_mode<synchronous>, transform_indices = @transform_3, window_bounds = array<i64: 1, 384>}, {pipeline_mode = #tpu.pipeline_mode<synchronous>, transform_indices = @transform_4, window_bounds = array<i64: 128, 128>}, {pipeline_mode = #tpu.pipeline_mode<synchronous>, transform_indices = @transform_5, window_bounds = array<i64: 1, 128>}, {pipeline_mode = #tpu.pipeline_mode<synchronous>, transform_indices = @transform_6, window_bounds = array<i64: 32, 256>}, {pipeline_mode = #tpu.pipeline_mode<synchronous>, transform_indices = @transform_7, window_bounds = array<i64: 1, 256>}, {transform_indices = @transform_8, window_bounds = array<i64: 1, 8, 32>}, {transform_indices = @transform_9, window_bounds = array<i64: 8, 64, 128>}, {transform_indices = @transform_10, window_bounds = array<i64: 1, 8, 128>}, {transform_indices = @transform_11, window_bounds = array<i64: 1, 8, 128>}]} {
    %c0 = arith.constant 0 : index
    %c0_0 = arith.constant 0 : index
    %0 = vector.load %arg3[%c0, %c0_0] : memref<32x384xf32, #tpu.memory_space<vmem>>, vector<32x384xf32>
    %c0_1 = arith.constant 0 : index
    %c0_2 = arith.constant 0 : index
    %1 = vector.load %arg4[%c0_1, %c0_2] : memref<1x384xf32, #tpu.memory_space<vmem>>, vector<1x384xf32>
    %c0_3 = arith.constant 0 : index
    %c0_4 = arith.constant 0 : index
    %2 = vector.load %arg5[%c0_3, %c0_4] : memref<128x128xf32, #tpu.memory_space<vmem>>, vector<128x128xf32>
    %c0_5 = arith.constant 0 : index
    %c0_6 = arith.constant 0 : index
    %3 = vector.load %arg6[%c0_5, %c0_6] : memref<1x128xf32, #tpu.memory_space<vmem>>, vector<1x128xf32>
    %c0_7 = arith.constant 0 : index
    %c0_8 = arith.constant 0 : index
    %4 = vector.load %arg7[%c0_7, %c0_8] : memref<32x256xf32, #tpu.memory_space<vmem>>, vector<32x256xf32>
    %c0_9 = arith.constant 0 : index
    %c0_10 = arith.constant 0 : index
    %5 = vector.load %arg8[%c0_9, %c0_10] : memref<1x256xf32, #tpu.memory_space<vmem>>, vector<1x256xf32>
    %c0_11 = arith.constant 0 : index
    %c0_12 = arith.constant 0 : index
    %c0_13 = arith.constant 0 : index
    %6 = vector.load %arg2[%c0_11, %c0_12, %c0_13] : memref<8x64x128xf32, #tpu.memory_space<vmem>>, vector<8x64x128xf32>
    %c0_14 = arith.constant 0 : index
    %c0_15 = arith.constant 0 : index
    %c0_16 = arith.constant 0 : index
    %7 = vector.load %arg10[%c0_14, %c0_15, %c0_16] : memref<8x64x128xf32, #tpu.memory_space<vmem>>, vector<8x64x128xf32>
    tpu.vector_store %arg10[%c0_14, %c0_15, %c0_16], %6 {strides = array<i32>} : memref<8x64x128xf32, #tpu.memory_space<vmem>>, vector<8x64x128xf32>,
    %c0_17 = arith.constant 0 : index
    %c0_18 = arith.constant 0 : index
    %8 = vector.load %arg1[%c0_17, %c0_18] : memref<8x32xf32, #tpu.memory_space<vmem>>, vector<8x32xf32>
    %c0_i32 = arith.constant 0 : i32
    %c0_19 = arith.constant 0 : index
    %c0_20 = arith.constant 0 : index
    %c0_21 = arith.constant 0 : index
    %9 = vector.load %arg10[%c0_19, %c0_20, %c0_21] : memref<8x64x128xf32, #tpu.memory_space<vmem>>, vector<8x64x128xf32>
    %cst = arith.constant dense<0.000000e+00> : vector<8x384xf32>
    %10 = tpu.matmul %8, %0, %cst {dimension_numbers = #tpu.dot_dimension_numbers<[1], [0], [0], [1], [0, 0, 1, 1], [], []>} : vector<8x32xf32>, vector<32x384xf32>, vector<8x384xf32> -> vector<8x384xf32>
    %11 = vector.broadcast %1 : vector<1x384xf32> to vector<8x384xf32>
    %12 = arith.addf %10, %11 : vector<8x384xf32>
    %13 = vector.extract_strided_slice %12 {offsets = [0, 0], sizes = [8, 128], strides = [1, 1]} : vector<8x384xf32> to vector<8x128xf32>
    %14 = vector.extract_strided_slice %12 {offsets = [0, 128], sizes = [8, 128], strides = [1, 1]} : vector<8x384xf32> to vector<8x128xf32>
    %15 = vector.extract_strided_slice %12 {offsets = [0, 256], sizes = [8, 1], strides = [1, 1]} : vector<8x384xf32> to vector<8x1xf32>
    %cst_22 = arith.constant 0.000000e+00 : f32
    %16 = vector.broadcast %cst_22 : f32 to vector<8x1xf32>
    %17 = arith.maximumf %15, %16 : vector<8x1xf32>
    %18 = math.absf %15 : vector<8x1xf32>
    %cst_23 = arith.constant 0.000000e+00 : f32
    %19 = vector.broadcast %cst_23 : f32 to vector<8x1xf32>
    %20 = arith.subf %19, %18 : vector<8x1xf32>
    %21 = math.exp %20 : vector<8x1xf32>
    %22 = math.log1p %21 : vector<8x1xf32>
    %23 = arith.addf %17, %22 : vector<8x1xf32>
    %cst_24 = arith.constant 1.000000e+00 : f32
    %24 = vector.broadcast %cst_24 : f32 to vector<8x1xf32>
    %25 = arith.addf %23, %24 : vector<8x1xf32>
    %26 = vector.shape_cast %13 : vector<8x128xf32> to vector<8x1x128xf32>
    %27 = vector.broadcast %26 : vector<8x1x128xf32> to vector<8x64x128xf32>
    %28 = arith.mulf %9, %27 : vector<8x64x128xf32>
    %cst_25 = arith.constant dense<0.000000e+00> : vector<8x64xf32>
    %29 = vector.multi_reduction <add>, %28, %cst_25 [2] : vector<8x64x128xf32> to vector<8x64xf32>
    %30 = arith.mulf %9, %9 : vector<8x64x128xf32>
    %cst_26 = arith.constant dense<0.000000e+00> : vector<8x64xf32>
    %31 = vector.multi_reduction <add>, %30, %cst_26 [2] : vector<8x64x128xf32> to vector<8x64xf32>
    %32 = arith.mulf %13, %13 : vector<8x128xf32>
    %cst_27 = arith.constant dense<0.000000e+00> : vector<8xf32>
    %33 = vector.multi_reduction <add>, %32, %cst_27 [1] : vector<8x128xf32> to vector<8xf32>
    %34 = vector.shape_cast %33 : vector<8xf32> to vector<8x1xf32>
    %cst_28 = arith.constant 1.000000e-16 : f32
    %35 = vector.broadcast %cst_28 : f32 to vector<8x64xf32>
    %36 = arith.maximumf %31, %35 : vector<8x64xf32>
    %cst_29 = arith.constant 1.000000e-16 : f32
    %37 = vector.broadcast %cst_29 : f32 to vector<8x1xf32>
    %38 = arith.maximumf %34, %37 : vector<8x1xf32>
    %39 = vector.broadcast %38 : vector<8x1xf32> to vector<8x64xf32>
    %40 = arith.mulf %36, %39 : vector<8x64xf32>
    %41 = math.rsqrt %40 : vector<8x64xf32>
    %42 = arith.mulf %29, %41 : vector<8x64xf32>
    %43 = vector.broadcast %25 : vector<8x1xf32> to vector<8x64xf32>
    %44 = arith.mulf %42, %43 : vector<8x64xf32>
    %cst_30 = arith.constant dense<0xFF800000> : vector<8xf32>
    %45 = vector.multi_reduction <maximumf>, %44, %cst_30 [1] : vector<8x64xf32> to vector<8xf32>
    %46 = vector.shape_cast %45 : vector<8xf32> to vector<8x1xf32>
    %47 = vector.broadcast %46 : vector<8x1xf32> to vector<8x64xf32>
    %48 = arith.subf %44, %47 : vector<8x64xf32>
    %49 = math.exp %48 : vector<8x64xf32>
    %cst_31 = arith.constant dense<0.000000e+00> : vector<8xf32>
    %50 = vector.multi_reduction <add>, %49, %cst_31 [1] : vector<8x64xf32> to vector<8xf32>
    %51 = vector.shape_cast %50 : vector<8xf32> to vector<8x1xf32>
    %52 = tpu.reciprocal %51 {approx = true} : vector<8x1xf32> -> vector<8x1xf32>
    %53 = vector.broadcast %52 : vector<8x1xf32> to vector<8x64xf32>
    %54 = arith.mulf %49, %53 : vector<8x64xf32>
    %55 = vector.shape_cast %54 : vector<8x64xf32> to vector<8x64x1xf32>
    %56 = vector.broadcast %55 : vector<8x64x1xf32> to vector<8x64x128xf32>
    %57 = arith.mulf %9, %56 : vector<8x64x128xf32>
    %cst_32 = arith.constant dense<0.000000e+00> : vector<8x128xf32>
    %58 = vector.multi_reduction <add>, %57, %cst_32 [1] : vector<8x64x128xf32> to vector<8x128xf32>
    %cst_33 = arith.constant dense<0.000000e+00> : vector<8x128xf32>
    %59 = tpu.matmul %58, %2, %cst_33 {dimension_numbers = #tpu.dot_dimension_numbers<[1], [0], [0], [1], [0, 0, 1, 1], [], []>} : vector<8x128xf32>, vector<128x128xf32>, vector<8x128xf32> -> vector<8x128xf32>
    %60 = vector.broadcast %3 : vector<1x128xf32> to vector<8x128xf32>
    %61 = arith.addf %59, %60 : vector<8x128xf32>
    %62 = arith.addf %61, %14 : vector<8x128xf32>
    %63 = vector.extract_strided_slice %62 {offsets = [0, 0], sizes = [8, 64], strides = [1, 1]} : vector<8x128xf32> to vector<8x64xf32>
    %64 = arith.negf %63 : vector<8x64xf32>
    %65 = math.exp %64 : vector<8x64xf32>
    %cst_34 = arith.constant 1.000000e+00 : f32
    %66 = vector.broadcast %cst_34 : f32 to vector<8x64xf32>
    %67 = arith.addf %66, %65 : vector<8x64xf32>
    %68 = arith.divf %66, %67 : vector<8x64xf32>
    %69 = vector.extract_strided_slice %68 {offsets = [0, 0], sizes = [8, 32], strides = [1, 1]} : vector<8x64xf32> to vector<8x32xf32>
    %70 = vector.extract_strided_slice %68 {offsets = [0, 32], sizes = [8, 32], strides = [1, 1]} : vector<8x64xf32> to vector<8x32xf32>
    %71 = vector.extract_strided_slice %62 {offsets = [0, 64], sizes = [8, 32], strides = [1, 1]} : vector<8x128xf32> to vector<8x32xf32>
    %cst_35 = arith.constant 1.000000e+00 : f32
    %72 = vector.broadcast %cst_35 : f32 to vector<8x32xf32>
    %73 = arith.subf %69, %72 : vector<8x32xf32>
    %74 = vector.extract_strided_slice %14 {offsets = [0, 64], sizes = [8, 32], strides = [1, 1]} : vector<8x128xf32> to vector<8x32xf32>
    %75 = arith.mulf %73, %74 : vector<8x32xf32>
    %76 = arith.addf %71, %75 : vector<8x32xf32>
    %77 = math.tanh %76 : vector<8x32xf32>
    %cst_36 = arith.constant 1.000000e+00 : f32
    %78 = vector.broadcast %cst_36 : f32 to vector<8x32xf32>
    %79 = arith.subf %78, %70 : vector<8x32xf32>
    %80 = arith.mulf %79, %77 : vector<8x32xf32>
    %81 = arith.mulf %70, %8 : vector<8x32xf32>
    %82 = arith.addf %80, %81 : vector<8x32xf32>
    %cst_37 = arith.constant dense<0.000000e+00> : vector<8x256xf32>
    %83 = tpu.matmul %82, %4, %cst_37 {dimension_numbers = #tpu.dot_dimension_numbers<[1], [0], [0], [1], [0, 0, 1, 1], [], []>} : vector<8x32xf32>, vector<32x256xf32>, vector<8x256xf32> -> vector<8x256xf32>
    %84 = vector.broadcast %5 : vector<1x256xf32> to vector<8x256xf32>
    %85 = arith.addf %83, %84 : vector<8x256xf32>
    %86 = vector.extract_strided_slice %85 {offsets = [0, 0], sizes = [8, 128], strides = [1, 1]} : vector<8x256xf32> to vector<8x128xf32>
    %87 = arith.negf %86 : vector<8x128xf32>
    %88 = math.exp %87 : vector<8x128xf32>
    %cst_38 = arith.constant 1.000000e+00 : f32
    %89 = vector.broadcast %cst_38 : f32 to vector<8x128xf32>
    %90 = arith.addf %89, %88 : vector<8x128xf32>
    %91 = arith.divf %89, %90 : vector<8x128xf32>
    %92 = vector.extract_strided_slice %85 {offsets = [0, 128], sizes = [8, 128], strides = [1, 1]} : vector<8x256xf32> to vector<8x128xf32>
    %93 = vector.shape_cast %54 : vector<8x64xf32> to vector<8x64x1xf32>
    %94 = vector.shape_cast %91 : vector<8x128xf32> to vector<8x1x128xf32>
    %95 = vector.broadcast %93 : vector<8x64x1xf32> to vector<8x64x128xf32>
    %96 = vector.broadcast %94 : vector<8x1x128xf32> to vector<8x64x128xf32>
    %97 = arith.mulf %95, %96 : vector<8x64x128xf32>
    %cst_39 = arith.constant 1.000000e+00 : f32
    %98 = vector.broadcast %cst_39 : f32 to vector<8x64x128xf32>
    %99 = arith.subf %98, %97 : vector<8x64x128xf32>
    %100 = arith.mulf %9, %99 : vector<8x64x128xf32>
    %101 = vector.shape_cast %92 : vector<8x128xf32> to vector<8x1x128xf32>
    %102 = vector.broadcast %93 : vector<8x64x1xf32> to vector<8x64x128xf32>
    %103 = vector.broadcast %101 : vector<8x1x128xf32> to vector<8x64x128xf32>
    %104 = arith.mulf %102, %103 : vector<8x64x128xf32>
    %105 = arith.addf %100, %104 : vector<8x64x128xf32>
    %c0_40 = arith.constant 0 : index
    %c0_41 = arith.constant 0 : index
    %c0_42 = arith.constant 0 : index
    %106 = vector.load %arg10[%c0_40, %c0_41, %c0_42] : memref<8x64x128xf32, #tpu.memory_space<vmem>>, vector<8x64x128xf32>
    tpu.vector_store %arg10[%c0_40, %c0_41, %c0_42], %105 {strides = array<i32>} : memref<8x64x128xf32, #tpu.memory_space<vmem>>, vector<8x64x128xf32>,
    %107 = arith.index_cast %c0_i32 : i32 to index
    %c0_43 = arith.constant 0 : index
    %c0_44 = arith.constant 0 : index
    %108 = vector.load %arg9[%107, %c0_43, %c0_44] : memref<1x8x32xf32, #tpu.memory_space<vmem>>, vector<1x8x32xf32>
    %109 = vector.shape_cast %108 : vector<1x8x32xf32> to vector<8x32xf32>
    %110 = vector.shape_cast %82 : vector<8x32xf32> to vector<1x8x32xf32>
    tpu.vector_store %arg9[%107, %c0_43, %c0_44], %110 {strides = array<i32>} : memref<1x8x32xf32, #tpu.memory_space<vmem>>, vector<1x8x32xf32>,
    %111 = arith.index_cast %c0_i32 : i32 to index
    %c0_45 = arith.constant 0 : index
    %c0_46 = arith.constant 0 : index
    %112 = vector.load %arg11[%111, %c0_45, %c0_46] : memref<1x8x128xf32, #tpu.memory_space<vmem>>, vector<1x8x128xf32>
    %113 = vector.shape_cast %112 : vector<1x8x128xf32> to vector<8x128xf32>
    %114 = vector.shape_cast %13 : vector<8x128xf32> to vector<1x8x128xf32>
    tpu.vector_store %arg11[%111, %c0_45, %c0_46], %114 {strides = array<i32>} : memref<1x8x128xf32, #tpu.memory_space<vmem>>, vector<1x8x128xf32>,
    %115 = arith.index_cast %c0_i32 : i32 to index
    %c0_47 = arith.constant 0 : index
    %c0_48 = arith.constant 0 : index
    %116 = vector.load %arg12[%115, %c0_47, %c0_48] : memref<1x8x128xf32, #tpu.memory_space<vmem>>, vector<1x8x128xf32>
    %117 = vector.shape_cast %116 : vector<1x8x128xf32> to vector<8x128xf32>
    %118 = vector.shape_cast %58 : vector<8x128xf32> to vector<1x8x128xf32>
    tpu.vector_store %arg12[%115, %c0_47, %c0_48], %118 {strides = array<i32>} : memref<1x8x128xf32, #tpu.memory_space<vmem>>, vector<1x8x128xf32>,
    %c1_i32 = arith.constant 1 : i32
    return
  }
  func.func @transform_0(%arg0: i32) -> (i32, i32) {
    %c0_i32 = arith.constant 0 : i32
    %c0_i32_0 = arith.constant 0 : i32
    return %arg0, %c0_i32 : i32, i32
  }
  func.func @transform_1(%arg0: i32) -> (i32, i32, i32) {
    %c0_i32 = arith.constant 0 : i32
    %c0_i32_0 = arith.constant 0 : i32
    %c0_i32_1 = arith.constant 0 : i32
    return %arg0, %c0_i32, %c0_i32_0 : i32, i32, i32
  }
  func.func @transform_2(%arg0: i32) -> (i32, i32) {
    %c0_i32 = arith.constant 0 : i32
    %c0_i32_0 = arith.constant 0 : i32
    %c0_i32_1 = arith.constant 0 : i32
    return %c0_i32, %c0_i32_0 : i32, i32
  }
  func.func @transform_3(%arg0: i32) -> (i32, i32) {
    %c0_i32 = arith.constant 0 : i32
    %c0_i32_0 = arith.constant 0 : i32
    %c0_i32_1 = arith.constant 0 : i32
    return %c0_i32, %c0_i32_0 : i32, i32
  }
  func.func @transform_4(%arg0: i32) -> (i32, i32) {
    %c0_i32 = arith.constant 0 : i32
    %c0_i32_0 = arith.constant 0 : i32
    %c0_i32_1 = arith.constant 0 : i32
    return %c0_i32, %c0_i32_0 : i32, i32
  }
  func.func @transform_5(%arg0: i32) -> (i32, i32) {
    %c0_i32 = arith.constant 0 : i32
    %c0_i32_0 = arith.constant 0 : i32
    %c0_i32_1 = arith.constant 0 : i32
    return %c0_i32, %c0_i32_0 : i32, i32
  }
  func.func @transform_6(%arg0: i32) -> (i32, i32) {
    %c0_i32 = arith.constant 0 : i32
    %c0_i32_0 = arith.constant 0 : i32
    %c0_i32_1 = arith.constant 0 : i32
    return %c0_i32, %c0_i32_0 : i32, i32
  }
  func.func @transform_7(%arg0: i32) -> (i32, i32) {
    %c0_i32 = arith.constant 0 : i32
    %c0_i32_0 = arith.constant 0 : i32
    %c0_i32_1 = arith.constant 0 : i32
    return %c0_i32, %c0_i32_0 : i32, i32
  }
  func.func @transform_8(%arg0: i32) -> (i32, i32, i32) {
    %c0_i32 = arith.constant 0 : i32
    %c0_i32_0 = arith.constant 0 : i32
    %c0_i32_1 = arith.constant 0 : i32
    return %c0_i32, %arg0, %c0_i32_0 : i32, i32, i32
  }
  func.func @transform_9(%arg0: i32) -> (i32, i32, i32) {
    %c0_i32 = arith.constant 0 : i32
    %c0_i32_0 = arith.constant 0 : i32
    %c0_i32_1 = arith.constant 0 : i32
    return %arg0, %c0_i32, %c0_i32_0 : i32, i32, i32
  }
  func.func @transform_10(%arg0: i32) -> (i32, i32, i32) {
    %c0_i32 = arith.constant 0 : i32
    %c0_i32_0 = arith.constant 0 : i32
    %c0_i32_1 = arith.constant 0 : i32
    return %c0_i32, %arg0, %c0_i32_0 : i32, i32, i32
  }
  func.func @transform_11(%arg0: i32) -> (i32, i32, i32) {
    %c0_i32 = arith.constant 0 : i32
    %c0_i32_0 = arith.constant 0 : i32
    %c0_i32_1 = arith.constant 0 : i32
    return %c0_i32, %arg0, %c0_i32_0 : i32, i32, i32
  }
}

</mosaic_0001>

<bundles_post_ra>
// kernel: ntm_cell_scan.1
= control target key start
LH: loop header
LB: loop body
LE: loop exit
PB: predicated region body
PF: predicated region fallthrough
CT: control target
= control target key end

     0   :  { %17 = vsyncpa [#allocation3], 0  ;;  %s8730_s0 = inlined_call_operand.vmem [shape: f32[8,32], index: 0, kind: input, shape index: {}]   ;;  %s8731_s1 = inlined_call_operand.hbm [shape: f32[8,64,128], index: 1, kind: input, shape index: {}, may-alias: {1,9}]   ;;  %s8732_s2 = inlined_call_operand.vmem [shape: f32[32,384], index: 2, kind: input, shape index: {}]   ;;  %s8733_s3 = inlined_call_operand.vmem [shape: f32[1,384], index: 3, kind: input, shape index: {}]   ;;  %s8734_s4 = inlined_call_operand.vmem [shape: f32[128,128], index: 4, kind: input, shape index: {}]   ;;  %s8735_s5 = inlined_call_operand.vmem [shape: f32[1,128], index: 5, kind: input, shape index: {}]   ;;  %s8736_s6 = inlined_call_operand.vmem [shape: f32[32,256], index: 6, kind: input, shape index: {}]   ;;  %s8737_s7 = inlined_call_operand.vmem [shape: f32[1,256], index: 7, kind: input, shape index: {}]   ;;  %s8738_s8 = inlined_call_operand.hbm [shape: f32[1,8,32], index: 8, kind: output, shape index: {0}]   ;;  %s8739_s9 = inlined_call_operand.hbm [shape: f32[8,64,128], index: 9, kind: output, shape index: {1}, may-alias: {1,9}]   ;;  %s8740_s10 = inlined_call_operand.hbm [shape: f32[1,8,128], index: 10, kind: output, shape index: {2}]   ;;  %s8741_s11 = inlined_call_operand.hbm [shape: f32[1,8,128], index: 11, kind: output, shape index: {3}]  }
   0x1   :  { %18 = vsyncpa [#allocation4], 0 }
   0x2   :  { %19 = vsyncpa [#allocation7], 0 }
   0x3   :  { %20 = vsyncpa [#allocation10], 0  ;;  %s4790_s17 = smov [#allocation2]   ;;  %s4672_s21 = scalar_lea.hbm %s8731_s1, 8192 }
   0x4   :  { %s28_s18 = sshll.u32 %s4790_s17, 4  ;;  %p4673_p0 = scmp.ne.s32.totalorder %s8731_s1, %s4672_s21  ;;  %s29_s18 = int_to_ptr.vmem [resolvable:$true] %s28_s18 }
   0x5   :  { %p4676_p1 = scmp.lt.u32.totalorder %s4672_s21, %s8731_s1 }
   0x7   :  { %p4678_p2 = pnand %p4676_p1, %p4673_p0 }
   0x9   :  { %4681 = shalt.err (!%p4678_p2)
}
   0xa   :  { %s4682_s26 = scalar_lea.vmem %s29_s18, 8192  ;;  %p4687_p4 = scmp.lt.s32.totalorder %s29_s18, %s29_s18 }
   0xb   :  { %p4683_p3 = scmp.ne.s32.totalorder %s29_s18, %s4682_s26  ;;  %p4688_p5 = scmp.lt.s32.totalorder %s4682_s26, %s4682_s26 }
   0xd   :  { %p4689_p6 = por %p4688_p5, %p4687_p4 }
   0xf   :  { %p4690_p7 = pnand %p4689_p6, %p4683_p3 }
  0x11   :  { %4693 = shalt.err (!%p4690_p7)
}
  0x12   :  { %s4791_s27 = smov 128   ;;  %s4792_s28 = smov 8  }
  0x13   :  { %34 = dma.hbm_to_vmem [thread:$0]  %s8731_s1, 8192, %s29_s18, [#allocation3], %s4791_s27, %s4791_s27, %s4792_s28  }
  0x14   :  { %4782 = dma.done.wait [#allocation3], 8192  }
  0x15   :  { %4783 = vsyncadd [#allocation3], 4294959104  ;;  %v4793_v0 = vmov 0.0   ;;  %v8742_v1 = vmov 0.0|0.0   ;;  %vm4795_vm0 = vmmov 0   ;;  %v51_v2 = vld [vmem:[%s8732_s2 + $0x8] sm:$0xff] }
  0x16   :  { %366 = vmatprep.mubr.f32.mxu1 %v4793_v0  ;;  %4281 = vmatprep.subr.bf16.mxu0 %v8742_v1  ;;  %v54_v3 = vld [vmem:[%s8732_s2 + $0x20] sm:$0xff]  ;;  %v53_v6 = vld [vmem:[%s8732_s2 + $0x18] sm:$0xff]  ;;  %v60_v8 = vld [vmem:[%s8732_s2 + $0x50] sm:$0xff]  ;;  %vm298_vm1 = vcmask 261120   ;;  %vm1609_vm3 = vcmask 130112   ;;  %vm1616_vm4 = vcmask 195712  }
  0x17   :  { %4264 = vmatprep.mubr.msk.f32.mxu0 %vm4795_vm0, %v4793_v0  ;;  %v50_v4 = vld [vmem:[%s8732_s2] sm:$0xff]  ;;  %v4267_v5 = vpack.c.bf16 %v54_v3, %v51_v2  ;;  %v57_v7 = vld [vmem:[%s8732_s2 + $0x38] sm:$0xff]  ;;  %v56_v11 = vld [vmem:[%s8732_s2 + $0x30] sm:$0xff]  ;;  %vm1623_vm5 = vcmask 261312   ;;  %vm1630_vm6 = vcmask 326912   ;;  %vm1637_vm7 = vcmask 392512  }
  0x18   :  { %v4269_v9 = vpack.c.bf16 %v53_v6, %v50_v4  ;;  %v4271_v10 = vpack.c.bf16 %v60_v8, %v57_v7  ;;  %v59_v12 = vld [vmem:[%s8732_s2 + $0x48] sm:$0xff]  ;;  %v4908_v14 = vld [vmem:[#allocation2] sm:$0xff]  ;;  %v52_v16 = vld [vmem:[%s8732_s2 + $0x10] sm:$0xff]  ;;  %vm1644_vm8 = vcmask 458112   ;;  %vm1651_vm9 = vcmask 523712   ;;  %s4800_s1 = smov 96  }
  0x19   :  { %4268 = vmatprep.subr.bf16.mxu1 %v4267_v5  ;;  %v4273_v13 = vpack.c.bf16 %v59_v12, %v56_v11  ;;  %v4910_v15 = vld [vmem:[#allocation2 + $0x48] sm:$0xff]  ;;  %v741_v18 = vmul.f32 %v4908_v14, %v4908_v14  ;;  %v4924_v21 = vld [vmem:[#allocation2 + $0x40] sm:$0xff]  ;;  %v4931_v25 = vld [vmem:[#allocation2 + $0x50] sm:$0xff]  ;;  %vm1926_vm10 = vcmask 1041409   ;;  %vm1928_vm11 = vcmask 1042434  }
  0x1a   :  { %4270 = vmatpush1.bf16.msra.mxu1 %v4269_v9  ;;  %v55_v17 = vld [vmem:[%s8732_s2 + $0x28] sm:$0xff]  ;;  %v750_v22 = vmul.f32 %v4910_v15, %v4910_v15  ;;  %v217_v23 = vld [vmem:[%s8730_s0] sm:$0xff]  ;;  %v61_v27 = vld [vmem:[%s8732_s2 + $0x58] sm:$0xff]  ;;  %v749_v28 = vmul.f32 %v4924_v21, %v4924_v21  ;;  %v751_v30 = vmul.f32 %v4931_v25, %v4931_v25  ;;  %vm1930_vm12 = vcmask 1043459  }
  0x1b   :  { %4272 = vmatprep.subr.bf16.mxu1 %v4271_v10  ;;  %v4920_v19 = vld [vmem:[#allocation2 + $0x8] sm:$0xff]  ;;  %805 = vadd.xlane.f32.xlu0 %v741_v18  ;;  %v4276_v24 = vpack.c.bf16 %v55_v17, %v52_v16  ;;  %v58_v26 = vld [vmem:[%s8732_s2 + $0x40] sm:$0xff]  ;;  %v4942_v29 = vld [vmem:[#allocation2 + $0x10] sm:$0xff]  ;;  %vm1932_vm13 = vcmask 1044484   ;;  %vm1934_vm14 = vcmask 1045509   ;;  %vm1936_vm15 = vcmask 1046534  }
  0x1c   :  { %v742_v20 = vmul.f32 %v4920_v19, %v4920_v19  ;;  %v4279_v31 = vpack.c.bf16 %v61_v27, %v58_v26  ;;  %v4949_v32 = vld [vmem:[#allocation2 + $0x88] sm:$0xff]  ;;  %v743_v33 = vmul.f32 %v4942_v29, %v4942_v29  ;;  %v4954_v34 = vld [vmem:[#allocation2 + $0x80] sm:$0xff]  ;;  %v4958_v36 = vld [vmem:[#allocation2 + $0x58] sm:$0xff] }
  0x1d   :  { %v758_v35 = vmul.f32 %v4949_v32, %v4949_v32  ;;  %v757_v37 = vmul.f32 %v4954_v34, %v4954_v34  ;;  %v4962_v38 = vld [vmem:[#allocation2 + $0x18] sm:$0xff]  ;;  %v752_v39 = vmul.f32 %v4958_v36, %v4958_v36  ;;  %v4967_v40 = vld [vmem:[#allocation2 + $0xc0] sm:$0xff]  ;;  %v4972_v42 = vld [vmem:[#allocation2 + $0x90] sm:$0xff] }
  0x1e   :  { %4274 = vmatpush1.bf16.msra.mxu1 %v4273_v13  ;;  %807 = vadd.xlane.f32.xlu1 %v742_v20  ;;  %v744_v41 = vmul.f32 %v4962_v38, %v4962_v38  ;;  %v765_v43 = vmul.f32 %v4967_v40, %v4967_v40  ;;  %v4976_v44 = vld [vmem:[#allocation2 + $0x20] sm:$0xff]  ;;  %v759_v45 = vmul.f32 %v4972_v42, %v4972_v42  ;;  %v4980_v46 = vld [vmem:[#allocation2 + $0xc8] sm:$0xff]  ;;  %v4984_v48 = vld [vmem:[#allocation2 + $0x98] sm:$0xff] }
  0x1f   :  { %4275 = vmatprep.subr.bf16.mxu1 %v8742_v1  ;;  %823 = vadd.xlane.f32.xlu0 %v750_v22  ;;  %v745_v47 = vmul.f32 %v4976_v44, %v4976_v44  ;;  %v766_v49 = vmul.f32 %v4980_v46, %v4980_v46  ;;  %v4988_v50 = vld [vmem:[#allocation2 + $0x60] sm:$0xff]  ;;  %v760_v51 = vmul.f32 %v4984_v48, %v4984_v48  ;;  %v4996_v54 = vld [vmem:[#allocation2 + $0xd0] sm:$0xff]  ;;  %v5000_v56 = vld [vmem:[#allocation2 + $0x28] sm:$0xff] }
  0x20   :  { %v4992_v52 = vld [vmem:[#allocation2 + $0x100] sm:$0xff]  ;;  %v753_v53 = vmul.f32 %v4988_v50, %v4988_v50  ;;  %v767_v57 = vmul.f32 %v4996_v54, %v4996_v54  ;;  %v5004_v58 = vld [vmem:[#allocation2 + $0x108] sm:$0xff]  ;;  %v746_v59 = vmul.f32 %v5000_v56, %v5000_v56  ;;  %v5020_v3 = vld [vmem:[#allocation2 + $0xd8] sm:$0xff] }
  0x21   :  { %4192 = vmatmul.mubr.msk.f32.vlgmr.msra.gmra.mrb[0].mxu1 %vm298_vm1, %v217_v23  ;;  %v773_v55 = vmul.f32 %v4992_v52, %v4992_v52  ;;  %v5008_v60 = vld [vmem:[#allocation2 + $0xa0] sm:$0xff]  ;;  %v774_v61 = vmul.f32 %v5004_v58, %v5004_v58  ;;  %v5012_v62 = vld [vmem:[#allocation2 + $0x68] sm:$0xff]  ;;  %v768_v6 = vmul.f32 %v5020_v3, %v5020_v3  ;;  %v5032_v9 = vld [vmem:[#allocation2 + $0x70] sm:$0xff] }
  0x22   :  { %4277 = vmatpush3.bf16.msra.mxu1 %v4276_v24  ;;  %4229 = vmatprep.mubr.msk.f32.mxu1 %vm4795_vm0, %v4793_v0  ;;  %v761_v63 = vmul.f32 %v5008_v60, %v5008_v60  ;;  %v754_v2 = vmul.f32 %v5012_v62, %v5012_v62  ;;  %v5024_v5 = vld [vmem:[#allocation2 + $0x148] sm:$0xff]  ;;  %v5028_v7 = vld [vmem:[#allocation2 + $0x140] sm:$0xff]  ;;  %v5036_v11 = vld [vmem:[#allocation2 + $0x30] sm:$0xff]  ;;  %v755_v12 = vmul.f32 %v5032_v9, %v5032_v9  ;;  %vm1938_vm0 = vcmask 1047559  }
  0x23   :  { %4278 = vmatprep.subr.bf16.mxu1 %v8742_v1  ;;  %821 = vadd.xlane.f32.xlu1 %v749_v28  ;;  %v782_v8 = vmul.f32 %v5024_v5, %v5024_v5  ;;  %v781_v10 = vmul.f32 %v5028_v7, %v5028_v7  ;;  %v5040_v13 = vld [vmem:[#allocation2 + $0xe0] sm:$0xff]  ;;  %v747_v16 = vmul.f32 %v5036_v11, %v5036_v11  ;;  %v5044_v17 = vld [vmem:[#allocation2 + $0xa8] sm:$0xff]  ;;  %v5048_v20 = vld [vmem:[#allocation2 + $0x150] sm:$0xff] }
  0x24   :  { %825 = vadd.xlane.f32.xlu0 %v751_v30  ;;  %v769_v18 = vmul.f32 %v5040_v13, %v5040_v13  ;;  %v762_v22 = vmul.f32 %v5044_v17, %v5044_v17  ;;  %v783_v24 = vmul.f32 %v5048_v20, %v5048_v20  ;;  %v5056_v26 = vld [vmem:[#allocation2 + $0x188] sm:$0xff]  ;;  %v5060_v28 = vld [vmem:[#allocation2 + $0x180] sm:$0xff]  ;;  %v5160_v1 = vld [vmem:[#allocation2 + $0x1b0] sm:$0xff] }
  0x25   :  { %v790_v30 = vmul.f32 %v5056_v26, %v5056_v26  ;;  %9087 = vst [vmem:[#allocation28_spill] sm:$0xff] %v5160_v1 }
  0x26   :  { %4280 = vmatpush3.bf16.msra.mxu1 %v4279_v31  ;;  %v5064_v31 = vld [vmem:[#allocation2 + $0x78] sm:$0xff] }
  0x27   :  { %809 = vadd.xlane.f32.xlu1 %v743_v33  ;;  %v789_v33 = vmul.f32 %v5060_v28, %v5060_v28 }
  0x28   :  { %839 = vadd.xlane.f32.xlu0 %v758_v35  ;;  %v5068_v35 = vld [vmem:[#allocation2 + $0x38] sm:$0xff] }
  0x29   :  { %4230 = vmatmul.mubr.msk.f32.vlgmr.msra.gmra.mrb[2].mxu1 %vm298_vm1, %v217_v23  ;;  %v5052_v23 = vld [vmem:[#allocation2 + $0x118] sm:$0xff] }
  0x2a   :  { %3553 = vmatprep.mubr.f32.mxu1 %v4793_v0  ;;  %v5016_v0 = vld [vmem:[#allocation2 + $0x110] sm:$0xff]  ;;  %v776_v27 = vmul.f32 %v5052_v23, %v5052_v23 }
  0x2b   :  { %837 = vadd.xlane.f32.xlu1 %v757_v37  ;;  %v775_v4 = vmul.f32 %v5016_v0, %v5016_v0  ;;  %v756_v37 = vmul.f32 %v5064_v31, %v5064_v31 }
  0x2c   :  { %827 = vadd.xlane.f32.xlu0 %v752_v39  ;;  %v5072_v39 = vld [vmem:[#allocation2 + $0xe8] sm:$0xff] }
  0x2f   :  { %811 = vadd.xlane.f32.xlu1 %v744_v41  ;;  %v748_v41 = vmul.f32 %v5068_v35, %v5068_v35 }
  0x30   :  { %853 = vadd.xlane.f32.xlu0 %v765_v43  ;;  %v5076_v43 = vld [vmem:[#allocation2 + $0xb0] sm:$0xff] }
  0x33   :  { %841 = vadd.xlane.f32.xlu1 %v759_v45  ;;  %v770_v45 = vmul.f32 %v5072_v39, %v5072_v39 }
  0x34   :  { %813 = vadd.xlane.f32.xlu0 %v745_v47  ;;  %v5080_v47 = vld [vmem:[#allocation2 + $0x158] sm:$0xff] }
  0x37   :  { %855 = vadd.xlane.f32.xlu1 %v766_v49  ;;  %v763_v49 = vmul.f32 %v5076_v43, %v5076_v43 }
  0x38   :  { %843 = vadd.xlane.f32.xlu0 %v760_v51  ;;  %v5084_v51 = vld [vmem:[#allocation2 + $0x120] sm:$0xff] }
  0x3b   :  { %829 = vadd.xlane.f32.xlu1 %v753_v53  ;;  %v784_v53 = vmul.f32 %v5080_v47, %v5080_v47 }
  0x3c   :  { %869 = vadd.xlane.f32.xlu0 %v773_v55  ;;  %v5088_v55 = vld [vmem:[#allocation2 + $0x1c0] sm:$0xff] }
  0x3d   :  { %9074 = vst [vmem:[#allocation15_spill] sm:$0xff] %v5088_v55 }
  0x3f   :  { %857 = vadd.xlane.f32.xlu1 %v767_v57  ;;  %v777_v57 = vmul.f32 %v5084_v51, %v5084_v51 }
  0x40   :  { %815 = vadd.xlane.f32.xlu0 %v746_v59  ;;  %v5092_v59 = vld [vmem:[#allocation2 + $0x190] sm:$0xff] }
  0x43   :  { %871 = vadd.xlane.f32.xlu1 %v774_v61  ;;  %v797_v61 = vmul.f32 %v5088_v55, %v5088_v55 }
  0x44   :  { %845 = vadd.xlane.f32.xlu0 %v761_v63  ;;  %v5096_v63 = vld [vmem:[#allocation2 + $0xb8] sm:$0xff] }
  0x47   :  { %831 = vadd.xlane.f32.xlu1 %v754_v2  ;;  %v791_v2 = vmul.f32 %v5092_v59, %v5092_v59 }
  0x48   :  { %873 = vadd.xlane.f32.xlu0 %v775_v4  ;;  %v5100_v4 = vld [vmem:[#allocation2 + $0x1c8] sm:$0xff] }
  0x49   :  { %9075 = vst [vmem:[#allocation16_spill] sm:$0xff] %v5100_v4 }
  0x4b   :  { %859 = vadd.xlane.f32.xlu1 %v768_v6  ;;  %v764_v6 = vmul.f32 %v5096_v63, %v5096_v63 }
  0x4c   :  { %887 = vadd.xlane.f32.xlu0 %v782_v8  ;;  %v5104_v8 = vld [vmem:[#allocation2 + $0x128] sm:$0xff] }
  0x4f   :  { %885 = vadd.xlane.f32.xlu1 %v781_v10  ;;  %v798_v10 = vmul.f32 %v5100_v4, %v5100_v4 }
  0x50   :  { %833 = vadd.xlane.f32.xlu0 %v755_v12  ;;  %v5108_v12 = vld [vmem:[#allocation2 + $0xf0] sm:$0xff] }
  0x51   :  { %9076 = vst [vmem:[#allocation17_spill] sm:$0xff] %v5108_v12 }
  0x53   :  { %817 = vadd.xlane.f32.xlu1 %v747_v16  ;;  %v778_v16 = vmul.f32 %v5104_v8, %v5104_v8 }
  0x54   :  { %861 = vadd.xlane.f32.xlu0 %v769_v18  ;;  %v5112_v18 = vld [vmem:[#allocation2 + $0x198] sm:$0xff] }
  0x57   :  { %847 = vadd.xlane.f32.xlu1 %v762_v22  ;;  %v771_v22 = vmul.f32 %v5108_v12, %v5108_v12 }
  0x58   :  { %889 = vadd.xlane.f32.xlu0 %v783_v24  ;;  %v5116_v24 = vld [vmem:[#allocation2 + $0x160] sm:$0xff] }
  0x59   :  { %9077 = vst [vmem:[#allocation18_spill] sm:$0xff] %v5116_v24 }
  0x5b   :  { %875 = vadd.xlane.f32.xlu1 %v776_v27  ;;  %v792_v27 = vmul.f32 %v5112_v18, %v5112_v18 }
  0x5c   :  { %903 = vadd.xlane.f32.xlu0 %v790_v30  ;;  %v5120_v30 = vld [vmem:[#allocation2 + $0xf8] sm:$0xff] }
  0x5d   :  { %9078 = vst [vmem:[#allocation19_spill] sm:$0xff] %v5120_v30 }
  0x5f   :  { %901 = vadd.xlane.f32.xlu1 %v789_v33  ;;  %v785_v33 = vmul.f32 %v5116_v24, %v5116_v24 }
  0x60   :  { %835 = vadd.xlane.f32.xlu0 %v756_v37  ;;  %v5124_v37 = vld [vmem:[#allocation2 + $0x1d0] sm:$0xff] }
  0x61   :  { %9079 = vst [vmem:[#allocation20_spill] sm:$0xff] %v5124_v37 }
  0x63   :  { %819 = vadd.xlane.f32.xlu1 %v748_v41  ;;  %v772_v41 = vmul.f32 %v5120_v30, %v5120_v30 }
  0x64   :  { %863 = vadd.xlane.f32.xlu0 %v770_v45  ;;  %v5128_v45 = vld [vmem:[#allocation2 + $0x168] sm:$0xff] }
  0x65   :  { %9080 = vst [vmem:[#allocation21_spill] sm:$0xff] %v5128_v45 }
  0x67   :  { %849 = vadd.xlane.f32.xlu1 %v763_v49  ;;  %v799_v49 = vmul.f32 %v5124_v37, %v5124_v37 }
  0x68   :  { %891 = vadd.xlane.f32.xlu0 %v784_v53  ;;  %v5132_v53 = vld [vmem:[#allocation2 + $0x130] sm:$0xff] }
  0x6b   :  { %877 = vadd.xlane.f32.xlu1 %v777_v57  ;;  %v786_v57 = vmul.f32 %v5128_v45, %v5128_v45 }
  0x6c   :  { %917 = vadd.xlane.f32.xlu0 %v797_v61  ;;  %v5136_v61 = vld [vmem:[#allocation2 + $0x1d8] sm:$0xff] }
  0x6d   :  { %9081 = vst [vmem:[#allocation22_spill] sm:$0xff] %v5136_v61 }
  0x6f   :  { %905 = vadd.xlane.f32.xlu1 %v791_v2  ;;  %v779_v2 = vmul.f32 %v5132_v53, %v5132_v53 }
  0x70   :  { %851 = vadd.xlane.f32.xlu0 %v764_v6  ;;  %v5140_v6 = vld [vmem:[#allocation2 + $0x1a0] sm:$0xff] }
  0x71   :  { %9082 = vst [vmem:[#allocation23_spill] sm:$0xff] %v5140_v6 }
  0x73   :  { %919 = vadd.xlane.f32.xlu1 %v798_v10  ;;  %v800_v10 = vmul.f32 %v5136_v61, %v5136_v61  ;;  %v5164_v61 = vld [vmem:[#allocation2 + $0x178] sm:$0xff] }
  0x74   :  { %879 = vadd.xlane.f32.xlu0 %v778_v16  ;;  %v5144_v16 = vld [vmem:[#allocation2 + $0x170] sm:$0xff]  ;;  %9088 = vst [vmem:[#allocation29_spill] sm:$0xff] %v5164_v61 }
  0x75   :  { %9083 = vst [vmem:[#allocation24_spill] sm:$0xff] %v5144_v16 }
  0x77   :  { %865 = vadd.xlane.f32.xlu1 %v771_v22  ;;  %v793_v22 = vmul.f32 %v5140_v6, %v5140_v6 }
  0x78   :  { %907 = vadd.xlane.f32.xlu0 %v792_v27  ;;  %v5148_v27 = vld [vmem:[#allocation2 + $0x138] sm:$0xff] }
  0x79   :  { %9084 = vst [vmem:[#allocation25_spill] sm:$0xff] %v5148_v27 }
  0x7b   :  { %893 = vadd.xlane.f32.xlu1 %v785_v33  ;;  %v787_v33 = vmul.f32 %v5144_v16, %v5144_v16  ;;  %v5168_v16 = vld [vmem:[#allocation2 + $0x1b8] sm:$0xff] }
  0x7c   :  { %867 = vadd.xlane.f32.xlu0 %v772_v41  ;;  %v5152_v41 = vld [vmem:[#allocation2 + $0x1e0] sm:$0xff]  ;;  %9089 = vst [vmem:[#allocation30_spill] sm:$0xff] %v5168_v16 }
  0x7d   :  { %9085 = vst [vmem:[#allocation26_spill] sm:$0xff] %v5152_v41 }
  0x7f   :  { %921 = vadd.xlane.f32.xlu1 %v799_v49  ;;  %v780_v49 = vmul.f32 %v5148_v27, %v5148_v27  ;;  %v5172_v27 = vld [vmem:[#allocation2 + $0x1e8] sm:$0xff] }
  0x80   :  { %895 = vadd.xlane.f32.xlu0 %v786_v57  ;;  %v5156_v57 = vld [vmem:[#allocation2 + $0x1a8] sm:$0xff]  ;;  %9090 = vst [vmem:[#allocation31_spill] sm:$0xff] %v5172_v27 }
  0x81   :  { %9086 = vst [vmem:[#allocation27_spill] sm:$0xff] %v5156_v57 }
  0x83   :  { %881 = vadd.xlane.f32.xlu1 %v779_v2  ;;  %v801_v2 = vmul.f32 %v5152_v41, %v5152_v41  ;;  %v5176_v41 = vld [vmem:[#allocation2 + $0x1f8] sm:$0xff] }
  0x84   :  { %923 = vadd.xlane.f32.xlu0 %v800_v10  ;;  %v794_v10 = vmul.f32 %v5156_v57, %v5156_v57  ;;  %9091 = vst [vmem:[#allocation32_spill] sm:$0xff] %v5176_v41  ;;  %v5180_v57 = vld [vmem:[#allocation2 + $0x1f0] sm:$0xff] }
  0x85   :  { %9092 = vst [vmem:[#allocation33_spill] sm:$0xff] %v5180_v57 }
  0x87   :  { %909 = vadd.xlane.f32.xlu1 %v793_v22  ;;  %v795_v22 = vmul.f32 %v5160_v1, %v5160_v1  ;;  %v803_v1 = vmul.f32 %v5180_v57, %v5180_v57 }
  0x88   :  { %897 = vadd.xlane.f32.xlu0 %v787_v33  ;;  %v788_v33 = vmul.f32 %v5164_v61, %v5164_v61 }
  0x8b   :  { %883 = vadd.xlane.f32.xlu1 %v780_v49  ;;  %v796_v49 = vmul.f32 %v5168_v16, %v5168_v16 }
  0x8c   :  { %925 = vadd.xlane.f32.xlu0 %v801_v2  ;;  %v802_v2 = vmul.f32 %v5172_v27, %v5172_v27 }
  0x8f   :  { %911 = vadd.xlane.f32.xlu1 %v794_v10  ;;  %v804_v10 = vmul.f32 %v5176_v41, %v5176_v41 }
  0x90   :  { %913 = vadd.xlane.f32.xlu0 %v795_v22 }
  0x93   :  { %899 = vadd.xlane.f32.xlu1 %v788_v33 }
  0x94   :  { %915 = vadd.xlane.f32.xlu0 %v796_v49 }
  0x97   :  { %927 = vadd.xlane.f32.xlu1 %v802_v2 }
  0x98   :  { %931 = vadd.xlane.f32.xlu0 %v804_v10  ;;  %v8760_v10 = vlaneseq }
  0x9b   :  { %929 = vadd.xlane.f32.xlu1 %v803_v1 }
  0xa8   :  { %v5186_v22 = vpop.xlane.xlu0 %805 }
  0xa9   :  { %9093 = vst [vmem:[#allocation34_spill] sm:$0xff] %v5186_v22 }
  0xab   :  { %v5188_v16 = vpop.xlane.xlu1 %807 }
  0xac   :  { %9094 = vst [vmem:[#allocation35_spill] sm:$0xff] %v5188_v16  ;;  %v5190_v33 = vpop.xlane.xlu0 %823  ;;  %v5209_v16 = vshrl.u32 %v8760_v10, 7 }
  0xad   :  { %9095 = vst [vmem:[#allocation36_spill] sm:$0xff] %v5190_v33  ;;  %v4796_v33 = vmov 1966171168  }
  0xb0   :  { %v5192_v61 = vpop.xlane.xlu1 %821 }
  0xb1   :  { %9096 = vst [vmem:[#allocation37_spill] sm:$0xff] %v5192_v61  ;;  %v5194_v37 = vpop.xlane.xlu0 %825  ;;  %v462_v61 = vunpack.c.l.s4 %v4796_v33 }
  0xb2   :  { %9097 = vst [vmem:[#allocation38_spill] sm:$0xff] %v5194_v37  ;;  %v5214_v37 = vsub.s32 0, %v5209_v16 }
  0xb4   :  { %v5196_v49 = vpop.xlane.xlu1 %809  ;;  %9105 = vst [vmem:[#allocation46_spill] sm:$0xff] %v5214_v37 }
  0xb5   :  { %9098 = vst [vmem:[#allocation39_spill] sm:$0xff] %v5196_v49  ;;  %v5198_v4 = vpop.xlane.xlu0 %839 }
  0xb6   :  { %9099 = vst [vmem:[#allocation40_spill] sm:$0xff] %v5198_v4 }
  0xb8   :  { %v5200_v2 = vpop.xlane.xlu1 %837 }
  0xb9   :  { %9100 = vst [vmem:[#allocation41_spill] sm:$0xff] %v5200_v2  ;;  %v5202_v41 = vpop.xlane.xlu0 %827  ;;  %v463_v2 = vunpack.c.0.s8 %v462_v61 }
  0xba   :  { %9101 = vst [vmem:[#allocation42_spill] sm:$0xff] %v5202_v41  ;;  %v5221_v41 = vld [vmem:[%s8733_s3] sm:$0x7] }
  0xbb   :  { %v5228_v33 = vsub.s32 %v463_v2, %v5209_v16 }
  0xbc   :  { %v5204_v1 = vpop.xlane.xlu1 %811 }
  0xbd   :  { %9102 = vst [vmem:[#allocation43_spill] sm:$0xff] %v5204_v1  ;;  %v5206_v22 = vpop.xlane.xlu0 %853  ;;  %9108 = vst [vmem:[#allocation49_spill] sm:$0xff] %v5228_v33 }
  0xbe   :  { %9103 = vst [vmem:[#allocation44_spill] sm:$0xff] %v5206_v22  ;;  %v286_v22 = vrot.slane %v5221_v41, %v5214_v37 }
  0xc0   :  { %v5211_v57 = vpop.xlane.xlu1 %841 }
  0xc1   :  { %9104 = vst [vmem:[#allocation45_spill] sm:$0xff] %v5211_v57  ;;  %v5216_v4 = vpop.xlane.xlu0 %813 }
  0xc2   :  { %9106 = vst [vmem:[#allocation47_spill] sm:$0xff] %v5216_v4  ;;  %v4797_v4 = vmov 0  }
  0xc3   :  { %4328 = vset.pattern.permute.xlu0 %v4797_v4  ;;  %4329 = vset.pattern.permute.xlu1 %v4797_v4 }
  0xc4   :  { %v5225_v10 = vpop.xlane.xlu1 %855 }
  0xc5   :  { %9107 = vst [vmem:[#allocation48_spill] sm:$0xff] %v5225_v10  ;;  %v5230_v57 = vpop.xlane.xlu0 %843 }
  0xc6   :  { %9109 = vst [vmem:[#allocation50_spill] sm:$0xff] %v5230_v57 }
  0xc8   :  { %v5235_v27 = vpop.xlane.xlu1 %829 }
  0xc9   :  { %9111 = vst [vmem:[#allocation52_spill] sm:$0xff] %v5235_v27  ;;  %v5238_v2 = vpop.xlane.xlu0 %869 }
  0xca   :  { %9112 = vst [vmem:[#allocation53_spill] sm:$0xff] %v5238_v2 }
  0xcd   :  { %v5247_v24 = vpop.xlane.xlu0 %815 }
  0xce   :  { %9113 = vst [vmem:[#allocation54_spill] sm:$0xff] %v5247_v24  ;;  %v9200_v24 = vld [vmem:[#allocation38_spill] sm:$0xff] }
  0xf4   :  { %v368_v1 = vpop.f32.mrb[0].mxu1 }
  0xf5   :  { %v369_v49 = vadd.f32 %v368_v1, %v286_v22  ;;  %v5232_v6 = vpop.f32.mrb[1].mxu1  ;;  %v5243_v22 = vpop.xlane.xlu1 %857 }
  0xf6   :  { %9110 = vst [vmem:[#allocation51_spill] sm:$0xff] %v5232_v6 }
  0xf7   :  { %v467_v45 = vrot.slane %v369_v49, %v5228_v33  ;;  %4132 = vst [vmem:[#allocation8] sm:$0xff] %v369_v49  ;;  %v933_v61 = vmul.f32 %v369_v49, %v369_v49 }
  0xf9   :  { %v483_v10 = vrot.slane %v467_v45, %v5228_v33  ;;  %934 = vadd.xlane.f32.xlu0 %v933_v61  ;;  %v475_v6 = vcombine.high %v467_v45, %v467_v45  ;;  %v5254_v12 = vpop.xlane.xlu1 %871  ;;  %v5256_v45 = vpop.xlane.xlu0 %845 }
  0xfa   :  { %9114 = vst [vmem:[#allocation55_spill] sm:$0xff] %v5256_v45 }
  0xfb   :  { %v512_v57 = vrot.slane %v483_v10, %v5214_v37  ;;  %v5250_v61 = vrot.slane %v475_v6, %v5228_v33 }
  0xfc   :  { %v5241_v30 = vpop.f32.mrb[2].mxu1 }
  0xfd   :  { %v4231_v1 = vpop.f32.mrb[3].mxu1  ;;  %v550_v4 = vmul.f32 %v512_v57, %v4920_v19  ;;  %v549_v55 = vmul.f32 %v512_v57, %v4908_v14  ;;  %v553_v2 = vmul.f32 %v512_v57, %v4976_v44  ;;  %v551_v27 = vmul.f32 %v512_v57, %v4942_v29  ;;  %v5262_v6 = vpop.xlane.xlu1 %831 }
  0xfe   :  { %v516_v14 = vrot.slane %v5250_v61, %v5214_v37  ;;  %v554_v19 = vmul.f32 %v512_v57, %v5000_v56  ;;  %v505_v44 = vcombine.high %v483_v10, %v483_v10  ;;  %v555_v29 = vmul.f32 %v512_v57, %v5036_v11 }
  0xff   :  { %615 = vadd.xlane.f32.xlu0 %v550_v4  ;;  %613 = vadd.xlane.f32.xlu1 %v549_v55  ;;  %v552_v55 = vmul.f32 %v512_v57, %v4962_v38  ;;  %v556_v56 = vmul.f32 %v512_v57, %v5068_v35 }
 0x100   :  { %v558_v1 = vmul.f32 %v516_v14, %v4910_v15  ;;  %v520_v4 = vrot.slane %v505_v44, %v5214_v37  ;;  %v559_v38 = vmul.f32 %v516_v14, %v4931_v25  ;;  %v560_v25 = vmul.f32 %v516_v14, %v4958_v36 }
 0x102   :  { %v566_v15 = vmul.f32 %v520_v4, %v4949_v32  ;;  %v565_v57 = vmul.f32 %v520_v4, %v4954_v34  ;;  %v561_v34 = vmul.f32 %v516_v14, %v4988_v50 }
 0x103   :  { %621 = vadd.xlane.f32.xlu0 %v553_v2  ;;  %617 = vadd.xlane.f32.xlu1 %v551_v27  ;;  %v5266_v2 = vpop.xlane.xlu0 %873  ;;  %v460_v27 = vcombine.high %v369_v49, %v369_v49 }
 0x104   :  { %9115 = vst [vmem:[#allocation56_spill] sm:$0xff] %v5266_v2 }
 0x105   :  { %v474_v11 = vrot.slane %v460_v27, %v5228_v33 }
 0x107   :  { %623 = vadd.xlane.f32.xlu0 %v554_v19  ;;  %619 = vadd.xlane.f32.xlu1 %v552_v55  ;;  %v5271_v19 = vpop.xlane.xlu1 %859  ;;  %v5273_v10 = vpop.xlane.xlu0 %887  ;;  %v557_v55 = vmul.f32 %v516_v14, %v4924_v21  ;;  %v5281_v35 = vrot.slane %v474_v11, %v5228_v33  ;;  %v568_v21 = vmul.f32 %v520_v4, %v4984_v48 }
 0x108   :  { %9116 = vst [vmem:[#allocation57_spill] sm:$0xff] %v5273_v10 }
 0x109   :  { %v5289_v32 = vrot.slane %v5281_v35, %v5214_v37 }
 0x10b   :  { %625 = vadd.xlane.f32.xlu1 %v555_v29  ;;  %631 = vadd.xlane.f32.xlu0 %v558_v1  ;;  %v5278_v49 = vpop.xlane.xlu1 %885  ;;  %v5285_v44 = vpop.xlane.xlu0 %833  ;;  %v567_v29 = vmul.f32 %v520_v4, %v4972_v42  ;;  %v581_v36 = vmul.f32 %v5289_v32, %v4992_v52  ;;  %v582_v48 = vmul.f32 %v5289_v32, %v5004_v58 }
 0x10c   :  { %v569_v42 = vmul.f32 %v520_v4, %v5008_v60  ;;  %v583_v50 = vmul.f32 %v5289_v32, %v5016_v0  ;;  %v563_v58 = vmul.f32 %v516_v14, %v5032_v9  ;;  %v572_v9 = vmul.f32 %v520_v4, %v5096_v63 }
 0x10f   :  { %627 = vadd.xlane.f32.xlu1 %v556_v56  ;;  %633 = vadd.xlane.f32.xlu0 %v559_v38  ;;  %v5293_v1 = vpop.xlane.xlu1 %817  ;;  %v5295_v27 = vpop.xlane.xlu0 %861 }
 0x110   :  { %9117 = vst [vmem:[#allocation58_spill] sm:$0xff] %v5293_v1  ;;  %9118 = vst [vmem:[#allocation59_spill] sm:$0xff] %v5295_v27 }
 0x113   :  { %647 = vadd.xlane.f32.xlu0 %v566_v15  ;;  %629 = vadd.xlane.f32.xlu1 %v557_v55  ;;  %v5300_v56 = vpop.xlane.xlu1 %847  ;;  %v5305_v38 = vpop.xlane.xlu0 %889  ;;  %v562_v15 = vmul.f32 %v516_v14, %v5012_v62  ;;  %v584_v62 = vmul.f32 %v5289_v32, %v5052_v23 }
 0x114   :  { %9119 = vst [vmem:[#allocation60_spill] sm:$0xff] %v5300_v56  ;;  %9120 = vst [vmem:[#allocation61_spill] sm:$0xff] %v5305_v38  ;;  %v946_v56 = vmax.f32 %v9200_v24, 1e-16  ;;  %v5610_v24 = vsub.s32 3, %v5209_v16 }
 0x117   :  { %635 = vadd.xlane.f32.xlu0 %v560_v25  ;;  %645 = vadd.xlane.f32.xlu1 %v565_v57  ;;  %v5310_v55 = vpop.xlane.xlu1 %875  ;;  %v5312_v52 = vpop.xlane.xlu0 %903  ;;  %v570_v25 = vmul.f32 %v520_v4, %v5044_v17  ;;  %v564_v57 = vmul.f32 %v516_v14, %v5064_v31  ;;  %v571_v17 = vmul.f32 %v520_v4, %v5076_v43 }
 0x118   :  { %9121 = vst [vmem:[#allocation62_spill] sm:$0xff] %v5310_v55  ;;  %9122 = vst [vmem:[#allocation63_spill] sm:$0xff] %v5312_v52  ;;  %v586_v43 = vmul.f32 %v5289_v32, %v5104_v8 }
 0x11b   :  { %651 = vadd.xlane.f32.xlu0 %v568_v21  ;;  %649 = vadd.xlane.f32.xlu1 %v567_v29  ;;  %v5316_v60 = vpop.xlane.xlu1 %901  ;;  %v5321_v0 = vpop.xlane.xlu0 %835  ;;  %v476_v21 = vcombine.high %v474_v11, %v474_v11  ;;  %v507_v29 = vcombine.high %v5250_v61, %v5250_v61  ;;  %v585_v61 = vmul.f32 %v5289_v32, %v5084_v51 }
 0x11c   :  { %9123 = vst [vmem:[#allocation64_spill] sm:$0xff] %v5316_v60 }
 0x11d   :  { %v504_v31 = vrot.slane %v476_v21, %v5228_v33  ;;  %v5336_v14 = vrot.slane %v507_v29, %v5214_v37 }
 0x11f   :  { %637 = vadd.xlane.f32.xlu1 %v561_v34  ;;  %677 = vadd.xlane.f32.xlu0 %v581_v36  ;;  %v5328_v34 = vsub.s32 2, %v5209_v16  ;;  %v5330_v36 = vpop.xlane.xlu1 %819  ;;  %v5332_v23 = vpop.xlane.xlu0 %863  ;;  %v5347_v11 = vrot.slane %v504_v31, %v5214_v37 }
 0x120   :  { %9125 = vst [vmem:[#allocation66_spill] sm:$0xff] %v5330_v36 }
 0x121   :  { %9124 = vst [vmem:[#allocation65_spill] sm:$0xff] %v5328_v34  ;;  %v294_v63 = vrot.slane %v5221_v41, %v5328_v34  ;;  %v574_v41 = vmul.f32 %v5336_v14, %v4980_v46  ;;  %v577_v46 = vmul.f32 %v5336_v14, %v5040_v13  ;;  %v589_v13 = vmul.f32 %v5347_v11, %v5028_v7 }
 0x122   :  { %v592_v7 = vmul.f32 %v5347_v11, %v5080_v47 }
 0x123   :  { %679 = vadd.xlane.f32.xlu1 %v582_v48  ;;  %653 = vadd.xlane.f32.xlu0 %v569_v42  ;;  %v5344_v4 = vpop.xlane.xlu1 %849  ;;  %v587_v48 = vmul.f32 %v5289_v32, %v5132_v53  ;;  %v573_v42 = vmul.f32 %v5336_v14, %v4967_v40  ;;  %v5354_v51 = vadd.f32 %v5241_v30, %v294_v63  ;;  %v5356_v8 = vpop.xlane.xlu0 %891 }
 0x124   :  { %9126 = vst [vmem:[#allocation67_spill] sm:$0xff] %v5344_v4  ;;  %9127 = vst [vmem:[#allocation68_spill] sm:$0xff] %v5356_v8  ;;  %v506_v30 = vcombine.high %v5281_v35, %v5281_v35  ;;  %v575_v53 = vmul.f32 %v5336_v14, %v4996_v54  ;;  %v591_v35 = vmul.f32 %v5347_v11, %v5048_v20 }
 0x125   :  { %v578_v20 = vmul.f32 %v5336_v14, %v5072_v39 }
 0x127   :  { %639 = vadd.xlane.f32.xlu1 %v562_v15  ;;  %681 = vadd.xlane.f32.xlu0 %v583_v50  ;;  %v590_v15 = vmul.f32 %v5347_v11, %v5024_v5  ;;  %v444_v50 = vand.u32 2147483647, %v5354_v51  ;;  %v5365_v40 = vpop.xlane.xlu0 %917 }
 0x128   :  { %9129 = vst [vmem:[#allocation70_spill] sm:$0xff] %v5365_v40 }
 0x12b   :  { %655 = vadd.xlane.f32.xlu1 %v570_v25  ;;  %641 = vadd.xlane.f32.xlu0 %v563_v58  ;;  %v5363_v25 = vpop.xlane.xlu1 %877  ;;  %v445_v58 = vsub.f32 0.0, %v444_v50  ;;  %v5382_v29 = vpop.xlane.xlu0 %851 }
 0x12c   :  { %9128 = vst [vmem:[#allocation69_spill] sm:$0xff] %v5363_v25 }
 0x12d   :  { %v446_v21 = vmul.f32 1.442695, %v445_v58 }
 0x12f   :  { %683 = vadd.xlane.f32.xlu1 %v584_v62  ;;  %643 = vadd.xlane.f32.xlu0 %v564_v57  ;;  %v5373_v5 = vpop.xlane.xlu1 %905  ;;  %v5376_v62 = vrot.slane %v506_v30, %v5214_v37  ;;  %v576_v57 = vmul.f32 %v5336_v14, %v5020_v3  ;;  %4330 = vpow2.f32 %v446_v21  ;;  %v5390_v3 = vpop.xlane.xlu0 %879  ;;  %v9136_v30 = vld [vmem:[#allocation15_spill] sm:$0xff] }
 0x130   :  { %9130 = vst [vmem:[#allocation71_spill] sm:$0xff] %v5373_v5 }
 0x131   :  { %v598_v54 = vmul.f32 %v5376_v62, %v5056_v26  ;;  %v508_v26 = vcombine.high %v504_v31, %v504_v31 }
 0x133   :  { %657 = vadd.xlane.f32.xlu1 %v571_v17  ;;  %659 = vadd.xlane.f32.xlu0 %v572_v9  ;;  %v5388_v17 = vpop.xlane.xlu1 %919  ;;  %v597_v9 = vmul.f32 %v5376_v62, %v5060_v28  ;;  %v5402_v63 = vpop.xlane.xlu0 %907  ;;  %v5405_v39 = vrot.slane %v508_v26, %v5214_v37  ;;  %v600_v28 = vmul.f32 %v5376_v62, %v5112_v18 }
 0x134   :  { %9131 = vst [vmem:[#allocation72_spill] sm:$0xff] %v5388_v17  ;;  %9132 = vst [vmem:[#allocation73_spill] sm:$0xff] %v5402_v63 }
 0x137   :  { %685 = vadd.xlane.f32.xlu1 %v585_v61  ;;  %687 = vadd.xlane.f32.xlu0 %v586_v43  ;;  %v5396_v61 = vpop.xlane.xlu1 %865  ;;  %v599_v43 = vmul.f32 %v5376_v62, %v5092_v59  ;;  %v5413_v59 = vpop.xlane.xlu0 %867 }
 0x13b   :  { %689 = vadd.xlane.f32.xlu1 %v587_v48  ;;  %661 = vadd.xlane.f32.xlu0 %v573_v42  ;;  %v4331_v48 = vpop.eup %4330  ;;  %v9133_v42 = vld [vmem:[#allocation17_spill] sm:$0xff]  ;;  %v5425_v21 = vpop.xlane.xlu0 %895 }
 0x13c   :  { %v579_v31 = vmul.f32 %v5336_v14, %v9133_v42  ;;  %v448_v47 = vadd.f32 1.0, %v4331_v48 }
 0x13e   :  { %4332 = vlog2.f32 %v448_v47 }
 0x13f   :  { %663 = vadd.xlane.f32.xlu1 %v574_v41  ;;  %695 = vadd.xlane.f32.xlu0 %v590_v15  ;;  %v5411_v41 = vpop.xlane.xlu1 %893  ;;  %v9135_v15 = vld [vmem:[#allocation18_spill] sm:$0xff] }
 0x140   :  { %9134 = vst [vmem:[#allocation17_spill] sm:$0xff] %v5411_v41  ;;  %v593_v50 = vmul.f32 %v5347_v11, %v9135_v15 }
 0x143   :  { %665 = vadd.xlane.f32.xlu1 %v575_v53  ;;  %669 = vadd.xlane.f32.xlu0 %v577_v46  ;;  %v605_v53 = vmul.f32 %v5405_v39, %v9136_v30  ;;  %v5419_v18 = vpop.xlane.xlu1 %921  ;;  %v9138_v46 = vld [vmem:[#allocation19_spill] sm:$0xff] }
 0x144   :  { %9137 = vst [vmem:[#allocation18_spill] sm:$0xff] %v5419_v18  ;;  %v580_v58 = vmul.f32 %v5336_v14, %v9138_v46  ;;  %v9142_v14 = vld [vmem:[#allocation23_spill] sm:$0xff]  ;;  %v443_v46 = vmax.f32 %v5354_v51, 0.0  ;;  %v9149_v51 = vld [vmem:[#allocation25_spill] sm:$0xff] }
 0x145   :  { %v601_v42 = vmul.f32 %v5376_v62, %v9142_v14  ;;  %v588_v14 = vmul.f32 %v5289_v32, %v9149_v51 }
 0x147   :  { %667 = vadd.xlane.f32.xlu1 %v576_v57  ;;  %697 = vadd.xlane.f32.xlu0 %v591_v35  ;;  %v9139_v57 = vld [vmem:[#allocation31_spill] sm:$0xff] }
 0x148   :  { %v610_v35 = vmul.f32 %v5405_v39, %v9139_v57  ;;  %v9145_v57 = vld [vmem:[#allocation20_spill] sm:$0xff] }
 0x14b   :  { %711 = vadd.xlane.f32.xlu0 %v598_v54  ;;  %693 = vadd.xlane.f32.xlu1 %v589_v13  ;;  %v451_v54 = vmul.f32 -0.5, %v4331_v48  ;;  %v9140_v13 = vld [vmem:[#allocation21_spill] sm:$0xff] }
 0x14d   :  { %v452_v26 = vadd.f32 1.0, %v451_v54 }
 0x14f   :  { %671 = vadd.xlane.f32.xlu0 %v578_v20  ;;  %709 = vadd.xlane.f32.xlu1 %v597_v9  ;;  %v594_v20 = vmul.f32 %v5347_v11, %v9140_v13  ;;  %v5429_v9 = vpop.xlane.xlu1 %881  ;;  %v453_v47 = vmul.f32 %v4331_v48, %v452_v26 }
 0x153   :  { %699 = vadd.xlane.f32.xlu0 %v592_v7  ;;  %713 = vadd.xlane.f32.xlu1 %v599_v43  ;;  %v5431_v7 = vpop.xlane.xlu0 %923  ;;  %v4333_v43 = vpop.eup %4332 }
 0x154   :  { %9141 = vst [vmem:[#allocation15_spill] sm:$0xff] %v5431_v7  ;;  %v5435_v15 = vpop.xlane.xlu1 %909 }
 0x155   :  { %9143 = vst [vmem:[#allocation19_spill] sm:$0xff] %v5435_v15 }
 0x157   :  { %715 = vadd.xlane.f32.xlu0 %v600_v28  ;;  %673 = vadd.xlane.f32.xlu1 %v579_v31  ;;  %v454_v28 = vand.u32 2147483647, %v4331_v48  ;;  %v450_v31 = vmul.f32 0.6931472, %v4333_v43 }
 0x158   :  { %v5444_v54 = vpop.xlane.xlu1 %883 }
 0x159   :  { %vm455_vm2 = vcmp.lt.f32.partialorder %v454_v28, 0.0004427343 }
 0x15b   :  { %701 = vadd.xlane.f32.xlu1 %v593_v50  ;;  %725 = vadd.xlane.f32.xlu0 %v605_v53  ;;  %v9144_v50 = vld [vmem:[#allocation16_spill] sm:$0xff]  ;;  %v5439_v53 = vpop.xlane.xlu0 %897 }
 0x15c   :  { %v606_v30 = vmul.f32 %v5405_v39, %v9144_v50  ;;  %v5450_v28 = vpop.xlane.xlu1 %911 }
 0x15d   :  { %9148 = vst [vmem:[#allocation21_spill] sm:$0xff] %v5450_v28 }
 0x15f   :  { %675 = vadd.xlane.f32.xlu1 %v580_v58  ;;  %735 = vadd.xlane.f32.xlu0 %v610_v35  ;;  %v456_v58 = vsel %vm455_vm2, %v453_v47, %v450_v31  ;;  %v607_v35 = vmul.f32 %v5405_v39, %v9145_v57  ;;  %v5446_v48 = vpop.xlane.xlu0 %925  ;;  %v9151_v31 = vld [vmem:[#allocation24_spill] sm:$0xff]  ;;  %vm1941_vm2 = vcmask 523264  }
 0x160   :  { %v457_v13 = vadd.f32 %v456_v58, %v443_v46  ;;  %9146 = vst [vmem:[#allocation31_spill] sm:$0xff] %v5446_v48  ;;  %v595_v47 = vmul.f32 %v5347_v11, %v9151_v31  ;;  %v5458_v50 = vpop.xlane.xlu1 %899  ;;  %v9153_v46 = vld [vmem:[#allocation27_spill] sm:$0xff] }
 0x161   :  { %v602_v58 = vmul.f32 %v5376_v62, %v9153_v46 }
 0x162   :  { %v458_v43 = vadd.f32 1.0, %v457_v13 }
 0x163   :  { %703 = vadd.xlane.f32.xlu1 %v594_v20  ;;  %v9147_v20 = vld [vmem:[#allocation22_spill] sm:$0xff] }
 0x164   :  { %v608_v26 = vmul.f32 %v5405_v39, %v9147_v20  ;;  %v5464_v57 = vpop.xlane.xlu1 %927  ;;  %v9157_v20 = vld [vmem:[#allocation29_spill] sm:$0xff] }
 0x165   :  { %9154 = vst [vmem:[#allocation20_spill] sm:$0xff] %v5464_v57 }
 0x167   :  { %717 = vadd.xlane.f32.xlu1 %v601_v42  ;;  %v5454_v42 = vpop.xlane.xlu0 %913 }
 0x168   :  { %9150 = vst [vmem:[#allocation23_spill] sm:$0xff] %v5454_v42 }
 0x16b   :  { %727 = vadd.xlane.f32.xlu1 %v606_v30  ;;  %v5460_v30 = vpop.xlane.xlu0 %915 }
 0x16c   :  { %9152 = vst [vmem:[#allocation16_spill] sm:$0xff] %v5460_v30 }
 0x16f   :  { %729 = vadd.xlane.f32.xlu1 %v607_v35  ;;  %v9155_v35 = vld [vmem:[#allocation26_spill] sm:$0xff]  ;;  %v5468_v13 = vpop.xlane.xlu0 %931 }
 0x170   :  { %v609_v32 = vmul.f32 %v5405_v39, %v9155_v35  ;;  %9156 = vst [vmem:[#allocation22_spill] sm:$0xff] %v5468_v13 }
 0x173   :  { %731 = vadd.xlane.f32.xlu1 %v608_v26  ;;  %v596_v26 = vmul.f32 %v5347_v11, %v9157_v20  ;;  %v9162_v11 = vld [vmem:[#allocation33_spill] sm:$0xff] }
 0x174   :  { %v611_v20 = vmul.f32 %v5405_v39, %v9162_v11 }
 0x175   :  { %1236 = vperm.xlu0 %4328, %v458_v43   ;;  %v5472_v43 = vpop.xlane.xlu1 %929 }
 0x176   :  { %9158 = vst [vmem:[#allocation25_spill] sm:$0xff] %v5472_v43 }
 0x177   :  { %691 = vadd.xlane.f32.xlu1 %v588_v14  ;;  %v9159_v14 = vld [vmem:[#allocation28_spill] sm:$0xff] }
 0x178   :  { %v603_v31 = vmul.f32 %v5376_v62, %v9159_v14 }
 0x17b   :  { %705 = vadd.xlane.f32.xlu1 %v595_v47 }
 0x17f   :  { %719 = vadd.xlane.f32.xlu1 %v602_v58  ;;  %v9160_v58 = vld [vmem:[#allocation30_spill] sm:$0xff] }
 0x180   :  { %v604_v35 = vmul.f32 %v5376_v62, %v9160_v58 }
 0x183   :  { %733 = vadd.xlane.f32.xlu1 %v609_v32 }
 0x186   :  { %v935_v51 = vpop.xlane.xlu0 %934 }
 0x187   :  { %707 = vadd.xlane.f32.xlu1 %v596_v26 }
 0x18b   :  { %721 = vadd.xlane.f32.xlu1 %v603_v31  ;;  %v9164_v31 = vld [vmem:[#allocation32_spill] sm:$0xff] }
 0x18c   :  { %v5476_v47 = vpop.xlane.xlu0 %615  ;;  %v5478_v46 = vpop.xlane.xlu1 %613  ;;  %v612_v48 = vmul.f32 %v5405_v39, %v9164_v31 }
 0x18f   :  { %723 = vadd.xlane.f32.xlu1 %v604_v35 }
 0x190   :  { %v5482_v32 = vpop.xlane.xlu0 %621  ;;  %v5484_v33 = vpop.xlane.xlu1 %617 }
 0x191   :  { %9161 = vst [vmem:[#allocation24_spill] sm:$0xff] %v5482_v32 }
 0x193   :  { %737 = vadd.xlane.f32.xlu1 %v611_v20 }
 0x194   :  { %v5488_v26 = vpop.xlane.xlu0 %623  ;;  %v5490_v14 = vpop.xlane.xlu1 %619 }
 0x195   :  { %9163 = vst [vmem:[#allocation27_spill] sm:$0xff] %v5488_v26 }
 0x197   :  { %739 = vadd.xlane.f32.xlu1 %v612_v48 }
 0x198   :  { %v5494_v7 = vpop.xlane.xlu1 %625  ;;  %v5496_v62 = vpop.xlane.xlu0 %631 }
 0x199   :  { %9165 = vst [vmem:[#allocation26_spill] sm:$0xff] %v5494_v7 }
 0x19c   :  { %v5498_v58 = vpop.xlane.xlu1 %627  ;;  %v5500_v35 = vpop.xlane.xlu0 %633 }
 0x19d   :  { %9166 = vst [vmem:[#allocation29_spill] sm:$0xff] %v5498_v58 }
 0x1a0   :  { %v5502_v43 = vpop.xlane.xlu0 %647  ;;  %v5504_v11 = vpop.xlane.xlu1 %629 }
 0x1a1   :  { %9167 = vst [vmem:[#allocation28_spill] sm:$0xff] %v5502_v43  ;;  %v5605_v43 = vsub.s32 4, %v5209_v16 }
 0x1a4   :  { %v5506_v20 = vpop.xlane.xlu0 %635  ;;  %v5508_v57 = vpop.xlane.xlu1 %645 }
 0x1a5   :  { %9168 = vst [vmem:[#allocation30_spill] sm:$0xff] %v5506_v20  ;;  %9169 = vst [vmem:[#allocation33_spill] sm:$0xff] %v5508_v57  ;;  %v9199_v20 = vld [vmem:[#allocation43_spill] sm:$0xff]  ;;  %v9208_v57 = vld [vmem:[#allocation52_spill] sm:$0xff] }
 0x1a8   :  { %v5510_v63 = vpop.xlane.xlu0 %651  ;;  %v5512_v39 = vpop.xlane.xlu1 %649 }
 0x1a9   :  { %9170 = vst [vmem:[#allocation32_spill] sm:$0xff] %v5510_v63  ;;  %v5562_v63 = vmax.f32 %v935_v51, 1e-16 }
 0x1ac   :  { %v5514_v48 = vpop.xlane.xlu1 %637  ;;  %v5516_v31 = vpop.xlane.xlu0 %677 }
 0x1ad   :  { %9171 = vst [vmem:[#allocation74_spill] sm:$0xff] %v5516_v31 }
 0x1b0   :  { %v5518_v28 = vpop.xlane.xlu1 %679  ;;  %v5520_v40 = vpop.xlane.xlu0 %653 }
 0x1b1   :  { %9172 = vst [vmem:[#allocation75_spill] sm:$0xff] %v5518_v28  ;;  %9173 = vst [vmem:[#allocation76_spill] sm:$0xff] %v5520_v40  ;;  %v9201_v28 = vld [vmem:[#allocation40_spill] sm:$0xff] }
 0x1b4   :  { %v5522_v15 = vpop.xlane.xlu1 %639  ;;  %v5524_v8 = vpop.xlane.xlu0 %681 }
 0x1b5   :  { %9174 = vst [vmem:[#allocation77_spill] sm:$0xff] %v5522_v15  ;;  %9175 = vst [vmem:[#allocation78_spill] sm:$0xff] %v5524_v8 }
 0x1b8   :  { %v5526_v18 = vpop.xlane.xlu1 %655  ;;  %v5528_v41 = vpop.xlane.xlu0 %641 }
 0x1b9   :  { %9176 = vst [vmem:[#allocation79_spill] sm:$0xff] %v5526_v18 }
 0x1bc   :  { %v5530_v52 = vpop.xlane.xlu1 %683  ;;  %v5532_v58 = vpop.xlane.xlu0 %643 }
 0x1bd   :  { %9177 = vst [vmem:[#allocation80_spill] sm:$0xff] %v5530_v52 }
 0x1c0   :  { %v5534_v38 = vpop.xlane.xlu1 %657  ;;  %v5536_v17 = vpop.xlane.xlu0 %659 }
 0x1c1   :  { %9178 = vst [vmem:[#allocation81_spill] sm:$0xff] %v5534_v38 }
 0x1c4   :  { %v5538_v27 = vpop.xlane.xlu1 %685  ;;  %v5540_v5 = vpop.xlane.xlu0 %687 }
 0x1c5   :  { %9179 = vst [vmem:[#allocation82_spill] sm:$0xff] %v5538_v27 }
 0x1c8   :  { %v5542_v40 = vpop.xlane.xlu1 %689  ;;  %v5544_v26 = vpop.xlane.xlu0 %661 }
 0x1c9   :  { %9180 = vst [vmem:[#allocation83_spill] sm:$0xff] %v5544_v26 }
 0x1cc   :  { %v5546_v8 = vpop.xlane.xlu1 %663  ;;  %v5548_v25 = vpop.xlane.xlu0 %695 }
 0x1cd   :  { %9181 = vst [vmem:[#allocation84_spill] sm:$0xff] %v5548_v25  ;;  %v5570_v25 = vrot.slane %v5562_v63, %v5214_v37 }
 0x1cf   :  { %9189 = vst [vmem:[#allocation92_spill] sm:$0xff] %v5570_v25 }
 0x1d0   :  { %v5550_v18 = vpop.xlane.xlu1 %665  ;;  %v5552_v52 = vpop.xlane.xlu0 %669 }
 0x1d1   :  { %9182 = vst [vmem:[#allocation85_spill] sm:$0xff] %v5550_v18  ;;  %9183 = vst [vmem:[#allocation86_spill] sm:$0xff] %v5552_v52  ;;  %v5573_v52 = vsub.s32 1, %v5209_v16  ;;  %v9207_v18 = vld [vmem:[#allocation42_spill] sm:$0xff] }
 0x1d3   :  { %9190 = vst [vmem:[#allocation93_spill] sm:$0xff] %v5573_v52  ;;  %v5583_v36 = vrot.slane %v5562_v63, %v5573_v52 }
 0x1d4   :  { %v5554_v31 = vpop.xlane.xlu1 %667  ;;  %v5556_v38 = vpop.xlane.xlu0 %697 }
 0x1d5   :  { %9184 = vst [vmem:[#allocation87_spill] sm:$0xff] %v5554_v31  ;;  %9185 = vst [vmem:[#allocation88_spill] sm:$0xff] %v5556_v38  ;;  %v9196_v31 = vld [vmem:[#allocation37_spill] sm:$0xff]  ;;  %v1052_v42 = vmul.f32 %v5583_v36, %v946_v56  ;;  %v5630_v56 = vsub.s32 5, %v5209_v16 }
 0x1d6   :  { %v944_v26 = vmax.f32 %v9196_v31, 1e-16 }
 0x1d7   :  { %9210 = vst [vmem:[#allocation43_spill] sm:$0xff] %v5630_v56 }
 0x1d8   :  { %v5558_v10 = vpop.xlane.xlu0 %711  ;;  %v5560_v27 = vpop.xlane.xlu1 %693  ;;  %v1050_v31 = vmul.f32 %v5583_v36, %v944_v26  ;;  %v9213_v26 = vld [vmem:[#allocation48_spill] sm:$0xff] }
 0x1d9   :  { %9186 = vst [vmem:[#allocation89_spill] sm:$0xff] %v5558_v10  ;;  %9187 = vst [vmem:[#allocation90_spill] sm:$0xff] %v5560_v27  ;;  %v9193_v10 = vld [vmem:[#allocation34_spill] sm:$0xff]  ;;  %v9194_v27 = vld [vmem:[#allocation35_spill] sm:$0xff] }
 0x1da   :  { %v936_v32 = vmax.f32 %v9193_v10, 1e-16  ;;  %v937_v51 = vmax.f32 %v9194_v27, 1e-16  ;;  %v939_v27 = vmax.f32 %v9199_v20, 1e-16 }
 0x1db   :  { %9203 = vst [vmem:[#allocation35_spill] sm:$0xff] %v5605_v43  ;;  %v9204_v20 = vld [vmem:[#allocation45_spill] sm:$0xff] }
 0x1dc   :  { %v5564_v7 = vpop.xlane.xlu0 %671  ;;  %v5566_v4 = vpop.xlane.xlu1 %709  ;;  %v1042_v45 = vmul.f32 %v5570_v25, %v936_v32  ;;  %v1043_v13 = vmul.f32 %v5570_v25, %v937_v51  ;;  %v5600_v32 = vrot.slane %v5562_v63, %v5328_v34  ;;  %v9202_v51 = vld [vmem:[#allocation41_spill] sm:$0xff] }
 0x1dd   :  { %9188 = vst [vmem:[#allocation91_spill] sm:$0xff] %v5566_v4  ;;  %v9195_v4 = vld [vmem:[#allocation39_spill] sm:$0xff] }
 0x1de   :  { %v938_v60 = vmax.f32 %v9195_v4, 1e-16  ;;  %4334 = vrsqrt.f32 %v1042_v45  ;;  %9205 = vst [vmem:[#allocation39_spill] sm:$0xff] %v5610_v24  ;;  %v950_v45 = vmax.f32 %v5285_v44, 1e-16  ;;  %v5634_v44 = vrot.slane %v5562_v63, %v5610_v24 }
 0x1df   :  { %4336 = vrsqrt.f32 %v1043_v13  ;;  %v959_v13 = vmax.f32 %v5382_v29, 1e-16  ;;  %v973_v29 = vmax.f32 %v5390_v3, 1e-16  ;;  %v965_v3 = vmax.f32 %v5332_v23, 1e-16 }
 0x1e0   :  { %v5575_v2 = vpop.xlane.xlu0 %699  ;;  %v5577_v38 = vpop.xlane.xlu1 %713  ;;  %v1044_v55 = vmul.f32 %v5570_v25, %v938_v60  ;;  %v954_v60 = vmax.f32 %v9204_v20, 1e-16 }
 0x1e1   :  { %9191 = vst [vmem:[#allocation94_spill] sm:$0xff] %v5575_v2  ;;  %9192 = vst [vmem:[#allocation95_spill] sm:$0xff] %v5577_v38  ;;  %v9198_v38 = vld [vmem:[#allocation36_spill] sm:$0xff] }
 0x1e2   :  { %v945_v10 = vmax.f32 %v9198_v38, 1e-16  ;;  %v1045_v38 = vmul.f32 %v5570_v25, %v939_v27  ;;  %4338 = vrsqrt.f32 %v1044_v55  ;;  %v951_v27 = vmax.f32 %v5321_v0, 1e-16  ;;  %v9214_v25 = vld [vmem:[#allocation47_spill] sm:$0xff] }
 0x1e3   :  { %4340 = vrsqrt.f32 %v1050_v31  ;;  %v1060_v20 = vmul.f32 %v5600_v32, %v954_v60  ;;  %v1056_v0 = vmul.f32 %v5583_v36, %v950_v45  ;;  %v966_v31 = vmax.f32 %v5396_v61, 1e-16 }
 0x1e4   :  { %v5589_v15 = vpop.xlane.xlu0 %715  ;;  %v5591_v2 = vpop.xlane.xlu1 %673  ;;  %v1051_v4 = vmul.f32 %v5583_v36, %v945_v10  ;;  %v5626_v10 = vrot.slane %v5562_v63, %v5605_v43  ;;  %4342 = vrsqrt.f32 %v1045_v38  ;;  %v1057_v38 = vmul.f32 %v5583_v36, %v951_v27 }
 0x1e5   :  { %9197 = vst [vmem:[#allocation34_spill] sm:$0xff] %v5589_v15  ;;  %v948_v15 = vmax.f32 %v9208_v57, 1e-16  ;;  %v974_v45 = vmax.f32 %v5429_v9, 1e-16  ;;  %v5651_v61 = vrot.slane %v5562_v63, %v5630_v56 }
 0x1e6   :  { %4344 = vrsqrt.f32 %v1051_v4  ;;  %v967_v9 = vmax.f32 %v5413_v59, 1e-16  ;;  %v975_v4 = vmax.f32 %v5444_v54, 1e-16  ;;  %v969_v60 = vmax.f32 %v5254_v12, 1e-16 }
 0x1e7   :  { %v1054_v55 = vmul.f32 %v5583_v36, %v948_v15  ;;  %4346 = vrsqrt.f32 %v1052_v42  ;;  %v9212_v15 = vld [vmem:[#allocation44_spill] sm:$0xff] }
 0x1e8   :  { %v5613_v30 = vpop.xlane.xlu1 %701  ;;  %v5621_v1 = vpop.xlane.xlu0 %725  ;;  %4348 = vrsqrt.f32 %v1060_v20 }
 0x1e9   :  { %9206 = vst [vmem:[#allocation37_spill] sm:$0xff] %v5613_v30  ;;  %9209 = vst [vmem:[#allocation36_spill] sm:$0xff] %v5621_v1  ;;  %v961_v1 = vmax.f32 %v9213_v26, 1e-16  ;;  %v1065_v30 = vmul.f32 %v5600_v32, %v959_v13  ;;  %4350 = vrsqrt.f32 %v1054_v55  ;;  %v4335_v20 = vpop.eup %4334  ;;  %v962_v13 = vmax.f32 %v5243_v22, 1e-16 }
 0x1ea   :  { %4352 = vrsqrt.f32 %v1056_v0  ;;  %v1072_v55 = vmul.f32 %v5634_v44, %v966_v31  ;;  %v4337_v23 = vpop.eup %4336  ;;  %v1080_v22 = vmul.f32 %v5626_v10, %v974_v45  ;;  %v1170_v31 = vmul.f32 %v4335_v20, %v5478_v46 }
 0x1eb   :  { %v1067_v42 = vmul.f32 %v5634_v44, %v961_v1  ;;  %4354 = vrsqrt.f32 %v1057_v38  ;;  %v1071_v1 = vmul.f32 %v5634_v44, %v965_v3  ;;  %v963_v45 = vmax.f32 %v5271_v19, 1e-16 }
 0x1ec   :  { %v5637_v57 = vpop.xlane.xlu1 %675  ;;  %v5654_v26 = vpop.xlane.xlu0 %735  ;;  %4356 = vrsqrt.f32 %v1065_v30  ;;  %v1081_v20 = vmul.f32 %v5626_v10, %v975_v4 }
 0x1ed   :  { %9211 = vst [vmem:[#allocation38_spill] sm:$0xff] %v5637_v57  ;;  %v1079_v57 = vmul.f32 %v5626_v10, %v973_v29  ;;  %9215 = vst [vmem:[#allocation40_spill] sm:$0xff] %v5654_v26  ;;  %v981_v29 = vmax.f32 %v5425_v21, 1e-16  ;;  %v5664_v0 = vpop.eup %4338  ;;  %v949_v26 = vmax.f32 %v5262_v6, 1e-16  ;;  %v1073_v21 = vmul.f32 %v5634_v44, %v967_v9 }
 0x1ee   :  { %v4341_v59 = vpop.eup %4340 }
 0x1ef   :  { %4358 = vrsqrt.f32 %v1079_v57  ;;  %v1087_v54 = vmul.f32 %v5651_v61, %v981_v29  ;;  %v4343_v3 = vpop.eup %4342  ;;  %v1178_v12 = vmul.f32 %v4341_v59, %v5504_v11  ;;  %v9217_v11 = vmax.f32 %v9201_v28, 1e-16 }
 0x1f0   :  { %v5656_v27 = vpop.xlane.xlu1 %703  ;;  %4360 = vrsqrt.f32 %v1067_v42  ;;  %v4345_v57 = vpop.eup %4344  ;;  %v5687_v42 = vsub.s32 6, %v5209_v16 }
 0x1f1   :  { %4362 = vrsqrt.f32 %v1072_v55  ;;  %v4347_v9 = vpop.eup %4346  ;;  %v1059_v55 = vmul.f32 %v5600_v32, %v9217_v11 }
 0x1f2   :  { %9216 = vst [vmem:[#allocation41_spill] sm:$0xff] %v5687_v42  ;;  %4364 = vrsqrt.f32 %v1071_v1  ;;  %v9220_v1 = vmax.f32 %v9202_v51, 1e-16 }
 0x1f3   :  { %4366 = vrsqrt.f32 %v1080_v22  ;;  %v1171_v22 = vmul.f32 %v4337_v23, %v5476_v47 }
 0x1f4   :  { %v5672_v30 = vpop.xlane.xlu1 %717  ;;  %v5674_v38 = vpop.permute.xlu0 %1236  ;;  %v1058_v4 = vmul.f32 %v5600_v32, %v9220_v1  ;;  %4368 = vrsqrt.f32 %v1073_v21  ;;  %v5716_v21 = vrot.slane %v5562_v63, %v5687_v42 }
 0x1f5   :  { %v5679_v6 = vrot.slane %v5674_v38, %v5214_v37  ;;  %v5683_v46 = vrot.slane %v5674_v38, %v5573_v52  ;;  %v4349_v52 = vpop.eup %4348  ;;  %v982_v37 = vmax.f32 %v5439_v53, 1e-16  ;;  %4370 = vrsqrt.f32 %v1087_v54 }
 0x1f6   :  { %v5706_v11 = vpop.eup %4350  ;;  %4372 = vrsqrt.f32 %v1081_v20  ;;  %v1055_v20 = vmul.f32 %v5583_v36, %v949_v26 }
 0x1f7   :  { %v5694_v29 = vmul.f32 %v5683_v46, %v1178_v12  ;;  %v5697_v59 = vmul.f32 %v5679_v6, %v1170_v31  ;;  %v1173_v12 = vmul.f32 %v4343_v3, %v5490_v14  ;;  %v1068_v31 = vmul.f32 %v5634_v44, %v962_v13  ;;  %v4353_v53 = vpop.eup %4352 }
 0x1f8   :  { %v5704_v28 = vpop.xlane.xlu1 %727  ;;  %v1088_v1 = vmul.f32 %v5651_v61, %v982_v37  ;;  %v4355_v47 = vpop.eup %4354  ;;  %4374 = vrsqrt.f32 %v1059_v55  ;;  %v5721_v14 = vrot.slane %v5674_v38, %v5328_v34  ;;  %v5727_v23 = vmul.f32 %v5679_v6, %v1171_v22 }
 0x1f9   :  { %9218 = vst [vmem:[#allocation45_spill] sm:$0xff] %v5694_v29  ;;  %9219 = vst [vmem:[#allocation42_spill] sm:$0xff] %v5697_v59  ;;  %1431 = vperm.xlu0 %4328, %v5694_v29   ;;  %1407 = vperm.xlu1 %4329, %v5697_v59   ;;  %v5724_v13 = vmul.f32 %v5679_v6, %v1173_v12  ;;  %v4357_v54 = vpop.eup %4356  ;;  %v9223_v3 = vmax.f32 %v9207_v18, 1e-16  ;;  %4376 = vrsqrt.f32 %v1058_v4  ;;  %v9224_v22 = vmax.f32 %v9212_v15, 1e-16 }
 0x1fa   :  { %9222 = vst [vmem:[#allocation44_spill] sm:$0xff] %v5727_v23  ;;  %v1075_v37 = vmul.f32 %v5626_v10, %v969_v60  ;;  %v4359_v51 = vpop.eup %4358  ;;  %v1179_v29 = vmul.f32 %v4345_v57, %v5496_v62  ;;  %v1188_v12 = vmul.f32 %v4349_v52, %v5512_v39  ;;  %4378 = vrsqrt.f32 %v1068_v31 }
 0x1fb   :  { %9221 = vst [vmem:[#allocation52_spill] sm:$0xff] %v5724_v13  ;;  %v1053_v19 = vmul.f32 %v5583_v36, %v9223_v3  ;;  %v1066_v59 = vmul.f32 %v5634_v44, %v9224_v22  ;;  %v4361_v18 = vpop.eup %4360  ;;  %v1172_v36 = vmul.f32 %v5664_v0, %v5484_v33  ;;  %v1069_v60 = vmul.f32 %v5634_v44, %v963_v45 }
 0x1fc   :  { %v5734_v55 = vpop.xlane.xlu1 %729  ;;  %v5748_v62 = vrot.slane %v5674_v38, %v5610_v24  ;;  %4380 = vrsqrt.f32 %v1088_v1  ;;  %v4363_v52 = vpop.eup %4362  ;;  %v1180_v39 = vmul.f32 %v4347_v9, %v5500_v35  ;;  %v1184_v15 = vmul.f32 %v4353_v53, %v5528_v41 }
 0x1fd   :  { %1416 = vperm.xlu0 %4328, %v5724_v13   ;;  %1410 = vperm.xlu1 %4329, %v5727_v23   ;;  %v5753_v26 = vmul.f32 %v5721_v14, %v1188_v12  ;;  %v5756_v57 = vmul.f32 %v5683_v46, %v1179_v29  ;;  %v4365_v4 = vpop.eup %4364  ;;  %v1185_v33 = vmul.f32 %v4355_v47, %v5532_v58  ;;  %4382 = vrsqrt.f32 %v1075_v37  ;;  %v9233_v37 = vld [vmem:[#allocation38_spill] sm:$0xff] }
 0x1fe   :  { %v1193_v0 = vmul.f32 %v4357_v54, %v5536_v17  ;;  %v1200_v45 = vmul.f32 %v4363_v52, %v5591_v2  ;;  %v5763_v31 = vrot.slane %v5674_v38, %v5605_v43  ;;  %v4367_v41 = vpop.eup %4366  ;;  %v1195_v9 = vmul.f32 %v4361_v18, %v5546_v8 }
 0x1ff   :  { %9225 = vst [vmem:[#allocation48_spill] sm:$0xff] %v5753_v26  ;;  %9226 = vst [vmem:[#allocation47_spill] sm:$0xff] %v5756_v57  ;;  %v1199_v29 = vmul.f32 %v4365_v4, %v5564_v7  ;;  %v5772_v17 = vmul.f32 %v5683_v46, %v1184_v15  ;;  %v4369_v2 = vpop.eup %4368  ;;  %v1207_v58 = vmul.f32 %v4359_v51, %v5540_v5  ;;  %4384 = vrsqrt.f32 %v1053_v19 }
 0x200   :  { %v5765_v35 = vpop.xlane.xlu1 %731  ;;  %v1208_v53 = vmul.f32 %v4367_v41, %v5542_v40  ;;  %v5778_v1 = vrot.slane %v5674_v38, %v5630_v56  ;;  %v5781_v8 = vmul.f32 %v5748_v62, %v1200_v45  ;;  %v4371_v7 = vpop.eup %4370  ;;  %v5784_v47 = vmul.f32 %v5748_v62, %v1195_v9 }
 0x201   :  { %1461 = vperm.xlu0 %4328, %v5753_v26   ;;  %1434 = vperm.xlu1 %4329, %v5756_v57   ;;  %9227 = vst [vmem:[#allocation96_spill] sm:$0xff] %v5772_v17  ;;  %v5787_v54 = vmul.f32 %v5679_v6, %v1172_v36  ;;  %v5790_v3 = vmul.f32 %v5683_v46, %v1185_v33  ;;  %v4373_v40 = vpop.eup %4372  ;;  %4386 = vrsqrt.f32 %v1055_v20  ;;  %v9240_v9 = vmax.f32 %v9214_v25, 1e-16 }
 0x202   :  { %9228 = vst [vmem:[#allocation97_spill] sm:$0xff] %v5781_v8  ;;  %9229 = vst [vmem:[#allocation98_spill] sm:$0xff] %v5784_v47  ;;  %v5793_v5 = vmul.f32 %v5748_v62, %v1199_v29  ;;  %v1182_v51 = vmul.f32 %v5706_v11, %v5514_v48  ;;  %v1201_v12 = vmul.f32 %v4369_v2, %v9233_v37  ;;  %v4375_v36 = vpop.eup %4374  ;;  %4388 = vrsqrt.f32 %v1066_v59 }
 0x203   :  { %9230 = vst [vmem:[#allocation99_spill] sm:$0xff] %v5787_v54  ;;  %9231 = vst [vmem:[#allocation100_spill] sm:$0xff] %v5790_v3  ;;  %v1215_v22 = vmul.f32 %v4371_v7, %v5656_v27  ;;  %v5800_v52 = vmul.f32 %v5763_v31, %v1208_v53  ;;  %v5805_v4 = vmul.f32 %v5721_v14, %v1193_v0  ;;  %v4377_v11 = vpop.eup %4376  ;;  %v9237_v27 = vmax.f32 %v5458_v50, 1e-16  ;;  %v9241_v0 = vld [vmem:[#allocation92_spill] sm:$0xff]  ;;  %v9245_v53 = vld [vmem:[#allocation58_spill] sm:$0xff] }
 0x204   :  { %9232 = vst [vmem:[#allocation101_spill] sm:$0xff] %v5793_v5  ;;  %v692_v18 = vpop.xlane.xlu1 %691  ;;  %v5808_v48 = vmul.f32 %v5763_v31, %v1207_v58  ;;  %v5814_v45 = vmul.f32 %v5748_v62, %v1201_v12  ;;  %v4379_v41 = vpop.eup %4378  ;;  %v1046_v29 = vmul.f32 %v9241_v0, %v9240_v9  ;;  %v5826_v20 = vmul.f32 %v5683_v46, %v1182_v51 }
 0x205   :  { %9234 = vst [vmem:[#allocation38_spill] sm:$0xff] %v5800_v52  ;;  %v1209_v15 = vmul.f32 %v4373_v40, %v692_v18  ;;  %1482 = vperm.xlu0 %4328, %v5784_v47   ;;  %1413 = vperm.xlu1 %4329, %v5787_v54   ;;  %9235 = vst [vmem:[#allocation102_spill] sm:$0xff] %v5805_v4  ;;  %v1089_v33 = vmul.f32 %v5651_v61, %v9237_v27  ;;  %v942_v7 = vmax.f32 %v9245_v53, 1e-16  ;;  %v9246_v40 = vld [vmem:[#allocation23_spill] sm:$0xff]  ;;  %v9248_v18 = vld [vmem:[#allocation33_spill] sm:$0xff] }
 0x206   :  { %9236 = vst [vmem:[#allocation103_spill] sm:$0xff] %v5808_v48  ;;  %9238 = vst [vmem:[#allocation104_spill] sm:$0xff] %v5814_v45  ;;  %v5817_v19 = vmul.f32 %v5778_v1, %v1215_v22  ;;  %v5829_v50 = vmul.f32 %v5683_v46, %v1180_v39  ;;  %v4381_v58 = vpop.eup %4380  ;;  %v990_v37 = vmax.f32 %v9246_v40, 1e-16  ;;  %v9247_v12 = vmax.f32 %v5278_v49, 1e-16 }
 0x207   :  { %v5823_v2 = vmul.f32 %v5763_v31, %v1209_v15  ;;  %9243 = vst [vmem:[#allocation106_spill] sm:$0xff] %v5826_v20  ;;  %v1186_v15 = vmul.f32 %v4377_v11, %v9248_v18  ;;  %v9249_v27 = vld [vmem:[#allocation85_spill] sm:$0xff]  ;;  %4390 = vrsqrt.f32 %v1069_v60  ;;  %v9250_v39 = vld [vmem:[#allocation50_spill] sm:$0xff]  ;;  %v4383_v40 = vpop.eup %4382 }
 0x208   :  { %9239 = vst [vmem:[#allocation105_spill] sm:$0xff] %v5817_v19  ;;  %9244 = vst [vmem:[#allocation107_spill] sm:$0xff] %v5829_v50  ;;  %v1082_v25 = vmul.f32 %v5651_v61, %v9247_v12  ;;  %v706_v22 = vpop.xlane.xlu1 %705  ;;  %v1196_v9 = vmul.f32 %v4379_v41, %v9249_v27  ;;  %v955_v53 = vmax.f32 %v9250_v39, 1e-16  ;;  %4392 = vrsqrt.f32 %v1089_v33  ;;  %v9254_v41 = vld [vmem:[#allocation16_spill] sm:$0xff] }
 0x209   :  { %9242 = vst [vmem:[#allocation92_spill] sm:$0xff] %v5823_v2  ;;  %v1216_v51 = vmul.f32 %v4381_v58, %v706_v22  ;;  %1443 = vperm.xlu0 %4328, %v5826_v20   ;;  %1437 = vperm.xlu1 %4329, %v5829_v50   ;;  %v1096_v59 = vmul.f32 %v5716_v21, %v990_v37  ;;  %4394 = vrsqrt.f32 %v1046_v29  ;;  %v991_v58 = vmax.f32 %v9254_v41, 1e-16  ;;  %v9255_v33 = vld [vmem:[#allocation28_spill] sm:$0xff]  ;;  %v9256_v29 = vld [vmem:[#allocation75_spill] sm:$0xff]  ;;  %v4385_v39 = vpop.eup %4384  ;;  %v9259_v41 = vld [vmem:[#allocation53_spill] sm:$0xff] }
 0x20a   :  { %v5846_v11 = vmul.f32 %v5748_v62, %v1196_v9  ;;  %v5849_v60 = vmul.f32 %v5721_v14, %v1186_v15  ;;  %v1048_v12 = vmul.f32 %v9241_v0, %v942_v7  ;;  %v1187_v18 = vmul.f32 %v4375_v36, %v9255_v33  ;;  %v9257_v9 = vld [vmem:[#allocation60_spill] sm:$0xff]  ;;  %v9262_v33 = vld [vmem:[#allocation54_spill] sm:$0xff] }
 0x20b   :  { %v5843_v49 = vmul.f32 %v5778_v1, %v1216_v51  ;;  %v1061_v37 = vmul.f32 %v5600_v32, %v955_v53  ;;  %v1203_v27 = vmul.f32 %v4383_v40, %v9256_v29  ;;  %4396 = vrsqrt.f32 %v1082_v25  ;;  %v4387_v40 = vpop.eup %4386 }
 0x20c   :  { %9252 = vst [vmem:[#allocation23_spill] sm:$0xff] %v5846_v11  ;;  %9253 = vst [vmem:[#allocation33_spill] sm:$0xff] %v5849_v60  ;;  %v5853_v22 = vpop.xlane.xlu1 %719  ;;  %v957_v15 = vmax.f32 %v9257_v9, 1e-16  ;;  %v5862_v51 = vsub.s32 7, %v5209_v16  ;;  %4398 = vrsqrt.f32 %v1096_v59  ;;  %v1097_v7 = vmul.f32 %v5716_v21, %v991_v58  ;;  %v9264_v59 = vld [vmem:[#allocation30_spill] sm:$0xff] }
 0x20d   :  { %9251 = vst [vmem:[#allocation58_spill] sm:$0xff] %v5843_v49  ;;  %1485 = vperm.xlu0 %4328, %v5846_v11   ;;  %1455 = vperm.xlu1 %4329, %v5849_v60   ;;  %v968_v36 = vmax.f32 %v9259_v41, 1e-16  ;;  %v5867_v53 = vmul.f32 %v5763_v31, %v1203_v27  ;;  %v5870_v25 = vmul.f32 %v5721_v14, %v1187_v18  ;;  %v941_v29 = vmax.f32 %v9262_v33, 1e-16  ;;  %v9263_v11 = vld [vmem:[#allocation62_spill] sm:$0xff]  ;;  %v4389_v18 = vpop.eup %4388 }
 0x20e   :  { %9258 = vst [vmem:[#allocation85_spill] sm:$0xff] %v5862_v51  ;;  %v971_v9 = vmax.f32 %v9263_v11, 1e-16  ;;  %4400 = vrsqrt.f32 %v1048_v12  ;;  %v1181_v47 = vmul.f32 %v4385_v39, %v9264_v59  ;;  %v9265_v41 = vld [vmem:[#allocation77_spill] sm:$0xff]  ;;  %v5883_v27 = vrot.slane %v5562_v63, %v5862_v51  ;;  %v9268_v33 = vld [vmem:[#allocation22_spill] sm:$0xff] }
 0x20f   :  { %9260 = vst [vmem:[#allocation50_spill] sm:$0xff] %v5867_v53  ;;  %9261 = vst [vmem:[#allocation16_spill] sm:$0xff] %v5870_v25  ;;  %4402 = vrsqrt.f32 %v1061_v37  ;;  %v1074_v58 = vmul.f32 %v5626_v10, %v968_v36  ;;  %v1183_v26 = vmul.f32 %v4387_v40, %v9265_v41  ;;  %v1063_v11 = vmul.f32 %v5600_v32, %v957_v15 }
 0x210   :  { %v5874_v20 = vpop.xlane.xlu1 %733  ;;  %4404 = vrsqrt.f32 %v1097_v7  ;;  %v1047_v39 = vmul.f32 %v9241_v0, %v941_v29  ;;  %v5891_v36 = vmul.f32 %v5683_v46, %v1181_v47  ;;  %v999_v59 = vmax.f32 %v9268_v33, 1e-16  ;;  %v9270_v7 = vld [vmem:[#allocation87_spill] sm:$0xff]  ;;  %v9272_v47 = vld [vmem:[#allocation64_spill] sm:$0xff] }
 0x211   :  { %1506 = vperm.xlu0 %4328, %v5867_v53   ;;  %1458 = vperm.xlu1 %4329, %v5870_v25   ;;  %v4391_v12 = vpop.eup %4390  ;;  %v5888_v37 = vmul.f32 %v5683_v46, %v1183_v26  ;;  %v1077_v41 = vmul.f32 %v5626_v10, %v971_v9  ;;  %4406 = vrsqrt.f32 %v1074_v58  ;;  %v9269_v25 = vld [vmem:[#allocation83_spill] sm:$0xff]  ;;  %v984_v29 = vmax.f32 %v9272_v47, 1e-16 }
 0x212   :  { %9267 = vst [vmem:[#allocation75_spill] sm:$0xff] %v5891_v36  ;;  %v4393_v40 = vpop.eup %4392  ;;  %v1194_v15 = vmul.f32 %v4389_v18, %v9269_v25  ;;  %v1197_v24 = vmul.f32 %v4391_v12, %v9270_v7  ;;  %v9271_v26 = vld [vmem:[#allocation55_spill] sm:$0xff]  ;;  %4408 = vrsqrt.f32 %v1063_v11  ;;  %v1105_v33 = vmul.f32 %v5883_v27, %v999_v59  ;;  %v9276_v12 = vld [vmem:[#allocation66_spill] sm:$0xff]  ;;  %v9277_v7 = vld [vmem:[#allocation24_spill] sm:$0xff] }
 0x213   :  { %9266 = vst [vmem:[#allocation28_spill] sm:$0xff] %v5888_v37  ;;  %v4395_v63 = vpop.eup %4394  ;;  %v956_v46 = vmax.f32 %v9271_v26, 1e-16  ;;  %4410 = vrsqrt.f32 %v1047_v39  ;;  %v9278_v59 = vld [vmem:[#allocation90_spill] sm:$0xff] }
 0x214   :  { %v708_v53 = vpop.xlane.xlu1 %707  ;;  %v5906_v25 = vmul.f32 %v5748_v62, %v1197_v24  ;;  %v1174_v26 = vmul.f32 %v4395_v63, %v9277_v7  ;;  %4412 = vrsqrt.f32 %v1077_v41 }
 0x215   :  { %v1217_v60 = vmul.f32 %v4393_v40, %v708_v53  ;;  %1446 = vperm.xlu0 %4328, %v5888_v37   ;;  %1440 = vperm.xlu1 %4329, %v5891_v36   ;;  %v4397_v9 = vpop.eup %4396  ;;  %v5909_v53 = vmul.f32 %v5748_v62, %v1194_v15  ;;  %v943_v40 = vmax.f32 %v9276_v12, 1e-16  ;;  %v1062_v11 = vmul.f32 %v5600_v32, %v956_v46 }
 0x216   :  { %9274 = vst [vmem:[#allocation53_spill] sm:$0xff] %v5906_v25  ;;  %v4399_v18 = vpop.eup %4398  ;;  %v1210_v39 = vmul.f32 %v4397_v9, %v9278_v59  ;;  %v1090_v12 = vmul.f32 %v5716_v21, %v984_v29  ;;  %4414 = vrsqrt.f32 %v1105_v33  ;;  %v5929_v9 = vmul.f32 %v5679_v6, %v1174_v26  ;;  %v9283_v59 = vld [vmem:[#allocation67_spill] sm:$0xff]  ;;  %v9284_v29 = vld [vmem:[#allocation26_spill] sm:$0xff] }
 0x217   :  { %v5903_v58 = vmul.f32 %v5778_v1, %v1217_v60  ;;  %9275 = vst [vmem:[#allocation54_spill] sm:$0xff] %v5909_v53  ;;  %v5917_v60 = vrot.slane %v5674_v38, %v5687_v42  ;;  %v1049_v37 = vmul.f32 %v9241_v0, %v943_v40  ;;  %v9285_v42 = vld [vmem:[#allocation32_spill] sm:$0xff]  ;;  %4416 = vrsqrt.f32 %v1062_v11  ;;  %v9289_v11 = vld [vmem:[#allocation57_spill] sm:$0xff] }
 0x218   :  { %v722_v47 = vpop.xlane.xlu1 %721  ;;  %v4401_v15 = vpop.eup %4400  ;;  %v5926_v41 = vmul.f32 %v5778_v1, %v1210_v39  ;;  %9281 = vst [vmem:[#allocation77_spill] sm:$0xff] %v5929_v9  ;;  %4418 = vrsqrt.f32 %v1090_v12  ;;  %v9291_v12 = vld [vmem:[#allocation79_spill] sm:$0xff] }
 0x219   :  { %9273 = vst [vmem:[#allocation60_spill] sm:$0xff] %v5903_v58  ;;  %v1224_v24 = vmul.f32 %v4399_v18, %v722_v47  ;;  %1488 = vperm.xlu0 %4328, %v5906_v25   ;;  %1479 = vperm.xlu1 %4329, %v5909_v53   ;;  %v4403_v63 = vpop.eup %4402  ;;  %v9282_v18 = vld [vmem:[#allocation56_spill] sm:$0xff]  ;;  %v958_v25 = vmax.f32 %v9283_v59, 1e-16  ;;  %v1176_v33 = vmul.f32 %v4401_v15, %v9284_v29  ;;  %4420 = vrsqrt.f32 %v1049_v37 }
 0x21a   :  { %9280 = vst [vmem:[#allocation30_spill] sm:$0xff] %v5926_v41  ;;  %v4405_v7 = vpop.eup %4404  ;;  %v970_v47 = vmax.f32 %v9282_v18, 1e-16  ;;  %v1189_v36 = vmul.f32 %v4403_v63, %v9285_v42 }
 0x21b   :  { %v5923_v46 = vmul.f32 %v5917_v60, %v1224_v24  ;;  %v4407_v39 = vpop.eup %4406  ;;  %v5943_v0 = vmul.f32 %v5679_v6, %v1176_v33  ;;  %v1064_v29 = vmul.f32 %v5600_v32, %v958_v25  ;;  %v9292_v33 = vld [vmem:[#allocation69_spill] sm:$0xff]  ;;  %v9296_v25 = vld [vmem:[#allocation80_spill] sm:$0xff] }
 0x21c   :  { %v724_v53 = vpop.xlane.xlu1 %723  ;;  %v1076_v26 = vmul.f32 %v5626_v10, %v970_v47  ;;  %v5946_v40 = vmul.f32 %v5721_v14, %v1189_v36  ;;  %v4409_v42 = vpop.eup %4408  ;;  %v972_v36 = vmax.f32 %v9292_v33, 1e-16  ;;  %v5968_v33 = vrot.slane %v5674_v38, %v5862_v51 }
 0x21d   :  { %9279 = vst [vmem:[#allocation62_spill] sm:$0xff] %v5923_v46  ;;  %v1225_v24 = vmul.f32 %v4405_v7, %v724_v53  ;;  %1527 = vperm.xlu0 %4328, %v5926_v41   ;;  %1419 = vperm.xlu1 %4329, %v5929_v9   ;;  %9287 = vst [vmem:[#allocation83_spill] sm:$0xff] %v5943_v0  ;;  %v977_v53 = vmax.f32 %v9289_v11, 1e-16  ;;  %v4411_v63 = vpop.eup %4410  ;;  %v9290_v7 = vld [vmem:[#allocation74_spill] sm:$0xff]  ;;  %v1191_v59 = vmul.f32 %v4409_v42, %v9291_v12  ;;  %v9295_v42 = vld [vmem:[#allocation27_spill] sm:$0xff] }
 0x21e   :  { %9288 = vst [vmem:[#allocation87_spill] sm:$0xff] %v5946_v40  ;;  %v1202_v47 = vmul.f32 %v4407_v39, %v9290_v7  ;;  %4422 = vrsqrt.f32 %v1076_v26  ;;  %v4413_v11 = vpop.eup %4412  ;;  %v1175_v7 = vmul.f32 %v4411_v63, %v9295_v42  ;;  %v9298_v63 = vld [vmem:[#allocation59_spill] sm:$0xff] }
 0x21f   :  { %v5940_v18 = vmul.f32 %v5917_v60, %v1225_v24  ;;  %v1083_v24 = vmul.f32 %v5651_v61, %v977_v53  ;;  %v5959_v41 = vmul.f32 %v5721_v14, %v1191_v59  ;;  %v1205_v12 = vmul.f32 %v4413_v11, %v9296_v25  ;;  %v9297_v53 = vld [vmem:[#allocation71_spill] sm:$0xff] }
 0x220   :  { %v5949_v15 = vpop.xlane.xlu1 %737  ;;  %v5962_v37 = vmul.f32 %v5763_v31, %v1202_v47  ;;  %v4415_v39 = vpop.eup %4414  ;;  %4424 = vrsqrt.f32 %v1064_v29  ;;  %v986_v59 = vmax.f32 %v9297_v53, 1e-16  ;;  %v1078_v47 = vmul.f32 %v5626_v10, %v972_v36  ;;  %v9304_v36 = vld [vmem:[#allocation91_spill] sm:$0xff] }
 0x221   :  { %9286 = vst [vmem:[#allocation22_spill] sm:$0xff] %v5940_v18  ;;  %1425 = vperm.xlu0 %4328, %v5943_v0   ;;  %1464 = vperm.xlu1 %4329, %v5946_v40   ;;  %9293 = vst [vmem:[#allocation55_spill] sm:$0xff] %v5959_v41  ;;  %4426 = vrsqrt.f32 %v1083_v24  ;;  %v4417_v0 = vpop.eup %4416  ;;  %v964_v42 = vmax.f32 %v9298_v63, 1e-16  ;;  %v5979_v29 = vmul.f32 %v5763_v31, %v1205_v12 }
 0x222   :  { %9294 = vst [vmem:[#allocation64_spill] sm:$0xff] %v5962_v37  ;;  %v5982_v38 = vmul.f32 %v5679_v6, %v1175_v7  ;;  %4428 = vrsqrt.f32 %v1078_v47  ;;  %v1092_v12 = vmul.f32 %v5716_v21, %v986_v59 }
 0x223   :  { %9300 = vst [vmem:[#allocation24_spill] sm:$0xff] %v5979_v29  ;;  %v1070_v10 = vmul.f32 %v5634_v44, %v964_v42  ;;  %v9308_v42 = vld [vmem:[#allocation29_spill] sm:$0xff] }
 0x224   :  { %v740_v32 = vpop.xlane.xlu1 %739  ;;  %9301 = vst [vmem:[#allocation90_spill] sm:$0xff] %v5982_v38 }
 0x225   :  { %v1233_v26 = vmul.f32 %v4415_v39, %v740_v32  ;;  %1470 = vperm.xlu0 %4328, %v5959_v41   ;;  %1503 = vperm.xlu1 %4329, %v5962_v37   ;;  %v4419_v39 = vpop.eup %4418  ;;  %v9302_v32 = vld [vmem:[#allocation72_spill] sm:$0xff]  ;;  %4430 = vrsqrt.f32 %v1070_v10 }
 0x226   :  { %v993_v25 = vmax.f32 %v9302_v32, 1e-16  ;;  %v9303_v41 = vld [vmem:[#allocation76_spill] sm:$0xff]  ;;  %v1218_v24 = vmul.f32 %v4419_v39, %v9304_v36  ;;  %v9309_v36 = vld [vmem:[#allocation78_spill] sm:$0xff]  ;;  %4432 = vrsqrt.f32 %v1092_v12  ;;  %v9315_v12 = vld [vmem:[#allocation17_spill] sm:$0xff] }
 0x227   :  { %v5976_v11 = vmul.f32 %v5968_v33, %v1233_v26  ;;  %v1190_v53 = vmul.f32 %v4417_v0, %v9303_v41  ;;  %v4421_v26 = vpop.eup %4420  ;;  %v9307_v41 = vld [vmem:[#allocation61_spill] sm:$0xff] }
 0x228   :  { %v5992_v7 = vmul.f32 %v5917_v60, %v1218_v24  ;;  %v4423_v32 = vpop.eup %4422  ;;  %v978_v0 = vmax.f32 %v9307_v41, 1e-16  ;;  %v1099_v44 = vmul.f32 %v5883_v27, %v993_v25  ;;  %v1177_v39 = vmul.f32 %v4421_v26, %v9308_v42  ;;  %v9312_v41 = vld [vmem:[#allocation63_spill] sm:$0xff]  ;;  %v9314_v42 = vld [vmem:[#allocation84_spill] sm:$0xff] }
 0x229   :  { %9299 = vst [vmem:[#allocation66_spill] sm:$0xff] %v5976_v11  ;;  %1512 = vperm.xlu0 %4328, %v5979_v29   ;;  %1422 = vperm.xlu1 %4329, %v5982_v38   ;;  %v5995_v63 = vmul.f32 %v5721_v14, %v1190_v53  ;;  %v1204_v29 = vmul.f32 %v4423_v32, %v9309_v36  ;;  %v985_v26 = vmax.f32 %v9312_v41, 1e-16  ;;  %v9313_v32 = vld [vmem:[#allocation81_spill] sm:$0xff]  ;;  %v9318_v41 = vld [vmem:[#allocation18_spill] sm:$0xff] }
 0x22a   :  { %9305 = vst [vmem:[#allocation56_spill] sm:$0xff] %v5992_v7  ;;  %v1084_v59 = vmul.f32 %v5651_v61, %v978_v0  ;;  %v4425_v47 = vpop.eup %4424  ;;  %v6005_v53 = vmul.f32 %v5679_v6, %v1177_v39  ;;  %4434 = vrsqrt.f32 %v1099_v44  ;;  %v980_v0 = vmax.f32 %v9315_v12, 1e-16 }
 0x22b   :  { %9306 = vst [vmem:[#allocation67_spill] sm:$0xff] %v5995_v63  ;;  %v6008_v24 = vmul.f32 %v5763_v31, %v1204_v29  ;;  %v4427_v25 = vpop.eup %4426  ;;  %v1192_v10 = vmul.f32 %v4425_v47, %v9313_v32  ;;  %v1091_v6 = vmul.f32 %v5716_v21, %v985_v26  ;;  %v994_v47 = vmax.f32 %v9318_v41, 1e-16  ;;  %v9319_v32 = vld [vmem:[#allocation82_spill] sm:$0xff] }
 0x22c   :  { %9310 = vst [vmem:[#allocation26_spill] sm:$0xff] %v6005_v53  ;;  %v1211_v36 = vmul.f32 %v4427_v25, %v9314_v42  ;;  %4436 = vrsqrt.f32 %v1084_v59  ;;  %v4429_v44 = vpop.eup %4428  ;;  %v1086_v59 = vmul.f32 %v5651_v61, %v980_v0 }
 0x22d   :  { %1551 = vperm.xlu0 %4328, %v5992_v7   ;;  %1467 = vperm.xlu1 %4329, %v5995_v63   ;;  %9311 = vst [vmem:[#allocation32_spill] sm:$0xff] %v6008_v24  ;;  %v6018_v29 = vmul.f32 %v5721_v14, %v1192_v10  ;;  %v1206_v25 = vmul.f32 %v4429_v44, %v9319_v32  ;;  %4438 = vrsqrt.f32 %v1091_v6 }
 0x22e   :  { %v6021_v39 = vmul.f32 %v5778_v1, %v1211_v36  ;;  %v1100_v10 = vmul.f32 %v5883_v27, %v994_v47  ;;  %v9321_v36 = vld [vmem:[#allocation86_spill] sm:$0xff]  ;;  %4440 = vrsqrt.f32 %v1086_v59  ;;  %v9325_v47 = vld [vmem:[#allocation68_spill] sm:$0xff] }
 0x22f   :  { %9316 = vst [vmem:[#allocation57_spill] sm:$0xff] %v6018_v29  ;;  %v4431_v42 = vpop.eup %4430  ;;  %v6029_v26 = vmul.f32 %v5763_v31, %v1206_v25  ;;  %v979_v25 = vmax.f32 %v9325_v47, 1e-16 }
 0x230   :  { %9317 = vst [vmem:[#allocation74_spill] sm:$0xff] %v6021_v39  ;;  %v4433_v14 = vpop.eup %4432  ;;  %v1198_v12 = vmul.f32 %v4431_v42, %v9321_v36  ;;  %v9326_v42 = vld [vmem:[#allocation19_spill] sm:$0xff]  ;;  %4442 = vrsqrt.f32 %v1100_v10  ;;  %v9331_v10 = vld [vmem:[#allocation89_spill] sm:$0xff] }
 0x231   :  { %1428 = vperm.xlu0 %4328, %v6005_v53   ;;  %1509 = vperm.xlu1 %4329, %v6008_v24   ;;  %9320 = vst [vmem:[#allocation79_spill] sm:$0xff] %v6029_v26  ;;  %v9322_v53 = vld [vmem:[#allocation95_spill] sm:$0xff]  ;;  %v988_v36 = vmax.f32 %v9326_v42, 1e-16 }
 0x232   :  { %v1220_v41 = vmul.f32 %v4433_v14, %v9322_v53  ;;  %v6041_v31 = vmul.f32 %v5748_v62, %v1198_v12  ;;  %v9327_v53 = vld [vmem:[#allocation88_spill] sm:$0xff] }
 0x233   :  { %v1094_v47 = vmul.f32 %v5716_v21, %v988_v36 }
 0x234   :  { %v4435_v44 = vpop.eup %4434  ;;  %v6038_v0 = vmul.f32 %v5917_v60, %v1220_v41  ;;  %9324 = vst [vmem:[#allocation27_spill] sm:$0xff] %v6041_v31  ;;  %v9330_v41 = vld [vmem:[#allocation70_spill] sm:$0xff] }
 0x235   :  { %1473 = vperm.xlu0 %4328, %v6018_v29   ;;  %1530 = vperm.xlu1 %4329, %v6021_v39   ;;  %v1227_v6 = vmul.f32 %v4435_v44, %v5704_v28  ;;  %v1085_v28 = vmul.f32 %v5651_v61, %v979_v25  ;;  %v992_v44 = vmax.f32 %v9330_v41, 1e-16  ;;  %v9333_v25 = vld [vmem:[#allocation21_spill] sm:$0xff] }
 0x236   :  { %9323 = vst [vmem:[#allocation69_spill] sm:$0xff] %v6038_v0  ;;  %v4437_v32 = vpop.eup %4436 }
 0x237   :  { %v1212_v14 = vmul.f32 %v4437_v32, %v9327_v53  ;;  %v6050_v59 = vmul.f32 %v5968_v33, %v1227_v6  ;;  %v4439_v12 = vpop.eup %4438  ;;  %4444 = vrsqrt.f32 %v1085_v28  ;;  %v1098_v61 = vmul.f32 %v5883_v27, %v992_v44 }
 0x238   :  { %v1219_v42 = vmul.f32 %v4439_v12, %v9331_v10  ;;  %v4441_v32 = vpop.eup %4440  ;;  %v989_v53 = vmax.f32 %v9333_v25, 1e-16  ;;  %4446 = vrsqrt.f32 %v1094_v47  ;;  %v9338_v25 = vld [vmem:[#allocation94_spill] sm:$0xff] }
 0x239   :  { %1515 = vperm.xlu0 %4328, %v6029_v26   ;;  %1449 = vperm.xlu1 %4329, %v5772_v17   ;;  %9328 = vst [vmem:[#allocation80_spill] sm:$0xff] %v6050_v59  ;;  %v6053_v62 = vmul.f32 %v5778_v1, %v1212_v14  ;;  %v9334_v14 = vld [vmem:[#allocation37_spill] sm:$0xff]  ;;  %4448 = vrsqrt.f32 %v1098_v61 }
 0x23a   :  { %v6062_v6 = vmul.f32 %v5917_v60, %v1219_v42  ;;  %v1214_v41 = vmul.f32 %v4441_v32, %v9334_v14  ;;  %v4443_v36 = vpop.eup %4442  ;;  %v1095_v44 = vmul.f32 %v5716_v21, %v989_v53  ;;  %v9337_v42 = vld [vmem:[#allocation73_spill] sm:$0xff]  ;;  %v9339_v14 = vld [vmem:[#allocation20_spill] sm:$0xff] }
 0x23b   :  { %9329 = vst [vmem:[#allocation71_spill] sm:$0xff] %v6053_v62  ;;  %v1228_v12 = vmul.f32 %v4443_v36, %v5734_v55  ;;  %v987_v32 = vmax.f32 %v9337_v42, 1e-16  ;;  %v997_v53 = vmax.f32 %v9339_v14, 1e-16  ;;  %v9347_v14 = vld [vmem:[#allocation34_spill] sm:$0xff] }
 0x23c   :  { %9332 = vst [vmem:[#allocation59_spill] sm:$0xff] %v6062_v6  ;;  %v6070_v28 = vmul.f32 %v5778_v1, %v1214_v41  ;;  %4450 = vrsqrt.f32 %v1095_v44  ;;  %v9342_v44 = vld [vmem:[#allocation36_spill] sm:$0xff] }
 0x23d   :  { %1557 = vperm.xlu0 %4328, %v6038_v0   ;;  %1491 = vperm.xlu1 %4329, %v6041_v31   ;;  %v6076_v47 = vmul.f32 %v5968_v33, %v1228_v12  ;;  %v1093_v41 = vmul.f32 %v5716_v21, %v987_v32 }
 0x23e   :  { %9335 = vst [vmem:[#allocation72_spill] sm:$0xff] %v6070_v28 }
 0x23f   :  { %9336 = vst [vmem:[#allocation76_spill] sm:$0xff] %v6076_v47  ;;  %4452 = vrsqrt.f32 %v1093_v41  ;;  %v9348_v41 = vld [vmem:[#allocation31_spill] sm:$0xff] }
 0x241   :  { %1578 = vperm.xlu0 %4328, %v6050_v59   ;;  %1533 = vperm.xlu1 %4329, %v6053_v62   ;;  %v4445_v10 = vpop.eup %4444  ;;  %v9356_v62 = vlaneseq }
 0x242   :  { %v1213_v61 = vmul.f32 %v4445_v10, %v9338_v25  ;;  %v4447_v55 = vpop.eup %4446  ;;  %v1103_v10 = vmul.f32 %v5883_v27, %v997_v53 }
 0x243   :  { %v1222_v36 = vmul.f32 %v4447_v55, %v5672_v30  ;;  %v1599_v31 = vand.u32 127, %v9356_v62 }
 0x244   :  { %v6086_v12 = vmul.f32 %v5778_v1, %v1213_v61  ;;  %4454 = vrsqrt.f32 %v1103_v10  ;;  %v9350_v10 = vld [vmem:[#allocation40_spill] sm:$0xff] }
 0x245   :  { %1497 = vperm.xlu0 %4328, %v5781_v8   ;;  %1554 = vperm.xlu1 %4329, %v6062_v6   ;;  %v9341_v8 = vld [vmem:[#allocation25_spill] sm:$0xff]  ;;  %v6094_v25 = vmul.f32 %v5917_v60, %v1222_v36  ;;  %v1604_v39 = vadd.s32 4294967288, %v1599_v31  ;;  %v1611_v24 = vadd.s32 4294967280, %v1599_v31  ;;  %v1618_v56 = vadd.s32 4294967272, %v1599_v31 }
 0x246   :  { %9340 = vst [vmem:[#allocation91_spill] sm:$0xff] %v6086_v12  ;;  %v998_v42 = vmax.f32 %v9341_v8, 1e-16  ;;  %v9345_v8 = vld [vmem:[#allocation15_spill] sm:$0xff]  ;;  %v1625_v54 = vadd.s32 4294967264, %v1599_v31  ;;  %v1632_v63 = vadd.s32 4294967256, %v1599_v31  ;;  %v6246_v38 = vsub.s32 %v1599_v31, %v5209_v16 }
 0x247   :  { %9343 = vst [vmem:[#allocation61_spill] sm:$0xff] %v6094_v25  ;;  %v6249_v37 = vsub.s32 %v1604_v39, %v5209_v16  ;;  %v6252_v23 = vsub.s32 %v1611_v24, %v5209_v16  ;;  %v1639_v62 = vadd.s32 4294967248, %v1599_v31  ;;  %v6255_v40 = vsub.s32 %v1618_v56, %v5209_v16 }
 0x248   :  { %v1104_v21 = vmul.f32 %v5883_v27, %v998_v42  ;;  %v6262_v34 = vsub.s32 %v1625_v54, %v5209_v16  ;;  %v6267_v24 = vsub.s32 %v1632_v63, %v5209_v16 }
 0x249   :  { %1539 = vperm.xlu0 %4328, %v6070_v28   ;;  %1452 = vperm.xlu1 %4329, %v5790_v3   ;;  %v4449_v28 = vpop.eup %4448  ;;  %v6280_v63 = vsub.s32 %v1639_v62, %v5209_v16 }
 0x24a   :  { %v1226_v59 = vmul.f32 %v4449_v28, %v9342_v44  ;;  %v4451_v1 = vpop.eup %4450  ;;  %v995_v28 = vmax.f32 %v9345_v8, 1e-16  ;;  %4456 = vrsqrt.f32 %v1104_v21 }
 0x24b   :  { %v1223_v32 = vmul.f32 %v4451_v1, %v5853_v22  ;;  %v4453_v55 = vpop.eup %4452  ;;  %v996_v22 = vmax.f32 %v9348_v41, 1e-16 }
 0x24c   :  { %v6097_v30 = vmul.f32 %v5968_v33, %v1226_v59  ;;  %v1101_v61 = vmul.f32 %v5883_v27, %v995_v28  ;;  %v1221_v53 = vmul.f32 %v4453_v55, %v9347_v14 }
 0x24d   :  { %1581 = vperm.xlu0 %4328, %v6076_v47   ;;  %1494 = vperm.xlu1 %4329, %v5793_v5   ;;  %v6108_v59 = vmul.f32 %v5917_v60, %v1223_v32  ;;  %v1102_v44 = vmul.f32 %v5883_v27, %v996_v22 }
 0x24e   :  { %9344 = vst [vmem:[#allocation29_spill] sm:$0xff] %v6097_v30  ;;  %4458 = vrsqrt.f32 %v1101_v61  ;;  %v6115_v36 = vmul.f32 %v5917_v60, %v1221_v53  ;;  %v4455_v42 = vpop.eup %4454 }
 0x24f   :  { %9346 = vst [vmem:[#allocation78_spill] sm:$0xff] %v6108_v59  ;;  %v1231_v21 = vmul.f32 %v4455_v42, %v9350_v10  ;;  %4460 = vrsqrt.f32 %v1102_v44 }
 0x250   :  { %9349 = vst [vmem:[#allocation63_spill] sm:$0xff] %v6115_v36 }
 0x251   :  { %1521 = vperm.xlu0 %4328, %v5800_v52   ;;  %1536 = vperm.xlu1 %4329, %v6086_v12   ;;  %v6123_v28 = vmul.f32 %v5968_v33, %v1231_v21 }
 0x253   :  { %9351 = vst [vmem:[#allocation81_spill] sm:$0xff] %v6123_v28 }
 0x254   :  { %v4457_v1 = vpop.eup %4456 }
 0x255   :  { %1563 = vperm.xlu0 %4328, %v6094_v25   ;;  %1575 = vperm.xlu1 %4329, %v6097_v30   ;;  %v1232_v8 = vmul.f32 %v4457_v1, %v5949_v15 }
 0x257   :  { %v6129_v32 = vmul.f32 %v5968_v33, %v1232_v8 }
 0x258   :  { %v4459_v60 = vpop.eup %4458 }
 0x259   :  { %1524 = vperm.xlu0 %4328, %v5823_v2   ;;  %1476 = vperm.xlu1 %4329, %v5805_v4   ;;  %v1229_v27 = vmul.f32 %v4459_v60, %v5765_v35  ;;  %9352 = vst [vmem:[#allocation84_spill] sm:$0xff] %v6129_v32  ;;  %v4461_v61 = vpop.eup %4460 }
 0x25a   :  { %v1230_v55 = vmul.f32 %v4461_v61, %v5874_v20 }
 0x25b   :  { %v6134_v15 = vmul.f32 %v5968_v33, %v1229_v27 }
 0x25c   :  { %v6140_v14 = vmul.f32 %v5968_v33, %v1230_v55 }
 0x25d   :  { %1566 = vperm.xlu0 %4328, %v6108_v59   ;;  %1518 = vperm.xlu1 %4329, %v5808_v48   ;;  %9353 = vst [vmem:[#allocation17_spill] sm:$0xff] %v6134_v15 }
 0x25e   :  { %9354 = vst [vmem:[#allocation18_spill] sm:$0xff] %v6140_v14 }
 0x261   :  { %1548 = vperm.xlu0 %4328, %v5903_v58   ;;  %1560 = vperm.xlu1 %4329, %v6115_v36  }
 0x265   :  { %1590 = vperm.xlu0 %4328, %v6123_v28   ;;  %1500 = vperm.xlu1 %4329, %v5814_v45  }
 0x269   :  { %1593 = vperm.xlu0 %4328, %v6129_v32   ;;  %1542 = vperm.xlu1 %4329, %v5817_v19  }
 0x26d   :  { %1584 = vperm.xlu1 %4329, %v6134_v15  }
 0x271   :  { %1545 = vperm.xlu1 %4329, %v5843_v49  }
 0x275   :  { %1587 = vperm.xlu1 %4329, %v6140_v14  }
 0x278   :  { %v6143_v35 = vpop.permute.xlu0 %1431  ;;  %v6145_v53 = vpop.permute.xlu1 %1407 }
 0x279   :  { %1569 = vperm.xlu1 %4329, %v5923_v46   ;;  %v1656_v56 = vrot.slane %v6143_v35, %v6246_v38 }
 0x27c   :  { %v6148_v41 = vpop.permute.xlu0 %1416  ;;  %v6150_v22 = vpop.permute.xlu1 %1410 }
 0x27d   :  { %1572 = vperm.xlu1 %4329, %v5940_v18   ;;  %v1608_v54 = vrot.slane %v6150_v22, %v6249_v37 }
 0x280   :  { %v6153_v20 = vpop.permute.xlu0 %1461  ;;  %v6155_v42 = vpop.permute.xlu1 %1434 }
 0x281   :  { %1596 = vperm.xlu1 %4329, %v5976_v11   ;;  %v1660_v13 = vrot.slane %v6155_v42, %v6249_v37 }
 0x284   :  { %v6158_v33 = vpop.permute.xlu0 %1482  ;;  %v6160_v44 = vpop.permute.xlu1 %1413 }
 0x285   :  { %v1738_v35 = vrot.slane %v6158_v33, %v6249_v37 }
 0x288   :  { %v6162_v10 = vpop.permute.xlu0 %1443  ;;  %v6164_v21 = vpop.permute.xlu1 %1437 }
 0x289   :  { %v1665_v39 = vrot.slane %v6164_v21, %v6252_v23  ;;  %v1661_v21 = vsel %vm1609_vm3, %v1660_v13, %v1656_v56 }
 0x28b   :  { %v1666_v22 = vsel %vm1616_vm4, %v1665_v39, %v1661_v21  ;;  %v1675_v21 = vrot.slane %v6162_v10, %v6262_v34 }
 0x28c   :  { %v6166_v1 = vpop.permute.xlu0 %1485  ;;  %v6168_v8 = vpop.permute.xlu1 %1455 }
 0x28d   :  { %v1695_v13 = vrot.slane %v6168_v8, %v6246_v38  ;;  %v1743_v8 = vrot.slane %v6166_v1, %v6252_v23 }
 0x290   :  { %v6170_v60 = vpop.permute.xlu0 %1506  ;;  %v6172_v27 = vpop.permute.xlu1 %1458 }
 0x294   :  { %v6174_v61 = vpop.permute.xlu0 %1446  ;;  %v6176_v55 = vpop.permute.xlu1 %1440 }
 0x295   :  { %v1670_v42 = vrot.slane %v6176_v55, %v6255_v40  ;;  %v1615_v55 = vrot.slane %v6160_v44, %v6252_v23 }
 0x297   :  { %v1671_v33 = vsel %vm1623_vm5, %v1670_v42, %v1666_v22 }
 0x298   :  { %v6178_v32 = vpop.permute.xlu0 %1488  ;;  %v6180_v28 = vpop.permute.xlu1 %1479 }
 0x29c   :  { %v6182_v58 = vpop.permute.xlu0 %1527  ;;  %v6184_v59 = vpop.permute.xlu1 %1419 }
 0x29d   :  { %v1629_v42 = vrot.slane %v6184_v59, %v6262_v34 }
 0x2a0   :  { %v6186_v2 = vpop.permute.xlu0 %1425  ;;  %v6188_v25 = vpop.permute.xlu1 %1464 }
 0x2a1   :  { %v1709_v10 = vrot.slane %v6188_v25, %v6255_v40  ;;  %v1777_v25 = vrot.slane %v6170_v60, %v6249_v37  ;;  %v1643_v60 = vrot.slane %v6186_v2, %v6280_v63 }
 0x2a4   :  { %v6190_v52 = vpop.permute.xlu0 %1470  ;;  %v6192_v47 = vpop.permute.xlu1 %1503 }
 0x2a5   :  { %v1773_v59 = vrot.slane %v6192_v47, %v6246_v38  ;;  %v1719_v2 = vrot.slane %v6190_v52, %v6267_v24 }
 0x2a8   :  { %v6194_v0 = vpop.permute.xlu0 %1512  ;;  %v6196_v26 = vpop.permute.xlu1 %1422 }
 0x2a9   :  { %v1636_v1 = vrot.slane %v6196_v26, %v6267_v24 }
 0x2ac   :  { %v6198_v11 = vpop.permute.xlu0 %1551  ;;  %v6200_v29 = vpop.permute.xlu1 %1467 }
 0x2b0   :  { %v6202_v18 = vpop.permute.xlu0 %1428  ;;  %v6204_v46 = vpop.permute.xlu1 %1509 }
 0x2b1   :  { %v1782_v22 = vrot.slane %v6204_v46, %v6252_v23 }
 0x2b4   :  { %v6206_v7 = vpop.permute.xlu0 %1473  ;;  %v6208_v14 = vpop.permute.xlu1 %1530 }
 0x2b8   :  { %v6210_v49 = vpop.permute.xlu0 %1515  ;;  %v6212_v15 = vpop.permute.xlu1 %1449 }
 0x2b9   :  { %v1685_v52 = vrot.slane %v6212_v15, %v6280_v63 }
 0x2bc   :  { %v6214_v19 = vpop.permute.xlu0 %1557  ;;  %v6216_v45 = vpop.permute.xlu1 %1491 }
 0x2c0   :  { %v6218_v36 = vpop.permute.xlu1 %1533  ;;  %v6220_v48 = vpop.permute.xlu0 %1578 }
 0x2c4   :  { %v6222_v4 = vpop.permute.xlu1 %1554  ;;  %v6224_v30 = vpop.permute.xlu0 %1497 }
 0x2c8   :  { %v6226_v12 = vpop.permute.xlu1 %1452  ;;  %v6230_v9 = vpop.permute.xlu0 %1539 }
 0x2cc   :  { %v6228_v51 = vpop.permute.xlu1 %1494  ;;  %v6234_v3 = vpop.permute.xlu0 %1581 }
 0x2cd   :  { %9355 = vst [vmem:[#allocation82_spill] sm:$0xff] %v6234_v3  ;;  %v1646_v3 = vadd.s32 4294967240, %v1599_v31  ;;  %v1603_v31 = vrot.slane %v6145_v53, %v6246_v38  ;;  %v1622_v53 = vrot.slane %v6148_v41, %v6255_v40  ;;  %v1676_v41 = vsel %vm1630_vm6, %v1675_v21, %v1671_v33 }
 0x2ce   :  { %v1724_v21 = vrot.slane %v6206_v7, %v6280_v63 }
 0x2cf   :  { %v6299_v44 = vsub.s32 %v1646_v3, %v5209_v16  ;;  %v1610_v39 = vsel %vm1609_vm3, %v1608_v54, %v1603_v31 }
 0x2d0   :  { %v6232_v5 = vpop.permute.xlu1 %1536  ;;  %v6241_v50 = vpop.permute.xlu0 %1521  ;;  %v1617_v16 = vsel %vm1616_vm4, %v1615_v55, %v1610_v39  ;;  %v1748_v55 = vrot.slane %v6178_v32, %v6255_v40 }
 0x2d1   :  { %9357 = vst [vmem:[#allocation86_spill] sm:$0xff] %v6241_v50  ;;  %v1624_v31 = vsel %vm1623_vm5, %v1622_v53, %v1617_v16  ;;  %v1650_v46 = vrot.slane %v6202_v18, %v6299_v44  ;;  %v1855_v16 = vrot.slane %v6222_v4, %v6249_v37  ;;  %v1821_v4 = vrot.slane %v6218_v36, %v6252_v23 }
 0x2d2   :  { %v1631_v32 = vsel %vm1630_vm6, %v1629_v42, %v1624_v31  ;;  %v1690_v15 = vrot.slane %v6226_v12, %v6299_v44  ;;  %v1826_v36 = vrot.slane %v6232_v5, %v6255_v40  ;;  %v1860_v12 = vrot.slane %v6214_v19, %v6252_v23 }
 0x2d4   :  { %v6236_v6 = vpop.permute.xlu1 %1575  ;;  %v6259_v43 = vpop.permute.xlu0 %1563 }
 0x2d5   :  { %9358 = vst [vmem:[#allocation95_spill] sm:$0xff] %v6259_v43  ;;  %v1734_v43 = vrot.slane %v6180_v28, %v6246_v38  ;;  %v1699_v28 = vrot.slane %v6172_v27, %v6249_v37 }
 0x2d7   :  { %v1739_v56 = vsel %vm1609_vm3, %v1738_v35, %v1734_v43  ;;  %v1704_v43 = vrot.slane %v6153_v20, %v6252_v23  ;;  %v1700_v3 = vsel %vm1609_vm3, %v1699_v28, %v1695_v13  ;;  %v1680_v20 = vrot.slane %v6174_v61, %v6267_v24 }
 0x2d8   :  { %v6239_v17 = vpop.permute.xlu1 %1476  ;;  %v6301_v27 = vpop.permute.xlu0 %1524  ;;  %v1744_v54 = vsel %vm1616_vm4, %v1743_v8, %v1739_v56  ;;  %v1714_v28 = vrot.slane %v6200_v29, %v6262_v34  ;;  %v1812_v61 = vrot.slane %v6182_v58, %v6246_v38  ;;  %v1638_v56 = vsel %vm1637_vm7, %v1636_v1, %v1631_v32 }
 0x2d9   :  { %v1705_v26 = vsel %vm1616_vm4, %v1704_v43, %v1700_v3  ;;  %v1681_v47 = vsel %vm1637_vm7, %v1680_v20, %v1676_v41  ;;  %v1749_v13 = vsel %vm1623_vm5, %v1748_v55, %v1744_v54  ;;  %v1778_v58 = vsel %vm1609_vm3, %v1777_v25, %v1773_v59 }
 0x2da   :  { %v1710_v33 = vsel %vm1623_vm5, %v1709_v10, %v1705_v26  ;;  %v1816_v8 = vrot.slane %v6208_v14, %v6249_v37  ;;  %v1787_v43 = vrot.slane %v6194_v0, %v6255_v40  ;;  %v1783_v18 = vsel %vm1616_vm4, %v1782_v22, %v1778_v58 }
 0x2db   :  { %v1715_v39 = vsel %vm1630_vm6, %v1714_v28, %v1710_v33  ;;  %v1851_v3 = vrot.slane %v6198_v11, %v6246_v38  ;;  %v1645_v7 = vsel %vm1644_vm8, %v1643_v60, %v1638_v56  ;;  %v1792_v14 = vrot.slane %v6210_v49, %v6262_v34  ;;  %v9359_v56 = vld [vmem:[#allocation82_spill] sm:$0xff] }
 0x2dc   :  { %v6243_v57 = vpop.permute.xlu1 %1518  ;;  %v6343_v29 = vpop.permute.xlu0 %1566  ;;  %v1652_v42 = vsel %vm1651_vm9, %v1650_v46, %v1645_v7  ;;  %v1720_v0 = vsel %vm1637_vm7, %v1719_v2, %v1715_v39  ;;  %v1753_v41 = vrot.slane %v6216_v45, %v6262_v34  ;;  %v1817_v10 = vsel %vm1609_vm3, %v1816_v8, %v1812_v61  ;;  %v9360_v58 = vld [vmem:[#allocation95_spill] sm:$0xff] }
 0x2dd   :  { %v1725_v11 = vsel %vm1644_vm8, %v1724_v21, %v1720_v0  ;;  %v1788_v49 = vsel %vm1623_vm5, %v1787_v43, %v1783_v18  ;;  %v1856_v20 = vsel %vm1609_vm3, %v1855_v16, %v1851_v3  ;;  %v1758_v45 = vrot.slane %v6228_v51, %v6267_v24 }
 0x2de   :  { %v1890_v55 = vrot.slane %v6236_v6, %v6246_v38  ;;  %v1793_v59 = vsel %vm1630_vm6, %v1792_v14, %v1788_v49  ;;  %v1686_v28 = vsel %vm1644_vm8, %v1685_v52, %v1681_v47  ;;  %v1754_v31 = vsel %vm1630_vm6, %v1753_v41, %v1749_v13 }
 0x2df   :  { %v1894_v51 = vrot.slane %v6220_v48, %v6249_v37  ;;  %v1822_v5 = vsel %vm1616_vm4, %v1821_v4, %v1817_v10  ;;  %v1763_v6 = vrot.slane %v6224_v30, %v6280_v63  ;;  %v1831_v22 = vrot.slane %v6230_v9, %v6262_v34 }
 0x2e0   :  { %v6269_v50 = vpop.permute.xlu1 %1560  ;;  %v1549_v1 = vpop.permute.xlu0 %1548  ;;  %v1691_v19 = vsel %vm1651_vm9, %v1690_v15, %v1686_v28  ;;  %v1861_v61 = vsel %vm1616_vm4, %v1860_v12, %v1856_v20  ;;  %v1759_v32 = vsel %vm1637_vm7, %v1758_v45, %v1754_v31  ;;  %v1827_v48 = vsel %vm1623_vm5, %v1826_v36, %v1822_v5 }
 0x2e1   :  { %v1865_v25 = vrot.slane %v6269_v50, %v6255_v40  ;;  %v1729_v50 = vrot.slane %v6239_v17, %v6299_v44  ;;  %v1895_v47 = vsel %vm1609_vm3, %v1894_v51, %v1890_v55  ;;  %v1797_v30 = vrot.slane %v6243_v57, %v6267_v24 }
 0x2e2   :  { %v1899_v46 = vrot.slane %v9359_v56, %v6252_v23  ;;  %v1870_v39 = vrot.slane %v9360_v58, %v6262_v34  ;;  %v1927_v2 = vsel %vm1926_vm10, %v1691_v19, %v1652_v42  ;;  %v1832_v3 = vsel %vm1630_vm6, %v1831_v22, %v1827_v48 }
 0x2e3   :  { %v1866_v13 = vsel %vm1623_vm5, %v1865_v25, %v1861_v61  ;;  %v1798_v18 = vsel %vm1637_vm7, %v1797_v30, %v1793_v59  ;;  %v1875_v4 = vrot.slane %v6343_v29, %v6267_v24  ;;  %v1846_v15 = vrot.slane %v1549_v1, %v6299_v44 }
 0x2e4   :  { %v6292_v62 = vpop.permute.xlu1 %1500  ;;  %v1591_v60 = vpop.permute.xlu0 %1590  ;;  %v1871_v16 = vsel %vm1630_vm6, %v1870_v39, %v1866_v13  ;;  %v1900_v7 = vsel %vm1616_vm4, %v1899_v46, %v1895_v47  ;;  %v1807_v55 = vrot.slane %v6301_v27, %v6299_v44  ;;  %v9362_v47 = vld [vmem:[#allocation46_spill] sm:$0xff]  ;;  %v9363_v13 = vld [vmem:[#allocation65_spill] sm:$0xff]  ;;  %v9367_v39 = vld [vmem:[#allocation87_spill] sm:$0xff] }
 0x2e5   :  { %v1768_v9 = vrot.slane %v6292_v62, %v6299_v44  ;;  %v9361_v62 = vld [vmem:[#allocation86_spill] sm:$0xff]  ;;  %v1914_v20 = vrot.slane %v1591_v60, %v6267_v24  ;;  %v1876_v29 = vsel %vm1637_vm7, %v1875_v4, %v1871_v16  ;;  %v9373_v4 = vld [vmem:[#allocation47_spill] sm:$0xff] }
 0x2e6   :  { %v1802_v43 = vrot.slane %v9361_v62, %v6280_v63  ;;  %v9366_v46 = vld [vmem:[#allocation42_spill] sm:$0xff] }
 0x2e8   :  { %v6322_v35 = vpop.permute.xlu1 %1542  ;;  %v1803_v49 = vsel %vm1644_vm8, %v1802_v43, %v1798_v18  ;;  %v1594_v45 = vpop.permute.xlu0 %1593  ;;  %v9370_v18 = vld [vmem:[#allocation64_spill] sm:$0xff] }
 0x2e9   :  { %v1836_v17 = vrot.slane %v6322_v35, %v6267_v24  ;;  %v1730_v35 = vsel %vm1651_vm9, %v1729_v50, %v1725_v11  ;;  %v1808_v1 = vsel %vm1651_vm9, %v1807_v55, %v1803_v49  ;;  %v1919_v31 = vrot.slane %v1594_v45, %v6280_v63 }
 0x2ea   :  { %v1929_v41 = vsel %vm1928_vm11, %v1730_v35, %v1927_v2  ;;  %v9369_v2 = vld [vmem:[#allocation44_spill] sm:$0xff] }
 0x2eb   :  { %v1837_v52 = vsel %vm1637_vm7, %v1836_v17, %v1832_v3 }
 0x2ec   :  { %v6351_v53 = vpop.permute.xlu1 %1584 }
 0x2ed   :  { %v1904_v33 = vrot.slane %v6351_v53, %v6255_v40  ;;  %v1764_v53 = vsel %vm1644_vm8, %v1763_v6, %v1759_v32 }
 0x2ee   :  { %v1769_v14 = vsel %vm1651_vm9, %v1768_v9, %v1764_v53  ;;  %v9364_v9 = vld [vmem:[#allocation35_spill] sm:$0xff] }
 0x2ef   :  { %v1905_v42 = vsel %vm1623_vm5, %v1904_v33, %v1900_v7  ;;  %v1931_v59 = vsel %vm1930_vm12, %v1769_v14, %v1929_v41  ;;  %v9365_v33 = vld [vmem:[#allocation52_spill] sm:$0xff]  ;;  %v9371_v7 = vld [vmem:[#allocation45_spill] sm:$0xff] }
 0x2f0   :  { %v1546_v54 = vpop.permute.xlu1 %1545  ;;  %v1933_v6 = vsel %vm1932_vm13, %v1808_v1, %v1931_v59  ;;  %v9378_v59 = vld [vmem:[#allocation43_spill] sm:$0xff] }
 0x2f1   :  { %v1841_v57 = vrot.slane %v1546_v54, %v6280_v63 }
 0x2f3   :  { %v1842_v54 = vsel %vm1644_vm8, %v1841_v57, %v1837_v52 }
 0x2f4   :  { %v1588_v26 = vpop.permute.xlu1 %1587  ;;  %v1847_v28 = vsel %vm1651_vm9, %v1846_v15, %v1842_v54 }
 0x2f5   :  { %v1909_v21 = vrot.slane %v1588_v26, %v6262_v34  ;;  %v1935_v22 = vsel %vm1934_vm14, %v1847_v28, %v1933_v6 }
 0x2f7   :  { %v1910_v11 = vsel %vm1630_vm6, %v1909_v21, %v1905_v42  ;;  %v9368_v21 = vld [vmem:[#allocation93_spill] sm:$0xff]  ;;  %v9372_v42 = vld [vmem:[#allocation90_spill] sm:$0xff] }
 0x2f8   :  { %v1570_v8 = vpop.permute.xlu1 %1569  ;;  %v1915_v12 = vsel %vm1637_vm7, %v1914_v20, %v1910_v11  ;;  %v9375_v20 = vld [vmem:[#allocation99_spill] sm:$0xff] }
 0x2f9   :  { %v1880_v0 = vrot.slane %v1570_v8, %v6280_v63  ;;  %v1920_v26 = vsel %vm1644_vm8, %v1919_v31, %v1915_v12  ;;  %v9379_v12 = vld [vmem:[#allocation32_spill] sm:$0xff]  ;;  %v9380_v31 = vld [vmem:[#allocation107_spill] sm:$0xff] }
 0x2fb   :  { %v1881_v25 = vsel %vm1644_vm8, %v1880_v0, %v1876_v29 }
 0x2fc   :  { %v1573_v10 = vpop.permute.xlu1 %1572 }
 0x2fd   :  { %v1885_v36 = vrot.slane %v1573_v10, %v6299_v44  ;;  %v9374_v10 = vld [vmem:[#allocation67_spill] sm:$0xff] }
 0x2ff   :  { %v1886_v51 = vsel %vm1651_vm9, %v1885_v36, %v1881_v25 }
 0x300   :  { %v1597_v5 = vpop.permute.xlu1 %1596  ;;  %v1937_v50 = vsel %vm1936_vm15, %v1886_v51, %v1935_v22 }
 0x301   :  { %v1924_v27 = vrot.slane %v1597_v5, %v6299_v44 }
 0x303   :  { %v1925_v19 = vsel %vm1651_vm9, %v1924_v27, %v1920_v26  ;;  %v9383_v26 = vld [vmem:[#allocation74_spill] sm:$0xff] }
 0x304   :  { %v1939_v61 = vsel %vm1938_vm0, %v1925_v19, %v1937_v50  ;;  %v9384_v50 = vld [vmem:[#allocation33_spill] sm:$0xff] }
 0x305   :  { %v1942_v32 = vsel %vm1941_vm2, %v1939_v61, -inf }
 0x306   :  { %1943 = vmax.xlane.f32.xlu0 %v1942_v32 }
 0x393   :  { %v6467_v48 = vpop.xlane.xlu0 %1943 }
 0x394   :  { %v6471_v30 = vrot.slane %v6467_v48, %v9362_v47  ;;  %v6475_v60 = vrot.slane %v6467_v48, %v9363_v13  ;;  %v6479_v17 = vrot.slane %v6467_v48, %v9364_v9  ;;  %v6489_v8 = vrot.slane %v6467_v48, %v9368_v21 }
 0x395   :  { %v6512_v29 = vrot.slane %v6467_v48, %v9378_v59 }
 0x396   :  { %v1989_v56 = vsub.f32 %v9365_v33, %v6471_v30  ;;  %v1986_v58 = vsub.f32 %v9366_v46, %v6471_v30  ;;  %v2005_v57 = vsub.f32 %v9367_v39, %v6475_v60  ;;  %v1987_v62 = vsub.f32 %v9369_v2, %v6471_v30  ;;  %v9388_v39 = vld [vmem:[#allocation96_spill] sm:$0xff] }
 0x397   :  { %v2018_v16 = vsub.f32 %v9370_v18, %v6479_v17  ;;  %v1994_v14 = vsub.f32 %v9371_v7, %v6489_v8  ;;  %v1991_v0 = vsub.f32 %v9372_v42, %v6471_v30  ;;  %v1995_v54 = vsub.f32 %v9373_v4, %v6489_v8 }
 0x398   :  { %v2056_v43 = vmul.f32 1.442695, %v1989_v56  ;;  %v2050_v35 = vmul.f32 1.442695, %v1986_v58  ;;  %v2088_v53 = vmul.f32 1.442695, %v2005_v57  ;;  %v2006_v49 = vsub.f32 %v9374_v10, %v6475_v60 }
 0x399   :  { %v2052_v3 = vmul.f32 1.442695, %v1987_v62  ;;  %v2114_v52 = vmul.f32 1.442695, %v2018_v16  ;;  %v2066_v41 = vmul.f32 1.442695, %v1994_v14  ;;  %v1988_v45 = vsub.f32 %v9375_v20, %v6471_v30 }
 0x39a   :  { %4462 = vpow2.f32 %v2056_v43  ;;  %v2060_v11 = vmul.f32 1.442695, %v1991_v0  ;;  %v2068_v15 = vmul.f32 1.442695, %v1995_v54  ;;  %v2090_v28 = vmul.f32 1.442695, %v2006_v49 }
 0x39b   :  { %4464 = vpow2.f32 %v2050_v35  ;;  %v2020_v25 = vsub.f32 %v9379_v12, %v6479_v17  ;;  %v2054_v1 = vmul.f32 1.442695, %v1988_v45  ;;  %v1996_v51 = vsub.f32 %v9380_v31, %v6489_v8  ;;  %v9387_v56 = vld [vmem:[#allocation39_spill] sm:$0xff]  ;;  %v9389_v62 = vld [vmem:[#allocation16_spill] sm:$0xff] }
 0x39c   :  { %4466 = vpow2.f32 %v2088_v53  ;;  %v2027_v22 = vsub.f32 %v9383_v26, %v6512_v29  ;;  %v2002_v61 = vsub.f32 %v9384_v50, %v6475_v60  ;;  %v6536_v46 = vrot.slane %v6467_v48, %v9387_v56  ;;  %v9392_v16 = vld [vmem:[#allocation27_spill] sm:$0xff]  ;;  %v9405_v50 = vld [vmem:[#allocation100_spill] sm:$0xff] }
 0x39d   :  { %4468 = vpow2.f32 %v2052_v3  ;;  %v2118_v6 = vmul.f32 1.442695, %v2020_v25  ;;  %v2070_v19 = vmul.f32 1.442695, %v1996_v51  ;;  %v2000_v57 = vsub.f32 %v9388_v39, %v6489_v8  ;;  %v9393_v14 = vld [vmem:[#allocation75_spill] sm:$0xff]  ;;  %v9402_v51 = vld [vmem:[#allocation54_spill] sm:$0xff] }
 0x39e   :  { %4470 = vpow2.f32 %v2114_v52  ;;  %v2132_v58 = vmul.f32 1.442695, %v2027_v22  ;;  %v2082_v2 = vmul.f32 1.442695, %v2002_v61  ;;  %v2003_v43 = vsub.f32 %v9389_v62, %v6475_v60  ;;  %v9401_v25 = vld [vmem:[#allocation59_spill] sm:$0xff]  ;;  %v9406_v39 = vld [vmem:[#allocation98_spill] sm:$0xff] }
 0x39f   :  { %4472 = vpow2.f32 %v2066_v41  ;;  %v2078_v18 = vmul.f32 1.442695, %v2000_v57  ;;  %v2014_v3 = vsub.f32 %v9392_v16, %v6536_v46  ;;  %v1997_v52 = vsub.f32 %v9393_v14, %v6489_v8  ;;  %v9396_v41 = vld [vmem:[#allocation41_spill] sm:$0xff] }
 0x3a0   :  { %4474 = vpow2.f32 %v2060_v11  ;;  %v2084_v7 = vmul.f32 1.442695, %v2003_v43  ;;  %v6560_v4 = vrot.slane %v6467_v48, %v9396_v41  ;;  %v9397_v11 = vld [vmem:[#allocation71_spill] sm:$0xff]  ;;  %v2001_v61 = vsub.f32 %v9405_v50, %v6489_v8 }
 0x3a1   :  { %4476 = vpow2.f32 %v2068_v15  ;;  %v2106_v54 = vmul.f32 1.442695, %v2014_v3  ;;  %v2028_v10 = vsub.f32 %v9397_v11, %v6512_v29  ;;  %v2072_v49 = vmul.f32 1.442695, %v1997_v52  ;;  %v9398_v15 = vld [vmem:[#allocation48_spill] sm:$0xff]  ;;  %v9413_v11 = vld [vmem:[#allocation85_spill] sm:$0xff] }
 0x3a2   :  { %4478 = vpow2.f32 %v2090_v28  ;;  %v2004_v20 = vsub.f32 %v9398_v15, %v6475_v60  ;;  %v2011_v57 = vsub.f32 %v9406_v39, %v6536_v46  ;;  %v2080_v43 = vmul.f32 1.442695, %v2001_v61  ;;  %v9414_v15 = vld [vmem:[#allocation91_spill] sm:$0xff] }
 0x3a3   :  { %4480 = vpow2.f32 %v2054_v1  ;;  %v2134_v12 = vmul.f32 1.442695, %v2028_v10  ;;  %v2035_v1 = vsub.f32 %v9401_v25, %v6560_v4  ;;  %v6604_v10 = vrot.slane %v6467_v48, %v9413_v11  ;;  %v9415_v25 = vld [vmem:[#allocation106_spill] sm:$0xff]  ;;  %v9419_v61 = vld [vmem:[#allocation23_spill] sm:$0xff] }
 0x3a4   :  { %v6505_v36 = vpop.eup %4462  ;;  %4482 = vpow2.f32 %v2118_v6  ;;  %v2086_v31 = vmul.f32 1.442695, %v2004_v20  ;;  %v2010_v6 = vsub.f32 %v9402_v51, %v6536_v46  ;;  %v2100_v3 = vmul.f32 1.442695, %v2011_v57 }
 0x3a5   :  { %9376 = vst [vmem:[#allocation68_spill] sm:$0xff] %v6505_v36  ;;  %v6507_v55 = vpop.eup %4464  ;;  %2252 = vperm.xlu0 %4328, %v6505_v36   ;;  %4484 = vpow2.f32 %v2070_v19  ;;  %v2148_v19 = vmul.f32 1.442695, %v2035_v1  ;;  %v2029_v20 = vsub.f32 %v9414_v15, %v6512_v29  ;;  %v1998_v1 = vsub.f32 %v9415_v25, %v6489_v8 }
 0x3a6   :  { %9377 = vst [vmem:[#allocation19_spill] sm:$0xff] %v6507_v55  ;;  %2243 = vperm.xlu1 %4329, %v6507_v55   ;;  %v6519_v5 = vpop.eup %4466  ;;  %4486 = vpow2.f32 %v2132_v58  ;;  %v2098_v58 = vmul.f32 1.442695, %v2010_v6  ;;  %v9418_v6 = vld [vmem:[#allocation29_spill] sm:$0xff] }
 0x3a7   :  { %9381 = vst [vmem:[#allocation88_spill] sm:$0xff] %v6519_v5  ;;  %v6521_v27 = vpop.eup %4468  ;;  %4488 = vpow2.f32 %v2082_v2  ;;  %v2136_v48 = vmul.f32 1.442695, %v2029_v20  ;;  %v2074_v50 = vmul.f32 1.442695, %v1998_v1 }
 0x3a8   :  { %9382 = vst [vmem:[#allocation70_spill] sm:$0xff] %v6521_v27  ;;  %v6529_v32 = vpop.eup %4470  ;;  %4490 = vpow2.f32 %v2078_v18  ;;  %v9409_v18 = vld [vmem:[#allocation101_spill] sm:$0xff] }
 0x3a9   :  { %2300 = vperm.xlu0 %4328, %v6519_v5   ;;  %9385 = vst [vmem:[#allocation89_spill] sm:$0xff] %v6529_v32  ;;  %v6531_v33 = vpop.eup %4472  ;;  %4492 = vpow2.f32 %v2084_v7  ;;  %v2015_v16 = vsub.f32 %v9409_v18, %v6536_v46  ;;  %v9410_v7 = vld [vmem:[#allocation77_spill] sm:$0xff]  ;;  %v9422_v18 = vld [vmem:[#allocation102_spill] sm:$0xff] }
 0x3aa   :  { %2246 = vperm.xlu1 %4329, %v6521_v27   ;;  %9386 = vst [vmem:[#allocation21_spill] sm:$0xff] %v6531_v33  ;;  %v6543_v35 = vpop.eup %4474  ;;  %4494 = vpow2.f32 %v2106_v54  ;;  %v1990_v14 = vsub.f32 %v9410_v7, %v6471_v30  ;;  %v9423_v7 = vld [vmem:[#allocation50_spill] sm:$0xff] }
 0x3ab   :  { %9390 = vst [vmem:[#allocation37_spill] sm:$0xff] %v6543_v35  ;;  %v6545_v53 = vpop.eup %4476  ;;  %4496 = vpow2.f32 %v2072_v49  ;;  %v2108_v49 = vmul.f32 1.442695, %v2015_v16  ;;  %v2009_v16 = vsub.f32 %v9422_v18, %v6475_v60 }
 0x3ac   :  { %9391 = vst [vmem:[#allocation73_spill] sm:$0xff] %v6545_v53  ;;  %v6553_v42 = vpop.eup %4478  ;;  %4498 = vpow2.f32 %v2134_v12  ;;  %v2058_v12 = vmul.f32 1.442695, %v1990_v14  ;;  %v2019_v14 = vsub.f32 %v9423_v7, %v6479_v17 }
 0x3ad   :  { %2339 = vperm.xlu0 %4328, %v6529_v32   ;;  %9394 = vst [vmem:[#allocation94_spill] sm:$0xff] %v6553_v42  ;;  %v6555_v0 = vpop.eup %4480  ;;  %4500 = vpow2.f32 %v2086_v31  ;;  %v2096_v20 = vmul.f32 1.442695, %v2009_v16  ;;  %v9431_v16 = vld [vmem:[#allocation53_spill] sm:$0xff] }
 0x3ae   :  { %2267 = vperm.xlu1 %4329, %v6531_v33   ;;  %9395 = vst [vmem:[#allocation20_spill] sm:$0xff] %v6555_v0  ;;  %v6567_v45 = vpop.eup %4482  ;;  %4502 = vpow2.f32 %v2148_v19  ;;  %v2042_v19 = vsub.f32 %v9418_v6, %v6604_v10  ;;  %v2116_v1 = vmul.f32 1.442695, %v2019_v14 }
 0x3af   :  { %9399 = vst [vmem:[#allocation25_spill] sm:$0xff] %v6567_v45  ;;  %v6569_v28 = vpop.eup %4484  ;;  %4504 = vpow2.f32 %v2098_v58  ;;  %v2012_v58 = vsub.f32 %v9419_v61, %v6536_v46 }
 0x3b0   :  { %9400 = vst [vmem:[#allocation36_spill] sm:$0xff] %v6569_v28  ;;  %v6577_v26 = vpop.eup %4486  ;;  %4506 = vpow2.f32 %v2080_v43  ;;  %v2162_v43 = vmul.f32 1.442695, %v2042_v19 }
 0x3b1   :  { %2258 = vperm.xlu0 %4328, %v6543_v35   ;;  %9403 = vst [vmem:[#allocation15_spill] sm:$0xff] %v6577_v26  ;;  %v6579_v22 = vpop.eup %4488  ;;  %4508 = vpow2.f32 %v2100_v3  ;;  %v2102_v3 = vmul.f32 1.442695, %v2012_v58  ;;  %v9430_v58 = vld [vmem:[#allocation63_spill] sm:$0xff] }
 0x3b2   :  { %2270 = vperm.xlu1 %4329, %v6545_v53   ;;  %9404 = vst [vmem:[#allocation34_spill] sm:$0xff] %v6579_v22  ;;  %v6587_v2 = vpop.eup %4490  ;;  %4510 = vpow2.f32 %v2108_v49 }
 0x3b3   :  { %9407 = vst [vmem:[#allocation31_spill] sm:$0xff] %v6587_v2  ;;  %v6589_v62 = vpop.eup %4492  ;;  %4512 = vpow2.f32 %v2058_v12  ;;  %v9426_v12 = vld [vmem:[#allocation103_spill] sm:$0xff] }
 0x3b4   :  { %9408 = vst [vmem:[#allocation40_spill] sm:$0xff] %v6589_v62  ;;  %v6597_v52 = vpop.eup %4494  ;;  %4514 = vpow2.f32 %v2136_v48  ;;  %v2023_v25 = vsub.f32 %v9426_v12, %v6479_v17  ;;  %v9427_v48 = vld [vmem:[#allocation28_spill] sm:$0xff] }
 0x3b5   :  { %2303 = vperm.xlu0 %4328, %v6553_v42   ;;  %9411 = vst [vmem:[#allocation82_spill] sm:$0xff] %v6597_v52  ;;  %v6599_v54 = vpop.eup %4496  ;;  %4516 = vpow2.f32 %v2074_v50  ;;  %v1999_v6 = vsub.f32 %v9427_v48, %v6489_v8 }
 0x3b6   :  { %2249 = vperm.xlu1 %4329, %v6555_v0   ;;  %9412 = vst [vmem:[#allocation95_spill] sm:$0xff] %v6599_v54  ;;  %v6611_v31 = vpop.eup %4498  ;;  %4518 = vpow2.f32 %v2162_v43  ;;  %v2124_v61 = vmul.f32 1.442695, %v2023_v25  ;;  %v2037_v43 = vsub.f32 %v9430_v58, %v6560_v4 }
 0x3b7   :  { %9416 = vst [vmem:[#allocation86_spill] sm:$0xff] %v6611_v31  ;;  %v6613_v51 = vpop.eup %4500  ;;  %4520 = vpow2.f32 %v2102_v3  ;;  %v2076_v18 = vmul.f32 1.442695, %v1999_v6  ;;  %v2013_v3 = vsub.f32 %v9431_v16, %v6536_v46 }
 0x3b8   :  { %9417 = vst [vmem:[#allocation52_spill] sm:$0xff] %v6613_v51  ;;  %v6621_v39 = vpop.eup %4502  ;;  %4522 = vpow2.f32 %v2096_v20  ;;  %v2152_v14 = vmul.f32 1.442695, %v2037_v43  ;;  %v9434_v20 = vld [vmem:[#allocation104_spill] sm:$0xff] }
 0x3b9   :  { %2345 = vperm.xlu0 %4328, %v6567_v45   ;;  %9420 = vst [vmem:[#allocation42_spill] sm:$0xff] %v6621_v39  ;;  %v6623_v57 = vpop.eup %4504  ;;  %4524 = vpow2.f32 %v2116_v1  ;;  %v2017_v12 = vsub.f32 %v9434_v20, %v6536_v46  ;;  %v2104_v25 = vmul.f32 1.442695, %v2013_v3  ;;  %v9435_v1 = vld [vmem:[#allocation30_spill] sm:$0xff] }
 0x3ba   :  { %2273 = vperm.xlu1 %4329, %v6569_v28   ;;  %9421 = vst [vmem:[#allocation87_spill] sm:$0xff] %v6623_v57  ;;  %v6631_v49 = vpop.eup %4506  ;;  %4526 = vpow2.f32 %v2124_v61  ;;  %v2026_v48 = vsub.f32 %v9435_v1, %v6512_v29  ;;  %v9438_v61 = vld [vmem:[#allocation105_spill] sm:$0xff] }
 0x3bb   :  { %9424 = vst [vmem:[#allocation44_spill] sm:$0xff] %v6631_v49  ;;  %v6633_v15 = vpop.eup %4508  ;;  %4528 = vpow2.f32 %v2076_v18  ;;  %v2112_v16 = vmul.f32 1.442695, %v2017_v12  ;;  %v2031_v43 = vsub.f32 %v9438_v61, %v6512_v29  ;;  %v9439_v18 = vld [vmem:[#allocation83_spill] sm:$0xff] }
 0x3bc   :  { %9425 = vst [vmem:[#allocation64_spill] sm:$0xff] %v6633_v15  ;;  %v6641_v19 = vpop.eup %4510  ;;  %4530 = vpow2.f32 %v2152_v14  ;;  %v2130_v20 = vmul.f32 1.442695, %v2026_v48  ;;  %v1992_v3 = vsub.f32 %v9439_v18, %v6471_v30  ;;  %v9442_v14 = vld [vmem:[#allocation17_spill] sm:$0xff] }
 0x3bd   :  { %2366 = vperm.xlu0 %4328, %v6577_v26   ;;  %9428 = vst [vmem:[#allocation45_spill] sm:$0xff] %v6641_v19  ;;  %v6643_v50 = vpop.eup %4512  ;;  %4532 = vpow2.f32 %v2104_v25  ;;  %v2045_v12 = vsub.f32 %v9442_v14, %v6604_v10  ;;  %v9443_v25 = vld [vmem:[#allocation55_spill] sm:$0xff] }
 0x3be   :  { %2291 = vperm.xlu1 %4329, %v6579_v22   ;;  %9429 = vst [vmem:[#allocation90_spill] sm:$0xff] %v6643_v50  ;;  %v6651_v7 = vpop.eup %4514  ;;  %4534 = vpow2.f32 %v2112_v16  ;;  %v2062_v61 = vmul.f32 1.442695, %v1992_v3  ;;  %v2007_v48 = vsub.f32 %v9443_v25, %v6475_v60  ;;  %v9446_v16 = vld [vmem:[#allocation58_spill] sm:$0xff] }
 0x3bf   :  { %9432 = vst [vmem:[#allocation47_spill] sm:$0xff] %v6651_v7  ;;  %v6653_v8 = vpop.eup %4516  ;;  %4536 = vpow2.f32 %v2130_v20  ;;  %v9447_v20 = vld [vmem:[#allocation24_spill] sm:$0xff] }
 0x3c0   :  { %9433 = vst [vmem:[#allocation67_spill] sm:$0xff] %v6653_v8  ;;  %v6661_v6 = vpop.eup %4518  ;;  %v2092_v14 = vmul.f32 1.442695, %v2007_v48  ;;  %v2021_v3 = vsub.f32 %v9447_v20, %v6479_v17 }
 0x3c1   :  { %2285 = vperm.xlu0 %4328, %v6587_v2   ;;  %9436 = vst [vmem:[#allocation99_spill] sm:$0xff] %v6661_v6  ;;  %v6663_v58 = vpop.eup %4520  ;;  %v2140_v2 = vmul.f32 1.442695, %v2031_v43  ;;  %v2032_v43 = vsub.f32 %v9446_v16, %v6512_v29 }
 0x3c2   :  { %2294 = vperm.xlu1 %4329, %v6589_v62   ;;  %9437 = vst [vmem:[#allocation32_spill] sm:$0xff] %v6663_v58  ;;  %v2120_v16 = vmul.f32 1.442695, %v2021_v3 }
 0x3c3   :  { %4538 = vpow2.f32 %v2140_v2  ;;  %v9450_v2 = vld [vmem:[#allocation18_spill] sm:$0xff] }
 0x3c4   :  { %4540 = vpow2.f32 %v2062_v61  ;;  %v9451_v61 = vld [vmem:[#allocation56_spill] sm:$0xff] }
 0x3c5   :  { %2327 = vperm.xlu0 %4328, %v6597_v52   ;;  %v2034_v48 = vsub.f32 %v9451_v61, %v6560_v4 }
 0x3c6   :  { %2276 = vperm.xlu1 %4329, %v6599_v54  }
 0x3c9   :  { %2369 = vperm.xlu0 %4328, %v6611_v31  }
 0x3ca   :  { %2297 = vperm.xlu1 %4329, %v6613_v51  }
 0x3cd   :  { %2390 = vperm.xlu0 %4328, %v6621_v39  }
 0x3ce   :  { %2315 = vperm.xlu1 %4329, %v6623_v57  }
 0x3d1   :  { %2288 = vperm.xlu0 %4328, %v6631_v49   ;;  %v6671_v49 = vpop.eup %4522 }
 0x3d2   :  { %2318 = vperm.xlu1 %4329, %v6633_v15   ;;  %9440 = vst [vmem:[#allocation107_spill] sm:$0xff] %v6671_v49  ;;  %v6673_v1 = vpop.eup %4524 }
 0x3d3   :  { %9441 = vst [vmem:[#allocation74_spill] sm:$0xff] %v6673_v1 }
 0x3d5   :  { %2330 = vperm.xlu0 %4328, %v6641_v19  }
 0x3d6   :  { %2255 = vperm.xlu1 %4329, %v6643_v50  }
 0x3d9   :  { %2372 = vperm.xlu0 %4328, %v6651_v7   ;;  %v6681_v7 = vpop.eup %4526 }
 0x3da   :  { %2279 = vperm.xlu1 %4329, %v6653_v8   ;;  %9444 = vst [vmem:[#allocation33_spill] sm:$0xff] %v6681_v7  ;;  %v6683_v18 = vpop.eup %4528 }
 0x3db   :  { %9445 = vst [vmem:[#allocation96_spill] sm:$0xff] %v6683_v18  ;;  %v6691_v42 = vpop.eup %4530 }
 0x3dc   :  { %9448 = vst [vmem:[#allocation16_spill] sm:$0xff] %v6691_v42  ;;  %v6693_v25 = vpop.eup %4532 }
 0x3dd   :  { %2411 = vperm.xlu0 %4328, %v6661_v6   ;;  %9449 = vst [vmem:[#allocation27_spill] sm:$0xff] %v6693_v25  ;;  %v6701_v6 = vpop.eup %4534 }
 0x3de   :  { %2321 = vperm.xlu1 %4329, %v6663_v58   ;;  %9452 = vst [vmem:[#allocation75_spill] sm:$0xff] %v6701_v6  ;;  %v6703_v20 = vpop.eup %4536 }
 0x3df   :  { %9453 = vst [vmem:[#allocation71_spill] sm:$0xff] %v6703_v20 }
 0x3e1   :  { %2312 = vperm.xlu0 %4328, %v6671_v49   ;;  %v2168_v49 = vmul.f32 1.442695, %v2045_v12  ;;  %v2046_v12 = vsub.f32 %v9450_v2, %v6604_v10  ;;  %v2146_v2 = vmul.f32 1.442695, %v2034_v48 }
 0x3e2   :  { %2342 = vperm.xlu1 %4329, %v6673_v1  }
 0x3e3   :  { %4542 = vpow2.f32 %v2168_v49  ;;  %v9454_v49 = vld [vmem:[#allocation62_spill] sm:$0xff] }
 0x3e4   :  { %4544 = vpow2.f32 %v2092_v14  ;;  %v9455_v14 = vld [vmem:[#allocation26_spill] sm:$0xff] }
 0x3e5   :  { %2354 = vperm.xlu0 %4328, %v6681_v7   ;;  %v1993_v3 = vsub.f32 %v9455_v14, %v6471_v30 }
 0x3e6   :  { %2282 = vperm.xlu1 %4329, %v6683_v18   ;;  %v2142_v18 = vmul.f32 1.442695, %v2032_v43  ;;  %v2040_v43 = vsub.f32 %v9454_v49, %v6560_v4 }
 0x3e7   :  { %v2064_v49 = vmul.f32 1.442695, %v1993_v3 }
 0x3e8   :  { %4546 = vpow2.f32 %v2142_v18  ;;  %v9458_v18 = vld [vmem:[#allocation22_spill] sm:$0xff] }
 0x3e9   :  { %2396 = vperm.xlu0 %4328, %v6691_v42   ;;  %v2170_v42 = vmul.f32 1.442695, %v2046_v12  ;;  %4548 = vpow2.f32 %v2120_v16  ;;  %v2041_v12 = vsub.f32 %v9458_v18, %v6560_v4  ;;  %v9459_v16 = vld [vmem:[#allocation57_spill] sm:$0xff] }
 0x3ea   :  { %2324 = vperm.xlu1 %4329, %v6693_v25   ;;  %v6711_v25 = vpop.eup %4538  ;;  %v2008_v48 = vsub.f32 %v9459_v16, %v6475_v60 }
 0x3eb   :  { %9456 = vst [vmem:[#allocation48_spill] sm:$0xff] %v6711_v25  ;;  %v6713_v61 = vpop.eup %4540  ;;  %4550 = vpow2.f32 %v2170_v42  ;;  %v2160_v14 = vmul.f32 1.442695, %v2041_v12  ;;  %v9462_v42 = vld [vmem:[#allocation66_spill] sm:$0xff]  ;;  %v9466_v12 = vld [vmem:[#allocation69_spill] sm:$0xff] }
 0x3ec   :  { %9457 = vst [vmem:[#allocation59_spill] sm:$0xff] %v6713_v61  ;;  %4552 = vpow2.f32 %v2146_v2  ;;  %v2094_v18 = vmul.f32 1.442695, %v2008_v48  ;;  %v9463_v2 = vld [vmem:[#allocation79_spill] sm:$0xff] }
 0x3ed   :  { %2336 = vperm.xlu0 %4328, %v6701_v6   ;;  %v2158_v6 = vmul.f32 1.442695, %v2040_v43  ;;  %v6721_v50 = vpop.eup %4542  ;;  %v2049_v43 = vsub.f32 %v9462_v42, %v6604_v10  ;;  %v2022_v3 = vsub.f32 %v9463_v2, %v6479_v17  ;;  %v2036_v42 = vsub.f32 %v9466_v12, %v6560_v4  ;;  %v9472_v12 = vld [vmem:[#allocation97_spill] sm:$0xff] }
 0x3ee   :  { %2363 = vperm.xlu1 %4329, %v6703_v20   ;;  %9460 = vst [vmem:[#allocation54_spill] sm:$0xff] %v6721_v50  ;;  %v6723_v30 = vpop.eup %4544 }
 0x3ef   :  { %9461 = vst [vmem:[#allocation100_spill] sm:$0xff] %v6723_v30  ;;  %4554 = vpow2.f32 %v2158_v6  ;;  %v2176_v16 = vmul.f32 1.442695, %v2049_v43  ;;  %v2122_v6 = vmul.f32 1.442695, %v2022_v3 }
 0x3f0   :  { %4556 = vpow2.f32 %v2064_v49  ;;  %v2150_v2 = vmul.f32 1.442695, %v2036_v42 }
 0x3f1   :  { %2378 = vperm.xlu0 %4328, %v6711_v25   ;;  %4558 = vpow2.f32 %v2160_v14 }
 0x3f2   :  { %2261 = vperm.xlu1 %4329, %v6713_v61   ;;  %v6731_v25 = vpop.eup %4546  ;;  %4560 = vpow2.f32 %v2094_v18 }
 0x3f3   :  { %9464 = vst [vmem:[#allocation98_spill] sm:$0xff] %v6731_v25  ;;  %v6733_v60 = vpop.eup %4548  ;;  %4562 = vpow2.f32 %v2176_v16 }
 0x3f4   :  { %9465 = vst [vmem:[#allocation101_spill] sm:$0xff] %v6733_v60  ;;  %4564 = vpow2.f32 %v2122_v6  ;;  %v9475_v6 = vld [vmem:[#allocation72_spill] sm:$0xff] }
 0x3f5   :  { %2420 = vperm.xlu0 %4328, %v6721_v50   ;;  %v6739_v49 = vpop.eup %4550  ;;  %4566 = vpow2.f32 %v2150_v2  ;;  %v2030_v42 = vsub.f32 %v9475_v6, %v6512_v29 }
 0x3f6   :  { %2306 = vperm.xlu1 %4329, %v6723_v30   ;;  %9467 = vst [vmem:[#allocation77_spill] sm:$0xff] %v6739_v49  ;;  %v6741_v48 = vpop.eup %4552  ;;  %v2016_v30 = vsub.f32 %v9472_v12, %v6536_v46 }
 0x3f7   :  { %9468 = vst [vmem:[#allocation91_spill] sm:$0xff] %v6741_v48  ;;  %v2138_v46 = vmul.f32 1.442695, %v2030_v42 }
 0x3f9   :  { %2381 = vperm.xlu0 %4328, %v6731_v25   ;;  %v9469_v25 = vld [vmem:[#allocation80_spill] sm:$0xff]  ;;  %v6747_v43 = vpop.eup %4554 }
 0x3fa   :  { %2348 = vperm.xlu1 %4329, %v6733_v60   ;;  %v2043_v14 = vsub.f32 %v9469_v25, %v6604_v10  ;;  %9470 = vst [vmem:[#allocation106_spill] sm:$0xff] %v6747_v43  ;;  %v6749_v18 = vpop.eup %4556  ;;  %v2110_v25 = vmul.f32 1.442695, %v2016_v30 }
 0x3fb   :  { %9471 = vst [vmem:[#allocation29_spill] sm:$0xff] %v6749_v18 }
 0x3fc   :  { %v2164_v3 = vmul.f32 1.442695, %v2043_v14  ;;  %v9478_v14 = vld [vmem:[#allocation76_spill] sm:$0xff] }
 0x3fd   :  { %2423 = vperm.xlu0 %4328, %v6739_v49   ;;  %v6755_v49 = vpop.eup %4558  ;;  %v2044_v12 = vsub.f32 %v9478_v14, %v6604_v10 }
 0x3fe   :  { %2387 = vperm.xlu1 %4329, %v6741_v48   ;;  %9473 = vst [vmem:[#allocation23_spill] sm:$0xff] %v6755_v49  ;;  %v6757_v16 = vpop.eup %4560  ;;  %4568 = vpow2.f32 %v2164_v3  ;;  %v9480_v3 = vld [vmem:[#allocation38_spill] sm:$0xff] }
 0x3ff   :  { %9474 = vst [vmem:[#allocation102_spill] sm:$0xff] %v6757_v16  ;;  %4570 = vpow2.f32 %v2110_v25  ;;  %v2166_v30 = vmul.f32 1.442695, %v2044_v12  ;;  %v2024_v6 = vsub.f32 %v9480_v3, %v6479_v17  ;;  %v9482_v25 = vld [vmem:[#allocation61_spill] sm:$0xff] }
 0x400   :  { %4572 = vpow2.f32 %v2138_v46  ;;  %v2038_v42 = vsub.f32 %v9482_v25, %v6560_v4  ;;  %v9484_v46 = vld [vmem:[#allocation92_spill] sm:$0xff] }
 0x401   :  { %2405 = vperm.xlu0 %4328, %v6747_v43   ;;  %v6763_v43 = vpop.eup %4562  ;;  %4574 = vpow2.f32 %v2166_v30  ;;  %v2025_v12 = vsub.f32 %v9484_v46, %v6479_v17  ;;  %v9486_v30 = vld [vmem:[#allocation78_spill] sm:$0xff] }
 0x402   :  { %2264 = vperm.xlu1 %4329, %v6749_v18   ;;  %9476 = vst [vmem:[#allocation50_spill] sm:$0xff] %v6763_v43  ;;  %v6765_v2 = vpop.eup %4564  ;;  %v2154_v14 = vmul.f32 1.442695, %v2038_v42 }
 0x403   :  { %9477 = vst [vmem:[#allocation103_spill] sm:$0xff] %v6765_v2  ;;  %v2128_v3 = vmul.f32 1.442695, %v2025_v12 }
 0x405   :  { %2408 = vperm.xlu0 %4328, %v6755_v49   ;;  %v6771_v49 = vpop.eup %4566 }
 0x406   :  { %2309 = vperm.xlu1 %4329, %v6757_v16   ;;  %9479 = vst [vmem:[#allocation28_spill] sm:$0xff] %v6771_v49 }
 0x408   :  { %v6776_v16 = vpop.eup %4568 }
 0x409   :  { %2432 = vperm.xlu0 %4328, %v6763_v43   ;;  %9481 = vst [vmem:[#allocation63_spill] sm:$0xff] %v6776_v16  ;;  %v2126_v43 = vmul.f32 1.442695, %v2024_v6  ;;  %v6781_v18 = vpop.eup %4570  ;;  %v2039_v6 = vsub.f32 %v9486_v30, %v6560_v4 }
 0x40a   :  { %2351 = vperm.xlu1 %4329, %v6765_v2   ;;  %9483 = vst [vmem:[#allocation53_spill] sm:$0xff] %v6781_v18 }
 0x40b   :  { %4576 = vpow2.f32 %v2126_v43  ;;  %v2156_v25 = vmul.f32 1.442695, %v2039_v6  ;;  %v9488_v43 = vld [vmem:[#allocation60_spill] sm:$0xff] }
 0x40c   :  { %4578 = vpow2.f32 %v2154_v14  ;;  %v2033_v42 = vsub.f32 %v9488_v43, %v6512_v29  ;;  %v9490_v14 = vld [vmem:[#allocation81_spill] sm:$0xff]  ;;  %v9492_v29 = vld [vmem:[#allocation84_spill] sm:$0xff] }
 0x40d   :  { %4580 = vpow2.f32 %v2128_v3  ;;  %v2047_v46 = vsub.f32 %v9490_v14, %v6604_v10  ;;  %v2048_v6 = vsub.f32 %v9492_v29, %v6604_v10 }
 0x40e   :  { %2393 = vperm.xlu1 %4329, %v6771_v49   ;;  %v6786_v49 = vpop.eup %4572  ;;  %4582 = vpow2.f32 %v2156_v25  ;;  %v2144_v17 = vmul.f32 1.442695, %v2033_v42 }
 0x40f   :  { %9485 = vst [vmem:[#allocation104_spill] sm:$0xff] %v6786_v49  ;;  %v6791_v48 = vpop.eup %4574  ;;  %v2172_v3 = vmul.f32 1.442695, %v2047_v46  ;;  %v2174_v14 = vmul.f32 1.442695, %v2048_v6 }
 0x410   :  { %9487 = vst [vmem:[#allocation30_spill] sm:$0xff] %v6791_v48  ;;  %4584 = vpow2.f32 %v2144_v17 }
 0x411   :  { %4586 = vpow2.f32 %v2172_v3 }
 0x412   :  { %2414 = vperm.xlu1 %4329, %v6776_v16   ;;  %4588 = vpow2.f32 %v2174_v14 }
 0x416   :  { %2333 = vperm.xlu1 %4329, %v6781_v18   ;;  %v6796_v18 = vpop.eup %4576 }
 0x417   :  { %9489 = vst [vmem:[#allocation105_spill] sm:$0xff] %v6796_v18  ;;  %v6803_v4 = vpop.eup %4578 }
 0x418   :  { %9491 = vst [vmem:[#allocation83_spill] sm:$0xff] %v6803_v4  ;;  %v6812_v25 = vpop.eup %4580 }
 0x419   :  { %9493 = vst [vmem:[#allocation17_spill] sm:$0xff] %v6812_v25 }
 0x41a   :  { %2375 = vperm.xlu1 %4329, %v6786_v49   ;;  %v6817_v49 = vpop.eup %4582 }
 0x41b   :  { %9494 = vst [vmem:[#allocation55_spill] sm:$0xff] %v6817_v49  ;;  %v6824_v10 = vpop.eup %4584 }
 0x41c   :  { %9495 = vst [vmem:[#allocation58_spill] sm:$0xff] %v6824_v10  ;;  %v6831_v29 = vpop.eup %4586 }
 0x41d   :  { %9496 = vst [vmem:[#allocation24_spill] sm:$0xff] %v6831_v29  ;;  %v6836_v6 = vpop.eup %4588 }
 0x41e   :  { %2417 = vperm.xlu1 %4329, %v6791_v48   ;;  %9497 = vst [vmem:[#allocation18_spill] sm:$0xff] %v6836_v6 }
 0x422   :  { %2357 = vperm.xlu1 %4329, %v6796_v18  }
 0x424   :  { %v6801_v12 = vpop.permute.xlu0 %2252 }
 0x425   :  { %v6805_v30 = vpop.permute.xlu1 %2243 }
 0x426   :  { %2399 = vperm.xlu1 %4329, %v6803_v4   ;;  %v2437_v15 = vrot.slane %v6805_v30, %v6246_v38 }
 0x428   :  { %v6810_v43 = vpop.permute.xlu0 %2300 }
 0x429   :  { %v6814_v42 = vpop.permute.xlu1 %2246 }
 0x42a   :  { %2360 = vperm.xlu1 %4329, %v6812_v25   ;;  %v2441_v59 = vrot.slane %v6814_v42, %v6249_v37  ;;  %v2529_v42 = vrot.slane %v6810_v43, %v6255_v40 }
 0x42c   :  { %v6821_v4 = vpop.permute.xlu0 %2339 }
 0x42d   :  { %v6819_v18 = vpop.permute.xlu1 %2267  ;;  %v2593_v30 = vrot.slane %v6821_v4, %v6246_v38 }
 0x42e   :  { %2402 = vperm.xlu1 %4329, %v6817_v49  }
 0x430   :  { %v6829_v46 = vpop.permute.xlu0 %2258 }
 0x431   :  { %v6826_v17 = vpop.permute.xlu1 %2270 }
 0x432   :  { %2384 = vperm.xlu1 %4329, %v6824_v10   ;;  %v2480_v27 = vrot.slane %v6826_v17, %v6249_v37  ;;  %v2476_v17 = vrot.slane %v6819_v18, %v6246_v38 }
 0x434   :  { %v6840_v49 = vpop.permute.xlu0 %2303 }
 0x435   :  { %v6833_v3 = vpop.permute.xlu1 %2249  ;;  %v2534_v43 = vrot.slane %v6840_v49, %v6262_v34 }
 0x436   :  { %2426 = vperm.xlu1 %4329, %v6831_v29   ;;  %v2446_v58 = vrot.slane %v6833_v3, %v6252_v23 }
 0x438   :  { %v6843_v7 = vpop.permute.xlu0 %2345 }
 0x439   :  { %v6838_v25 = vpop.permute.xlu1 %2273 }
 0x43a   :  { %2429 = vperm.xlu1 %4329, %v6836_v6  }
 0x43c   :  { %v6847_v50 = vpop.permute.xlu0 %2366 }
 0x43d   :  { %v2292_v14 = vpop.permute.xlu1 %2291 }
 0x440   :  { %v6849_v19 = vpop.permute.xlu0 %2285 }
 0x441   :  { %v2295_v10 = vpop.permute.xlu1 %2294 }
 0x442   :  { %v2519_v47 = vrot.slane %v2295_v10, %v6249_v37  ;;  %v2461_v10 = vrot.slane %v6829_v46, %v6267_v24 }
 0x444   :  { %v6855_v61 = vpop.permute.xlu0 %2327 }
 0x445   :  { %v6845_v5 = vpop.permute.xlu1 %2276 }
 0x446   :  { %v2490_v4 = vrot.slane %v6845_v5, %v6255_v40 }
 0x448   :  { %v6859_v6 = vpop.permute.xlu0 %2369 }
 0x449   :  { %v2298_v20 = vpop.permute.xlu1 %2297 }
 0x44a   :  { %v2524_v3 = vrot.slane %v2298_v20, %v6252_v23  ;;  %v2485_v20 = vrot.slane %v6838_v25, %v6252_v23 }
 0x44c   :  { %v6865_v48 = vpop.permute.xlu0 %2390 }
 0x44d   :  { %v6851_v29 = vpop.permute.xlu1 %2315 }
 0x450   :  { %v6869_v52 = vpop.permute.xlu0 %2288 }
 0x451   :  { %v6853_v54 = vpop.permute.xlu1 %2318 }
 0x454   :  { %v6875_v57 = vpop.permute.xlu0 %2330 }
 0x455   :  { %v6857_v36 = vpop.permute.xlu1 %2255 }
 0x458   :  { %v6879_v28 = vpop.permute.xlu0 %2372 }
 0x459   :  { %v6861_v2 = vpop.permute.xlu1 %2279 }
 0x45c   :  { %v6885_v0 = vpop.permute.xlu0 %2411 }
 0x45d   :  { %v6863_v1 = vpop.permute.xlu1 %2321 }
 0x45e   :  { %v2563_v25 = vrot.slane %v6863_v1, %v6252_v23  ;;  %v2505_v1 = vrot.slane %v6849_v19, %v6280_v63 }
 0x460   :  { %v6889_v62 = vpop.permute.xlu0 %2312 }
 0x461   :  { %v6867_v32 = vpop.permute.xlu1 %2342 }
 0x464   :  { %v6895_v39 = vpop.permute.xlu0 %2354 }
 0x465   :  { %v6871_v51 = vpop.permute.xlu1 %2282 }
 0x466   :  { %v2500_v5 = vrot.slane %v6871_v51, %v6267_v24 }
 0x468   :  { %v6899_v41 = vpop.permute.xlu0 %2396 }
 0x469   :  { %v6873_v35 = vpop.permute.xlu1 %2324  ;;  %9498 = vst [vmem:[#allocation56_spill] sm:$0xff] %v6899_v41  ;;  %v2451_v41 = vrot.slane %v6801_v12, %v6255_v40  ;;  %v2481_v12 = vsel %vm1609_vm3, %v2480_v27, %v2476_v17  ;;  %v2558_v27 = vrot.slane %v6853_v54, %v6249_v37  ;;  %v2641_v17 = vrot.slane %v6859_v6, %v6252_v23 }
 0x46a   :  { %v2568_v54 = vrot.slane %v6873_v35, %v6255_v40  ;;  %v2646_v6 = vrot.slane %v6879_v28, %v6255_v40 }
 0x46c   :  { %v6905_v9 = vpop.permute.xlu0 %2336 }
 0x46d   :  { %v6877_v60 = vpop.permute.xlu1 %2363 }
 0x46e   :  { %v2632_v46 = vrot.slane %v6877_v60, %v6246_v38 }
 0x470   :  { %v6909_v26 = vpop.permute.xlu0 %2378 }
 0x471   :  { %v6881_v16 = vpop.permute.xlu1 %2261  ;;  %9500 = vst [vmem:[#allocation26_spill] sm:$0xff] %v6909_v26 }
 0x474   :  { %v6924_v56 = vpop.permute.xlu0 %2420 }
 0x475   :  { %v6883_v11 = vpop.permute.xlu1 %2306  ;;  %9501 = vst [vmem:[#allocation22_spill] sm:$0xff] %v6924_v56  ;;  %v2515_v56 = vrot.slane %v2292_v14, %v6246_v38 }
 0x479   :  { %v6887_v31 = vpop.permute.xlu1 %2348 }
 0x47d   :  { %v6891_v8 = vpop.permute.xlu1 %2387 }
 0x481   :  { %v6893_v22 = vpop.permute.xlu1 %2264 }
 0x485   :  { %v6897_v13 = vpop.permute.xlu1 %2309 }
 0x489   :  { %v6901_v53 = vpop.permute.xlu1 %2351 }
 0x48d   :  { %v6903_v45 = vpop.permute.xlu1 %2393 }
 0x491   :  { %v6907_v33 = vpop.permute.xlu1 %2414 }
 0x492   :  { %9499 = vst [vmem:[#allocation62_spill] sm:$0xff] %v6907_v33  ;;  %v2442_v33 = vsel %vm1609_vm3, %v2441_v59, %v2437_v15  ;;  %v2602_v59 = vrot.slane %v6843_v7, %v6252_v23  ;;  %v2520_v15 = vsel %vm1609_vm3, %v2519_v47, %v2515_v56  ;;  %v2554_v47 = vrot.slane %v6851_v29, %v6246_v38  ;;  %v6968_v7 = vpop.permute.xlu0 %2381 }
 0x493   :  { %v2447_v26 = vsel %vm1616_vm4, %v2446_v58, %v2442_v33  ;;  %v2525_v49 = vsel %vm1616_vm4, %v2524_v3, %v2520_v15  ;;  %v2456_v33 = vrot.slane %v6857_v36, %v6262_v34  ;;  %v2495_v58 = vrot.slane %v6861_v2, %v6262_v34 }
 0x494   :  { %v2452_v56 = vsel %vm1623_vm5, %v2451_v41, %v2447_v26  ;;  %v2486_v36 = vsel %vm1616_vm4, %v2485_v20, %v2481_v12  ;;  %v2636_v2 = vrot.slane %v6847_v50, %v6249_v37  ;;  %v2530_v51 = vsel %vm1623_vm5, %v2529_v42, %v2525_v49 }
 0x495   :  { %v6911_v21 = vpop.permute.xlu1 %2333  ;;  %v2491_v26 = vsel %vm1623_vm5, %v2490_v4, %v2486_v36  ;;  %v2559_v35 = vsel %vm1609_vm3, %v2558_v27, %v2554_v47  ;;  %v2597_v29 = vrot.slane %v6867_v32, %v6249_v37  ;;  %v2573_v50 = vrot.slane %v6855_v61, %v6262_v34 }
 0x496   :  { %v2457_v14 = vsel %vm1630_vm6, %v2456_v33, %v2452_v56  ;;  %v2496_v19 = vsel %vm1630_vm6, %v2495_v58, %v2491_v26  ;;  %v2564_v60 = vsel %vm1616_vm4, %v2563_v25, %v2559_v35  ;;  %v2675_v42 = vrot.slane %v6865_v48, %v6249_v37  ;;  %v9502_v35 = vld [vmem:[#allocation26_spill] sm:$0xff] }
 0x497   :  { %v2501_v3 = vsel %vm1637_vm7, %v2500_v5, %v2496_v19  ;;  %v2569_v12 = vsel %vm1623_vm5, %v2568_v54, %v2564_v60  ;;  %v2510_v32 = vrot.slane %v6869_v52, %v6299_v44  ;;  %v2578_v61 = vrot.slane %v6875_v57, %v6267_v24  ;;  %v7009_v52 = vpop.permute.xlu0 %2423 }
 0x498   :  { %v2637_v20 = vsel %vm1609_vm3, %v2636_v2, %v2632_v46  ;;  %v2535_v15 = vsel %vm1630_vm6, %v2534_v43, %v2530_v51  ;;  %v2710_v48 = vrot.slane %v6885_v0, %v6246_v38  ;;  %v2598_v27 = vsel %vm1609_vm3, %v2597_v29, %v2593_v30 }
 0x499   :  { %v6919_v55 = vpop.permute.xlu1 %2375  ;;  %v2462_v49 = vsel %vm1637_vm7, %v2461_v10, %v2457_v14  ;;  %v2506_v57 = vsel %vm1644_vm8, %v2505_v1, %v2501_v3  ;;  %v2574_v33 = vsel %vm1630_vm6, %v2573_v50, %v2569_v12  ;;  %v2539_v43 = vrot.slane %v6883_v11, %v6267_v24  ;;  %v9503_v19 = vld [vmem:[#allocation62_spill] sm:$0xff] }
 0x49a   :  { %v2607_v58 = vrot.slane %v6887_v31, %v6255_v40  ;;  %v2642_v28 = vsel %vm1616_vm4, %v2641_v17, %v2637_v20  ;;  %v2466_v0 = vrot.slane %v6881_v16, %v6280_v63  ;;  %v2544_v30 = vrot.slane %v6897_v13, %v6280_v63 }
 0x49b   :  { %v2612_v10 = vrot.slane %v6901_v53, %v6262_v34  ;;  %v2549_v25 = vrot.slane %v6889_v62, %v6299_v44  ;;  %v2617_v11 = vrot.slane %v6895_v39, %v6267_v24  ;;  %v2583_v31 = vrot.slane %v6911_v21, %v6280_v63  ;;  %v2406_v36 = vpop.permute.xlu0 %2405 }
 0x49c   :  { %v2651_v47 = vrot.slane %v6919_v55, %v6262_v34  ;;  %v2603_v16 = vsel %vm1616_vm4, %v2602_v59, %v2598_v27  ;;  %v2511_v13 = vsel %vm1651_vm9, %v2510_v32, %v2506_v57  ;;  %v2471_v53 = vrot.slane %v6893_v22, %v6299_v44 }
 0x49d   :  { %v6945_v18 = vpop.permute.xlu1 %2417  ;;  %v2579_v5 = vsel %vm1637_vm7, %v2578_v61, %v2574_v33  ;;  %v2540_v62 = vsel %vm1637_vm7, %v2539_v43, %v2535_v15  ;;  %v2608_v39 = vsel %vm1623_vm5, %v2607_v58, %v2603_v16  ;;  %v2671_v21 = vrot.slane %v6891_v8, %v6246_v38  ;;  %v9504_v15 = vld [vmem:[#allocation56_spill] sm:$0xff] }
 0x49e   :  { %v2647_v54 = vsel %vm1623_vm5, %v2646_v6, %v2642_v28  ;;  %v2467_v55 = vsel %vm1644_vm8, %v2466_v0, %v2462_v49  ;;  %v2545_v59 = vsel %vm1644_vm8, %v2544_v30, %v2540_v62  ;;  %v2613_v2 = vsel %vm1630_vm6, %v2612_v10, %v2608_v39  ;;  %v9505_v30 = vld [vmem:[#allocation22_spill] sm:$0xff] }
 0x49f   :  { %v2680_v1 = vrot.slane %v6903_v45, %v6252_v23  ;;  %v2584_v46 = vsel %vm1644_vm8, %v2583_v31, %v2579_v5  ;;  %v2652_v26 = vsel %vm1630_vm6, %v2651_v47, %v2647_v54  ;;  %v2588_v51 = vrot.slane %v6905_v9, %v6299_v44  ;;  %v2409_v27 = vpop.permute.xlu0 %2408 }
 0x4a0   :  { %v2656_v29 = vrot.slane %v9502_v35, %v6267_v24  ;;  %v2661_v50 = vrot.slane %v6968_v7, %v6280_v63  ;;  %v2676_v45 = vsel %vm1609_vm3, %v2675_v42, %v2671_v21  ;;  %v2550_v14 = vsel %vm1651_vm9, %v2549_v25, %v2545_v59 }
 0x4a1   :  { %v6977_v41 = vpop.permute.xlu1 %2357  ;;  %v2714_v60 = vrot.slane %v9503_v19, %v6249_v37  ;;  %v2618_v17 = vsel %vm1637_vm7, %v2617_v11, %v2613_v2  ;;  %v2589_v3 = vsel %vm1651_vm9, %v2588_v51, %v2584_v46  ;;  %v2719_v12 = vrot.slane %v6945_v18, %v6252_v23  ;;  %v9507_v46 = vld [vmem:[#allocation46_spill] sm:$0xff]  ;;  %v9509_v51 = vld [vmem:[#allocation19_spill] sm:$0xff] }
 0x4a2   :  { %v2622_v22 = vrot.slane %v6977_v41, %v6280_v63  ;;  %v2472_v41 = vsel %vm1651_vm9, %v2471_v53, %v2467_v55  ;;  %v2657_v9 = vsel %vm1637_vm7, %v2656_v29, %v2652_v26  ;;  %v2681_v42 = vsel %vm1616_vm4, %v2680_v1, %v2676_v45  ;;  %v9506_v1 = vld [vmem:[#allocation39_spill] sm:$0xff]  ;;  %v9510_v29 = vld [vmem:[#allocation32_spill] sm:$0xff] }
 0x4a3   :  { %v2746_v32 = vsel %vm1926_vm10, %v2511_v13, %v2472_v41  ;;  %v2685_v6 = vrot.slane %v9504_v15, %v6255_v40  ;;  %v2715_v57 = vsel %vm1609_vm3, %v2714_v60, %v2710_v48  ;;  %v2662_v43 = vsel %vm1644_vm8, %v2661_v50, %v2657_v9  ;;  %v2433_v53 = vpop.permute.xlu0 %2432  ;;  %v9511_v41 = vld [vmem:[#allocation70_spill] sm:$0xff]  ;;  %v9513_v60 = vld [vmem:[#allocation93_spill] sm:$0xff] }
 0x4a4   :  { %v2623_v7 = vsel %vm1644_vm8, %v2622_v22, %v2618_v17  ;;  %v2747_v49 = vsel %vm1928_vm11, %v2550_v14, %v2746_v32  ;;  %v2724_v10 = vrot.slane %v9505_v30, %v6255_v40  ;;  %v2700_v47 = vrot.slane %v2406_v36, %v6280_v63  ;;  %v9512_v14 = vld [vmem:[#allocation43_spill] sm:$0xff]  ;;  %v9525_v30 = vld [vmem:[#allocation86_spill] sm:$0xff] }
 0x4a5   :  { %v7001_v4 = vpop.permute.xlu1 %2399  ;;  %v2748_v33 = vsel %vm1930_vm12, %v2589_v3, %v2747_v49  ;;  %v2686_v58 = vsel %vm1623_vm5, %v2685_v6, %v2681_v42  ;;  %v2729_v13 = vrot.slane %v7009_v52, %v6262_v34  ;;  %v2705_v62 = vrot.slane %v2409_v27, %v6299_v44  ;;  %v9514_v3 = vld [vmem:[#allocation15_spill] sm:$0xff]  ;;  %v9519_v6 = vld [vmem:[#allocation41_spill] sm:$0xff] }
 0x4a6   :  { %v2690_v61 = vrot.slane %v7001_v4, %v6262_v34  ;;  %v2720_v4 = vsel %vm1616_vm4, %v2719_v12, %v2715_v57  ;;  %v2744_v54 = vrot.slane %v2433_v53, %v6299_v44  ;;  %v9515_v12 = vld [vmem:[#allocation21_spill] sm:$0xff]  ;;  %v9516_v32 = vld [vmem:[#allocation35_spill] sm:$0xff] }
 0x4a7   :  { %v9520_v49 = vld [vmem:[#allocation65_spill] sm:$0xff] }
 0x4a8   :  { %v2691_v25 = vsel %vm1630_vm6, %v2690_v61, %v2686_v58  ;;  %v9517_v61 = vld [vmem:[#allocation25_spill] sm:$0xff] }
 0x4a9   :  { %v2361_v56 = vpop.permute.xlu1 %2360  ;;  %v9530_v53 = vld [vmem:[#allocation101_spill] sm:$0xff] }
 0x4aa   :  { %v2627_v38 = vrot.slane %v2361_v56, %v6299_v44  ;;  %v2725_v56 = vsel %vm1623_vm5, %v2724_v10, %v2720_v4  ;;  %v9523_v4 = vld [vmem:[#allocation67_spill] sm:$0xff] }
 0x4ab   :  { %v2730_v39 = vsel %vm1630_vm6, %v2729_v13, %v2725_v56 }
 0x4ac   :  { %v2628_v37 = vsel %vm1651_vm9, %v2627_v38, %v2623_v7  ;;  %v9508_v38 = vld [vmem:[#allocation64_spill] sm:$0xff] }
 0x4ad   :  { %v2403_v8 = vpop.permute.xlu1 %2402  ;;  %v2749_v28 = vsel %vm1932_vm13, %v2628_v37, %v2748_v33  ;;  %v9522_v33 = vld [vmem:[#allocation34_spill] sm:$0xff] }
 0x4ae   :  { %v2695_v23 = vrot.slane %v2403_v8, %v6267_v24 }
 0x4b0   :  { %v2696_v31 = vsel %vm1637_vm7, %v2695_v23, %v2691_v25  ;;  %v9526_v25 = vld [vmem:[#allocation20_spill] sm:$0xff] }
 0x4b1   :  { %v2385_v20 = vpop.permute.xlu1 %2384  ;;  %v2701_v5 = vsel %vm1644_vm8, %v2700_v47, %v2696_v31  ;;  %v9528_v47 = vld [vmem:[#allocation63_spill] sm:$0xff] }
 0x4b2   :  { %v2666_v18 = vrot.slane %v2385_v20, %v6299_v44  ;;  %v9518_v20 = vld [vmem:[#allocation73_spill] sm:$0xff] }
 0x4b4   :  { %v2667_v0 = vsel %vm1651_vm9, %v2666_v18, %v2662_v43  ;;  %v9521_v18 = vld [vmem:[#allocation42_spill] sm:$0xff] }
 0x4b5   :  { %v2427_v11 = vpop.permute.xlu1 %2426  ;;  %v2750_v48 = vsel %vm1934_vm14, %v2667_v0, %v2749_v28  ;;  %v9524_v28 = vld [vmem:[#allocation40_spill] sm:$0xff] }
 0x4b6   :  { %v2734_v16 = vrot.slane %v2427_v11, %v6267_v24  ;;  %v2706_v24 = vsel %vm1651_vm9, %v2705_v62, %v2701_v5 }
 0x4b7   :  { %v2751_v52 = vsel %vm1936_vm15, %v2706_v24, %v2750_v48  ;;  %v9527_v48 = vld [vmem:[#allocation85_spill] sm:$0xff] }
 0x4b8   :  { %v2735_v55 = vsel %vm1637_vm7, %v2734_v16, %v2730_v39  ;;  %v9529_v16 = vld [vmem:[#allocation36_spill] sm:$0xff]  ;;  %v9532_v39 = vld [vmem:[#allocation37_spill] sm:$0xff] }
 0x4b9   :  { %v2430_v40 = vpop.permute.xlu1 %2429 }
 0x4ba   :  { %v2739_v21 = vrot.slane %v2430_v40, %v6280_v63  ;;  %v9531_v40 = vld [vmem:[#allocation87_spill] sm:$0xff] }
 0x4bc   :  { %v2740_v36 = vsel %vm1644_vm8, %v2739_v21, %v2735_v55 }
 0x4bd   :  { %v2745_v34 = vsel %vm1651_vm9, %v2744_v54, %v2740_v36  ;;  %v9533_v54 = vld [vmem:[#allocation52_spill] sm:$0xff]  ;;  %v9534_v36 = vld [vmem:[#allocation82_spill] sm:$0xff] }
 0x4be   :  { %v2752_v59 = vsel %vm1938_vm0, %v2745_v34, %v2751_v52  ;;  %v9535_v34 = vld [vmem:[#allocation89_spill] sm:$0xff] }
 0x4bf   :  { %v2754_v2 = vsel %vm1941_vm2, %v2752_v59, 0.0  ;;  %v9536_v59 = vld [vmem:[#allocation30_spill] sm:$0xff] }
 0x4c0   :  { %2755 = vadd.xlane.f32.xlu1 %v2754_v2 }
 0x54d   :  { %v2756_v22 = vpop.xlane.xlu1 %2755 }
 0x54e   :  { %4590 = vrcp.f32 %v2756_v22  ;;  %v9537_v22 = vld [vmem:[#allocation74_spill] sm:$0xff] }
 0x558   :  { %v4591_v63 = vpop.eup %4590 }
 0x559   :  { %v7109_v44 = vrot.slane %v4591_v63, %v9506_v1  ;;  %v7112_v26 = vrot.slane %v4591_v63, %v9507_v46  ;;  %v7123_v19 = vrot.slane %v4591_v63, %v9512_v14  ;;  %v7126_v17 = vrot.slane %v4591_v63, %v9513_v60  ;;  %v9538_v1 = vld [vmem:[#allocation103_spill] sm:$0xff] }
 0x55a   :  { %v7133_v42 = vrot.slane %v4591_v63, %v9516_v32  ;;  %v7140_v27 = vrot.slane %v4591_v63, %v9519_v6  ;;  %v7143_v23 = vrot.slane %v4591_v63, %v9520_v49  ;;  %v7158_v31 = vrot.slane %v4591_v63, %v9527_v48  ;;  %v9545_v32 = vld [vmem:[#allocation88_spill] sm:$0xff]  ;;  %v9548_v49 = vld [vmem:[#allocation29_spill] sm:$0xff]  ;;  %v9555_v48 = vld [vmem:[#allocation94_spill] sm:$0xff] }
 0x55b   :  { %v2824_v8 = vmul.f32 %v9508_v38, %v7109_v44  ;;  %v2799_v35 = vmul.f32 %v9509_v51, %v7112_v26  ;;  %v2825_v50 = vmul.f32 %v9510_v29, %v7109_v44  ;;  %v2800_v45 = vmul.f32 %v9511_v41, %v7112_v26 }
 0x55c   :  { %v2840_v9 = vmul.f32 %v9514_v3, %v7123_v19  ;;  %v2807_v7 = vmul.f32 %v9515_v12, %v7126_v17  ;;  %v2833_v37 = vmul.f32 %v9517_v61, %v7133_v42  ;;  %v2808_v15 = vmul.f32 %v9518_v20, %v7126_v17  ;;  %v9543_v3 = vld [vmem:[#allocation71_spill] sm:$0xff]  ;;  %v9544_v12 = vld [vmem:[#allocation54_spill] sm:$0xff] }
 0x55d   :  { %2990 = vperm.xlu1 %4329, %v2824_v8   ;;  %2865 = vperm.xlu0 %4328, %v2799_v35   ;;  %v2848_v57 = vmul.f32 %v9521_v18, %v7140_v27  ;;  %v2815_v43 = vmul.f32 %v9522_v33, %v7143_v23  ;;  %v2811_v58 = vmul.f32 %v9523_v4, %v7126_v17  ;;  %v9539_v8 = vld [vmem:[#allocation68_spill] sm:$0xff]  ;;  %v9540_v35 = vld [vmem:[#allocation59_spill] sm:$0xff] }
 0x55e   :  { %v2816_v0 = vmul.f32 %v9524_v28, %v7143_v23  ;;  %v2841_v10 = vmul.f32 %v9525_v30, %v7123_v19  ;;  %v2801_v11 = vmul.f32 %v9526_v25, %v7112_v26  ;;  %v2856_v56 = vmul.f32 %v9528_v47, %v7158_v31 }
 0x55f   :  { %v2809_v13 = vmul.f32 %v9529_v16, %v7126_v17  ;;  %v2834_v5 = vmul.f32 %v9530_v53, %v7133_v42  ;;  %v2823_v62 = vmul.f32 %v9531_v40, %v7109_v44  ;;  %v2804_v21 = vmul.f32 %v9532_v39, %v7112_v26 }
 0x560   :  { %v2817_v55 = vmul.f32 %v9533_v54, %v7143_v23  ;;  %v2827_v24 = vmul.f32 %v9534_v36, %v7109_v44  ;;  %v2831_v52 = vmul.f32 %v9535_v34, %v7133_v42  ;;  %v2857_v2 = vmul.f32 %v9536_v59, %v7158_v31  ;;  %v9563_v34 = vld [vmem:[#allocation100_spill] sm:$0xff]  ;;  %v9564_v59 = vld [vmem:[#allocation50_spill] sm:$0xff] }
 0x561   :  { %2995 = vperm.xlu1 %4329, %v2825_v50   ;;  %2870 = vperm.xlu0 %4328, %v2800_v45   ;;  %v2832_v63 = vmul.f32 %v9537_v22, %v7133_v42  ;;  %v2835_v38 = vmul.f32 %v9538_v1, %v7133_v42  ;;  %v2802_v51 = vmul.f32 %v9539_v8, %v7112_v26  ;;  %v9541_v50 = vld [vmem:[#allocation95_spill] sm:$0xff]  ;;  %v9542_v45 = vld [vmem:[#allocation45_spill] sm:$0xff]  ;;  %v9565_v22 = vld [vmem:[#allocation16_spill] sm:$0xff] }
 0x562   :  { %v2805_v29 = vmul.f32 %v9540_v35, %v7112_v26  ;;  %v2810_v41 = vmul.f32 %v9541_v50, %v7126_v17  ;;  %v2828_v14 = vmul.f32 %v9542_v45, %v7109_v44  ;;  %v2818_v61 = vmul.f32 %v9545_v32, %v7143_v23  ;;  %v9566_v1 = vld [vmem:[#allocation31_spill] sm:$0xff]  ;;  %v9567_v8 = vld [vmem:[#allocation104_spill] sm:$0xff]  ;;  %v9568_v35 = vld [vmem:[#allocation102_spill] sm:$0xff] }
 0x563   :  { %v2806_v18 = vmul.f32 %v9548_v49, %v7112_v26  ;;  %v2819_v47 = vmul.f32 %v9555_v48, %v7143_v23  ;;  %v9569_v50 = vld [vmem:[#allocation83_spill] sm:$0xff] }
 0x565   :  { %3070 = vperm.xlu1 %4329, %v2840_v9   ;;  %2905 = vperm.xlu0 %4328, %v2807_v7   ;;  %v2839_v9 = vmul.f32 %v9543_v3, %v7123_v19  ;;  %v2858_v7 = vmul.f32 %v9544_v12, %v7158_v31 }
 0x569   :  { %3035 = vperm.xlu1 %4329, %v2833_v37   ;;  %2910 = vperm.xlu0 %4328, %v2808_v15   ;;  %v9546_v37 = vld [vmem:[#allocation33_spill] sm:$0xff]  ;;  %v9547_v15 = vld [vmem:[#allocation91_spill] sm:$0xff] }
 0x56a   :  { %v2836_v20 = vmul.f32 %v9546_v37, %v7133_v42  ;;  %v2847_v6 = vmul.f32 %v9547_v15, %v7140_v27 }
 0x56d   :  { %3110 = vperm.xlu1 %4329, %v2848_v57   ;;  %2945 = vperm.xlu0 %4328, %v2815_v43   ;;  %v9549_v57 = vld [vmem:[#allocation90_spill] sm:$0xff]  ;;  %v9550_v43 = vld [vmem:[#allocation53_spill] sm:$0xff] }
 0x56e   :  { %v2803_v33 = vmul.f32 %v9549_v57, %v7112_v26  ;;  %v2829_v4 = vmul.f32 %v9550_v43, %v7109_v44  ;;  %v9554_v26 = vld [vmem:[#allocation105_spill] sm:$0xff] }
 0x571   :  { %2925 = vperm.xlu1 %4329, %v2811_v58   ;;  %2950 = vperm.xlu0 %4328, %v2816_v0   ;;  %v9551_v58 = vld [vmem:[#allocation27_spill] sm:$0xff]  ;;  %v9552_v0 = vld [vmem:[#allocation77_spill] sm:$0xff] }
 0x572   :  { %v2826_v28 = vmul.f32 %v9551_v58, %v7109_v44  ;;  %v2859_v30 = vmul.f32 %v9552_v0, %v7158_v31  ;;  %v64_v0 = vld [vmem:[%s8734_s4 + $0x8] sm:$0xff] }
 0x575   :  { %3075 = vperm.xlu1 %4329, %v2841_v10   ;;  %2875 = vperm.xlu0 %4328, %v2801_v11   ;;  %v9553_v10 = vld [vmem:[#allocation99_spill] sm:$0xff]  ;;  %v2837_v11 = vmul.f32 %v9554_v26, %v7133_v42 }
 0x576   :  { %v2855_v25 = vmul.f32 %v9553_v10, %v7158_v31 }
 0x579   :  { %3150 = vperm.xlu1 %4329, %v2856_v56   ;;  %2915 = vperm.xlu0 %4328, %v2809_v13   ;;  %v9556_v56 = vld [vmem:[#allocation75_spill] sm:$0xff]  ;;  %v9557_v13 = vld [vmem:[#allocation28_spill] sm:$0xff] }
 0x57a   :  { %v2830_v16 = vmul.f32 %v9556_v56, %v7109_v44  ;;  %v2849_v53 = vmul.f32 %v9557_v13, %v7140_v27  ;;  %v9562_v44 = vld [vmem:[#allocation18_spill] sm:$0xff] }
 0x57d   :  { %3040 = vperm.xlu1 %4329, %v2834_v5   ;;  %2985 = vperm.xlu0 %4328, %v2823_v62   ;;  %v9558_v5 = vld [vmem:[#allocation24_spill] sm:$0xff] }
 0x57e   :  { %v2860_v40 = vmul.f32 %v9558_v5, %v7158_v31  ;;  %v9559_v62 = vld [vmem:[#allocation96_spill] sm:$0xff]  ;;  %v9589_v5 = vld [vmem:[#allocation51_spill] sm:$0xff] }
 0x57f   :  { %v2812_v39 = vmul.f32 %v9559_v62, %v7126_v17 }
 0x581   :  { %2890 = vperm.xlu1 %4329, %v2804_v21   ;;  %2955 = vperm.xlu0 %4328, %v2817_v55   ;;  %v9560_v21 = vld [vmem:[#allocation106_spill] sm:$0xff]  ;;  %v9561_v55 = vld [vmem:[#allocation47_spill] sm:$0xff] }
 0x582   :  { %v2853_v54 = vmul.f32 %v9560_v21, %v7140_v27  ;;  %v2842_v36 = vmul.f32 %v9561_v55, %v7123_v19  ;;  %v68_v21 = vld [vmem:[%s8734_s4 + $0x28] sm:$0xff] }
 0x585   :  { %3005 = vperm.xlu1 %4329, %v2827_v24   ;;  %3025 = vperm.xlu0 %4328, %v2831_v52   ;;  %v2861_v24 = vmul.f32 %v9562_v44, %v7158_v31  ;;  %v2820_v52 = vmul.f32 %v9563_v34, %v7143_v23  ;;  %v69_v44 = vld [vmem:[%s8734_s4 + $0x30] sm:$0xff] }
 0x589   :  { %3155 = vperm.xlu1 %4329, %v2857_v2   ;;  %3030 = vperm.xlu0 %4328, %v2832_v63   ;;  %v2862_v2 = vmul.f32 %v9564_v59, %v7158_v31  ;;  %v2850_v63 = vmul.f32 %v9565_v22, %v7140_v27  ;;  %v2851_v31 = vmul.f32 %v9569_v50, %v7140_v27  ;;  %v72_v59 = vld [vmem:[%s8734_s4 + $0x48] sm:$0xff] }
 0x58a   :  { %v76_v50 = vld [vmem:[%s8734_s4 + $0x68] sm:$0xff] }
 0x58d   :  { %3045 = vperm.xlu1 %4329, %v2835_v38   ;;  %2880 = vperm.xlu0 %4328, %v2802_v51   ;;  %v2813_v38 = vmul.f32 %v9566_v1, %v7126_v17  ;;  %v2843_v51 = vmul.f32 %v9567_v8, %v7123_v19  ;;  %v73_v1 = vld [vmem:[%s8734_s4 + $0x50] sm:$0xff] }
 0x591   :  { %2895 = vperm.xlu1 %4329, %v2805_v29   ;;  %2920 = vperm.xlu0 %4328, %v2810_v41   ;;  %v2821_v29 = vmul.f32 %v9568_v35, %v7143_v23  ;;  %v9570_v41 = vld [vmem:[#allocation44_spill] sm:$0xff] }
 0x592   :  { %v2814_v45 = vmul.f32 %v9570_v41, %v7126_v17  ;;  %v9578_v17 = vld [vmem:[#allocation98_spill] sm:$0xff] }
 0x595   :  { %3010 = vperm.xlu1 %4329, %v2828_v14   ;;  %3065 = vperm.xlu0 %4328, %v2839_v9   ;;  %v9571_v14 = vld [vmem:[#allocation48_spill] sm:$0xff]  ;;  %v9572_v9 = vld [vmem:[#allocation107_spill] sm:$0xff] }
 0x596   :  { %v2844_v3 = vmul.f32 %v9571_v14, %v7123_v19  ;;  %v2822_v12 = vmul.f32 %v9572_v9, %v7143_v23  ;;  %v9581_v23 = vld [vmem:[#allocation17_spill] sm:$0xff]  ;;  %v77_v14 = vld [vmem:[%s8734_s4 + $0x70] sm:$0xff] }
 0x597   :  { %v2838_v57 = vmul.f32 %v9581_v23, %v7133_v42  ;;  %v65_v42 = vld [vmem:[%s8734_s4 + $0x10] sm:$0xff] }
 0x599   :  { %3160 = vperm.xlu1 %4329, %v2858_v7   ;;  %2960 = vperm.xlu0 %4328, %v2818_v61   ;;  %v9575_v61 = vld [vmem:[#allocation55_spill] sm:$0xff] }
 0x59a   :  { %v2852_v37 = vmul.f32 %v9575_v61, %v7140_v27 }
 0x59d   :  { %3050 = vperm.xlu1 %4329, %v2836_v20   ;;  %3105 = vperm.xlu0 %4328, %v2847_v6   ;;  %v2845_v6 = vmul.f32 %v9578_v17, %v7123_v19 }
 0x5a1   :  { %2900 = vperm.xlu1 %4329, %v2806_v18   ;;  %2885 = vperm.xlu0 %4328, %v2803_v33  }
 0x5a5   :  { %3015 = vperm.xlu1 %4329, %v2829_v4   ;;  %3000 = vperm.xlu0 %4328, %v2826_v28   ;;  %v9583_v4 = vld [vmem:[#allocation58_spill] sm:$0xff]  ;;  %v63_v28 = vld [vmem:[%s8734_s4] sm:$0xff] }
 0x5a6   :  { %v2846_v58 = vmul.f32 %v9583_v4, %v7123_v19  ;;  %v66_v19 = vld [vmem:[%s8734_s4 + $0x18] sm:$0xff] }
 0x5a7   :  { %v4285_v26 = vpack.c.bf16 %v66_v19, %v65_v42 }
 0x5a9   :  { %3165 = vperm.xlu1 %4329, %v2859_v30   ;;  %3145 = vperm.xlu0 %4328, %v2855_v25   ;;  %v4282_v25 = vpack.c.bf16 %v64_v0, %v63_v28 }
 0x5ab   :  { %4283 = vmatpush3.bf16.msra.mxu0 %v4282_v25 }
 0x5ad   :  { %3055 = vperm.xlu1 %4329, %v2837_v11   ;;  %2965 = vperm.xlu0 %4328, %v2819_v47   ;;  %v4602_v11 = vld [vmem:[%s8733_s3] sm:$0x7]  ;;  %v9586_v47 = vld [vmem:[#allocation23_spill] sm:$0xff]  ;;  %s4798_s3 = smov 64  }
 0x5ae   :  { %v290_v48 = vrot.slane %v4602_v11, %v9513_v60  ;;  %v2854_v56 = vmul.f32 %v9586_v47, %v7140_v27  ;;  %v67_v27 = vld [vmem:[%s8734_s4 + $0x20] sm:$0xff] }
 0x5b1   :  { %3020 = vperm.xlu1 %4329, %v2830_v16   ;;  %3115 = vperm.xlu0 %4328, %v2849_v53   ;;  %v9587_v16 = vmov 0.0|0.0  }
 0x5b2   :  { %4284 = vmatprep.subr.bf16.mxu0 %v9587_v16 }
 0x5b3   :  { %4286 = vmatpush3.bf16.msra.mxu0 %v4285_v26 }
 0x5b4   :  { %4287 = vmatprep.subr.bf16.mxu0 %v9587_v16 }
 0x5b5   :  { %3170 = vperm.xlu1 %4329, %v2860_v40   ;;  %2930 = vperm.xlu0 %4328, %v2812_v39   ;;  %v7302_v40 = vadd.f32 %v9589_v5, %v290_v48 }
 0x5b9   :  { %3135 = vperm.xlu1 %4329, %v2853_v54   ;;  %3080 = vperm.xlu0 %4328, %v2842_v36   ;;  %v4288_v36 = vpack.c.bf16 %v68_v21, %v67_v27 }
 0x5bb   :  { %4289 = vmatpush3.bf16.msra.mxu0 %v4288_v36 }
 0x5bc   :  { %4290 = vmatprep.subr.bf16.mxu0 %v9587_v16 }
 0x5bd   :  { %3175 = vperm.xlu1 %4329, %v2861_v24   ;;  %2970 = vperm.xlu0 %4328, %v2820_v52   ;;  %v70_v24 = vld [vmem:[%s8734_s4 + $0x38] sm:$0xff]  ;;  %v71_v52 = vld [vmem:[%s8734_s4 + $0x40] sm:$0xff] }
 0x5be   :  { %v4291_v34 = vpack.c.bf16 %v70_v24, %v69_v44 }
 0x5c0   :  { %4292 = vmatpush3.bf16.msra.mxu0 %v4291_v34  ;;  %v7420_v34 = vld [vmem:[#allocation2 + $0x8] sm:$0xff] }
 0x5c1   :  { %3180 = vperm.xlu1 %4329, %v2862_v2   ;;  %3120 = vperm.xlu0 %4328, %v2850_v63   ;;  %v4294_v63 = vpack.c.bf16 %v72_v59, %v71_v52  ;;  %9609 = vst [vmem:[#allocation35_spill] sm:$0xff] %v7420_v34 }
 0x5c2   :  { %4293 = vmatprep.subr.bf16.mxu0 %v9587_v16 }
 0x5c4   :  { %4295 = vmatpush3.bf16.msra.mxu0 %v4294_v63  ;;  %v7426_v63 = vld [vmem:[#allocation2] sm:$0xff] }
 0x5c5   :  { %2935 = vperm.xlu0 %4328, %v2813_v38   ;;  %v74_v38 = vld [vmem:[%s8734_s4 + $0x58] sm:$0xff]  ;;  %4296 = vmatprep.subr.bf16.mxu0 %v9587_v16  ;;  %9611 = vst [vmem:[#allocation73_spill] sm:$0xff] %v7426_v63 }
 0x5c6   :  { %v4297_v35 = vpack.c.bf16 %v74_v38, %v73_v1  ;;  %v7430_v38 = vld [vmem:[#allocation2 + $0x10] sm:$0xff] }
 0x5c7   :  { %9612 = vst [vmem:[#allocation41_spill] sm:$0xff] %v7430_v38 }
 0x5c8   :  { %4298 = vmatpush3.bf16.msra.mxu0 %v4297_v35 }
 0x5c9   :  { %3085 = vperm.xlu0 %4328, %v2843_v51   ;;  %4299 = vmatprep.subr.bf16.mxu0 %v9587_v16 }
 0x5cd   :  { %2975 = vperm.xlu0 %4328, %v2821_v29   ;;  %v75_v29 = vld [vmem:[%s8734_s4 + $0x60] sm:$0xff] }
 0x5ce   :  { %v4300_v41 = vpack.c.bf16 %v76_v50, %v75_v29 }
 0x5d0   :  { %4301 = vmatpush3.bf16.msra.mxu0 %v4300_v41  ;;  %v4606_v41 = vld [vmem:[#allocation2 + $0xc0] sm:$0xff] }
 0x5d1   :  { %3125 = vperm.xlu0 %4328, %v2851_v31   ;;  %4302 = vmatprep.subr.bf16.mxu0 %v9587_v16 }
 0x5d5   :  { %2940 = vperm.xlu0 %4328, %v2814_v45  }
 0x5d9   :  { %3090 = vperm.xlu0 %4328, %v2844_v3   ;;  %v78_v3 = vld [vmem:[%s8734_s4 + $0x78] sm:$0xff] }
 0x5dc   :  { %v7250_v7 = vpop.permute.xlu1 %2990  ;;  %v7252_v32 = vpop.permute.xlu0 %2865 }
 0x5dd   :  { %9573 = vst [vmem:[#allocation57_spill] sm:$0xff] %v7250_v7  ;;  %9574 = vst [vmem:[#allocation66_spill] sm:$0xff] %v7252_v32  ;;  %2980 = vperm.xlu0 %4328, %v2822_v12   ;;  %v4303_v12 = vpack.c.bf16 %v78_v3, %v77_v14  ;;  %v3183_v1 = vmul.f32 %v7426_v63, %v7252_v32  ;;  %v7437_v3 = vld [vmem:[#allocation2 + $0x18] sm:$0xff]  ;;  %v4609_v32 = vld [vmem:[#allocation2 + $0xc8] sm:$0xff] }
 0x5de   :  { %9613 = vst [vmem:[#allocation65_spill] sm:$0xff] %v7437_v3 }
 0x5df   :  { %4304 = vmatpush3.bf16.msra.mxu0 %v4303_v12 }
 0x5e0   :  { %v7256_v20 = vpop.permute.xlu1 %2995  ;;  %v7258_v15 = vpop.permute.xlu0 %2870 }
 0x5e1   :  { %9576 = vst [vmem:[#allocation79_spill] sm:$0xff] %v7256_v20  ;;  %9577 = vst [vmem:[#allocation69_spill] sm:$0xff] %v7258_v15  ;;  %3130 = vperm.xlu0 %4328, %v2852_v37   ;;  %v3184_v52 = vmul.f32 %v7420_v34, %v7258_v15  ;;  %v7441_v34 = vld [vmem:[#allocation2 + $0x48] sm:$0xff] }
 0x5e2   :  { %9614 = vst [vmem:[#allocation42_spill] sm:$0xff] %v7441_v34 }
 0x5e3   :  { %v3247_v50 = vadd.f32 %v3184_v52, %v3183_v1  ;;  %v7448_v52 = vld [vmem:[#allocation2 + $0x20] sm:$0xff] }
 0x5e4   :  { %v7262_v49 = vpop.permute.xlu1 %3070  ;;  %v7264_v18 = vpop.permute.xlu0 %2905  ;;  %9615 = vst [vmem:[#allocation34_spill] sm:$0xff] %v7448_v52 }
 0x5e5   :  { %9579 = vst [vmem:[#allocation80_spill] sm:$0xff] %v7262_v49  ;;  %9580 = vst [vmem:[#allocation97_spill] sm:$0xff] %v7264_v18  ;;  %3095 = vperm.xlu0 %4328, %v2845_v6  }
 0x5e8   :  { %v7268_v33 = vpop.permute.xlu1 %3035  ;;  %v7270_v43 = vpop.permute.xlu0 %2910 }
 0x5e9   :  { %9582 = vst [vmem:[#allocation72_spill] sm:$0xff] %v7270_v43  ;;  %3060 = vperm.xlu0 %4328, %v2838_v57   ;;  %v3192_v63 = vmul.f32 %v7441_v34, %v7270_v43  ;;  %v7460_v43 = vld [vmem:[#allocation2 + $0x88] sm:$0xff] }
 0x5ea   :  { %9618 = vst [vmem:[#allocation86_spill] sm:$0xff] %v7460_v43 }
 0x5ec   :  { %v7283_v30 = vpop.permute.xlu1 %3110  ;;  %v7285_v10 = vpop.permute.xlu0 %2945 }
 0x5ed   :  { %9584 = vst [vmem:[#allocation76_spill] sm:$0xff] %v7283_v30  ;;  %9585 = vst [vmem:[#allocation38_spill] sm:$0xff] %v7285_v10  ;;  %3100 = vperm.xlu0 %4328, %v2846_v58  }
 0x5f0   :  { %v7297_v13 = vpop.permute.xlu1 %2925  ;;  %v7299_v53 = vpop.permute.xlu0 %2950 }
 0x5f1   :  { %9588 = vst [vmem:[#allocation61_spill] sm:$0xff] %v7299_v53  ;;  %3140 = vperm.xlu0 %4328, %v2854_v56  }
 0x5f4   :  { %v7305_v62 = vpop.permute.xlu1 %3075  ;;  %v7307_v39 = vpop.permute.xlu0 %2875 }
 0x5f5   :  { %9590 = vst [vmem:[#allocation92_spill] sm:$0xff] %v7307_v39  ;;  %3452 = vrot.lane.b32.xlu0 %v7302_v40, %s4798_s3  ;;  %v3185_v35 = vmul.f32 %v7430_v38, %v7307_v39  ;;  %v3208_v38 = vmul.f32 %v4609_v32, %v7250_v7  ;;  %v3200_v32 = vmul.f32 %v7460_v43, %v7299_v53  ;;  %v4621_v53 = vld [vmem:[#allocation2 + $0x1c0] sm:$0xff] }
 0x5f7   :  { %v3248_v39 = vadd.f32 %v3247_v50, %v3185_v35 }
 0x5f8   :  { %v7317_v54 = vpop.permute.xlu1 %3150  ;;  %v7319_v55 = vpop.permute.xlu0 %2915 }
 0x5f9   :  { %9591 = vst [vmem:[#allocation78_spill] sm:$0xff] %v7317_v54  ;;  %9592 = vst [vmem:[#allocation60_spill] sm:$0xff] %v7319_v55 }
 0x5fc   :  { %v7334_v2 = vpop.permute.xlu1 %3040  ;;  %v7336_v22 = vpop.permute.xlu0 %2985 }
 0x5fd   :  { %9593 = vst [vmem:[#allocation81_spill] sm:$0xff] %v7336_v22  ;;  %v3207_v14 = vmul.f32 %v4606_v41, %v7336_v22  ;;  %v7452_v41 = vld [vmem:[#allocation2 + $0x40] sm:$0xff]  ;;  %v7456_v22 = vld [vmem:[#allocation2 + $0x50] sm:$0xff] }
 0x5fe   :  { %9616 = vst [vmem:[#allocation67_spill] sm:$0xff] %v7452_v41  ;;  %9617 = vst [vmem:[#allocation40_spill] sm:$0xff] %v7456_v22  ;;  %v3193_v34 = vmul.f32 %v7456_v22, %v7319_v55  ;;  %v7474_v55 = vld [vmem:[#allocation2 + $0x58] sm:$0xff] }
 0x5ff   :  { %v3286_v35 = vadd.f32 %v3208_v38, %v3207_v14  ;;  %9622 = vst [vmem:[#allocation36_spill] sm:$0xff] %v7474_v55 }
 0x600   :  { %v7345_v8 = vpop.permute.xlu0 %2955  ;;  %v7347_v51 = vpop.permute.xlu1 %2890 }
 0x601   :  { %9594 = vst [vmem:[#allocation84_spill] sm:$0xff] %v7345_v8  ;;  %9595 = vst [vmem:[#allocation26_spill] sm:$0xff] %v7347_v51 }
 0x604   :  { %v7356_v31 = vpop.permute.xlu0 %3025  ;;  %v7358_v45 = vpop.permute.xlu1 %3005 }
 0x605   :  { %9596 = vst [vmem:[#allocation62_spill] sm:$0xff] %v7356_v31 }
 0x608   :  { %v7367_v9 = vpop.permute.xlu0 %3030  ;;  %v7372_v37 = vpop.permute.xlu1 %3155 }
 0x609   :  { %9597 = vst [vmem:[#allocation56_spill] sm:$0xff] %v7367_v9  ;;  %9598 = vst [vmem:[#allocation22_spill] sm:$0xff] %v7372_v37 }
 0x60c   :  { %v7370_v61 = vpop.permute.xlu0 %2880  ;;  %v7376_v6 = vpop.permute.xlu1 %3045 }
 0x60d   :  { %v3186_v12 = vmul.f32 %v7437_v3, %v7370_v61  ;;  %v3191_v3 = vmul.f32 %v7452_v41, %v7264_v18  ;;  %v7470_v18 = vld [vmem:[#allocation2 + $0x108] sm:$0xff] }
 0x60e   :  { %9621 = vst [vmem:[#allocation63_spill] sm:$0xff] %v7470_v18  ;;  %v3216_v22 = vmul.f32 %v7470_v18, %v7367_v9 }
 0x60f   :  { %v3249_v50 = vadd.f32 %v3248_v39, %v3186_v12  ;;  %v3260_v41 = vadd.f32 %v3192_v63, %v3191_v3  ;;  %v7480_v39 = vld [vmem:[#allocation2 + $0x80] sm:$0xff]  ;;  %v7484_v12 = vld [vmem:[#allocation2 + $0x90] sm:$0xff] }
 0x610   :  { %v7374_v17 = vpop.permute.xlu0 %2920  ;;  %v7382_v4 = vpop.permute.xlu1 %2895  ;;  %9624 = vst [vmem:[#allocation87_spill] sm:$0xff] %v7480_v39  ;;  %v3199_v14 = vmul.f32 %v7480_v39, %v7285_v10  ;;  %9625 = vst [vmem:[#allocation37_spill] sm:$0xff] %v7484_v12  ;;  %v3201_v63 = vmul.f32 %v7484_v12, %v7345_v8 }
 0x611   :  { %9599 = vst [vmem:[#allocation39_spill] sm:$0xff] %v7374_v17  ;;  %v3194_v43 = vmul.f32 %v7474_v55, %v7374_v17  ;;  %v3261_v9 = vadd.f32 %v3260_v41, %v3193_v34  ;;  %v7492_v55 = vld [vmem:[#allocation2 + $0x100] sm:$0xff]  ;;  %v7497_v17 = vld [vmem:[#allocation2 + $0x28] sm:$0xff] }
 0x612   :  { %9627 = vst [vmem:[#allocation82_spill] sm:$0xff] %v7492_v55  ;;  %v3273_v10 = vadd.f32 %v3200_v32, %v3199_v14  ;;  %9628 = vst [vmem:[#allocation89_spill] sm:$0xff] %v7497_v17  ;;  %v4624_v41 = vld [vmem:[#allocation2 + $0x1c8] sm:$0xff] }
 0x613   :  { %v3240_v12 = vmul.f32 %v4624_v41, %v7317_v54  ;;  %v7552_v54 = vld [vmem:[#allocation2 + $0x118] sm:$0xff] }
 0x614   :  { %v7378_v23 = vpop.permute.xlu0 %3065  ;;  %v7386_v28 = vpop.permute.xlu1 %3010  ;;  %9642 = vst [vmem:[#allocation90_spill] sm:$0xff] %v7552_v54 }
 0x618   :  { %v7380_v57 = vpop.permute.xlu0 %2960  ;;  %v7392_v25 = vpop.permute.xlu1 %3160 }
 0x619   :  { %9603 = vst [vmem:[#allocation32_spill] sm:$0xff] %v7392_v25 }
 0x61c   :  { %v7384_v58 = vpop.permute.xlu0 %3105  ;;  %v7396_v26 = vpop.permute.xlu1 %3050 }
 0x61d   :  { %9600 = vst [vmem:[#allocation46_spill] sm:$0xff] %v7384_v58 }
 0x620   :  { %v7388_v0 = vpop.permute.xlu0 %2885  ;;  %v7402_v47 = vpop.permute.xlu1 %2900 }
 0x621   :  { %9601 = vst [vmem:[#allocation64_spill] sm:$0xff] %v7388_v0  ;;  %v3187_v1 = vmul.f32 %v7448_v52, %v7388_v0  ;;  %v7466_v52 = vld [vmem:[#allocation2 + $0xd0] sm:$0xff] }
 0x622   :  { %9620 = vst [vmem:[#allocation85_spill] sm:$0xff] %v7466_v52  ;;  %v3209_v0 = vmul.f32 %v7466_v52, %v7256_v20  ;;  %v7488_v52 = vld [vmem:[#allocation2 + $0xd8] sm:$0xff]  ;;  %v3215_v20 = vmul.f32 %v7492_v55, %v7356_v31  ;;  %v3262_v55 = vadd.f32 %v3261_v9, %v3194_v43 }
 0x623   :  { %v3250_v3 = vadd.f32 %v3249_v50, %v3187_v1  ;;  %9626 = vst [vmem:[#allocation52_spill] sm:$0xff] %v7488_v52  ;;  %v3188_v1 = vmul.f32 %v7497_v17, %v7347_v51  ;;  %v7501_v50 = vld [vmem:[#allocation2 + $0x98] sm:$0xff]  ;;  %v7514_v51 = vld [vmem:[#allocation2 + $0x110] sm:$0xff] }
 0x624   :  { %v7390_v42 = vpop.permute.xlu0 %3000  ;;  %v7406_v16 = vpop.permute.xlu1 %3015  ;;  %9629 = vst [vmem:[#allocation30_spill] sm:$0xff] %v7501_v50  ;;  %v3287_v34 = vadd.f32 %v3286_v35, %v3209_v0  ;;  %9632 = vst [vmem:[#allocation68_spill] sm:$0xff] %v7514_v51  ;;  %v3217_v0 = vmul.f32 %v7514_v51, %v7268_v33  ;;  %v7518_v35 = vld [vmem:[#allocation2 + $0x60] sm:$0xff] }
 0x625   :  { %9602 = vst [vmem:[#allocation19_spill] sm:$0xff] %v7390_v42  ;;  %v3210_v18 = vmul.f32 %v7488_v52, %v7390_v42  ;;  %v3202_v52 = vmul.f32 %v7501_v50, %v7380_v57  ;;  %v3299_v42 = vadd.f32 %v3216_v22, %v3215_v20  ;;  %v3251_v32 = vadd.f32 %v3250_v3, %v3188_v1  ;;  %v7526_v22 = vld [vmem:[#allocation2 + $0xe0] sm:$0xff]  ;;  %v7542_v50 = vld [vmem:[#allocation2 + $0x70] sm:$0xff] }
 0x626   :  { %9633 = vst [vmem:[#allocation59_spill] sm:$0xff] %v7518_v35  ;;  %v3195_v20 = vmul.f32 %v7518_v35, %v7297_v13  ;;  %9635 = vst [vmem:[#allocation45_spill] sm:$0xff] %v7526_v22  ;;  %v3211_v9 = vmul.f32 %v7526_v22, %v7358_v45 }
 0x627   :  { %v3288_v14 = vadd.f32 %v3287_v34, %v3210_v18  ;;  %v7534_v34 = vld [vmem:[#allocation2 + $0xa8] sm:$0xff]  ;;  %v3300_v51 = vadd.f32 %v3299_v42, %v3217_v0  ;;  %9639 = vst [vmem:[#allocation33_spill] sm:$0xff] %v7542_v50 }
 0x628   :  { %v7394_v19 = vpop.permute.xlu0 %3145  ;;  %v7412_v21 = vpop.permute.xlu1 %3165  ;;  %9637 = vst [vmem:[#allocation54_spill] sm:$0xff] %v7534_v34 }
 0x629   :  { %9604 = vst [vmem:[#allocation70_spill] sm:$0xff] %v7394_v19  ;;  %9607 = vst [vmem:[#allocation15_spill] sm:$0xff] %v7412_v21  ;;  %v3239_v39 = vmul.f32 %v4621_v53, %v7394_v19  ;;  %v3274_v53 = vadd.f32 %v3273_v10, %v3201_v63  ;;  %v7508_v19 = vld [vmem:[#allocation2 + $0xa0] sm:$0xff]  ;;  %v7522_v10 = vld [vmem:[#allocation2 + $0x68] sm:$0xff] }
 0x62a   :  { %9630 = vst [vmem:[#allocation74_spill] sm:$0xff] %v7508_v19  ;;  %9634 = vst [vmem:[#allocation95_spill] sm:$0xff] %v7522_v10  ;;  %v7530_v63 = vld [vmem:[#allocation2 + $0x30] sm:$0xff] }
 0x62b   :  { %v3338_v43 = vadd.f32 %v3240_v12, %v3239_v39  ;;  %9636 = vst [vmem:[#allocation71_spill] sm:$0xff] %v7530_v63  ;;  %v3189_v3 = vmul.f32 %v7530_v63, %v7382_v4  ;;  %v3275_v1 = vadd.f32 %v3274_v53, %v3202_v52  ;;  %v7538_v12 = vld [vmem:[#allocation2 + $0x1d0] sm:$0xff]  ;;  %v3289_v53 = vadd.f32 %v3288_v14, %v3211_v9  ;;  %v7564_v14 = vld [vmem:[#allocation2 + $0xe8] sm:$0xff] }
 0x62c   :  { %v7398_v11 = vpop.permute.xlu0 %2965  ;;  %v7416_v44 = vpop.permute.xlu1 %3055  ;;  %9638 = vst [vmem:[#allocation88_spill] sm:$0xff] %v7538_v12  ;;  %v3241_v41 = vmul.f32 %v7538_v12, %v7372_v37  ;;  %v7548_v63 = vld [vmem:[#allocation2 + $0xb0] sm:$0xff]  ;;  %9645 = vst [vmem:[#allocation77_spill] sm:$0xff] %v7564_v14  ;;  %v3212_v9 = vmul.f32 %v7564_v14, %v7386_v28 }
 0x62d   :  { %v3203_v17 = vmul.f32 %v7508_v19, %v7398_v11  ;;  %v3263_v19 = vadd.f32 %v3262_v55, %v3195_v20  ;;  %v3252_v52 = vadd.f32 %v3251_v32, %v3189_v3  ;;  %9641 = vst [vmem:[#allocation29_spill] sm:$0xff] %v7548_v63  ;;  %v3218_v55 = vmul.f32 %v7552_v54, %v7334_v2  ;;  %v7556_v20 = vld [vmem:[#allocation2 + $0x78] sm:$0xff]  ;;  %v7560_v32 = vld [vmem:[#allocation2 + $0x148] sm:$0xff] }
 0x62e   :  { %v3339_v42 = vadd.f32 %v3338_v43, %v3241_v41  ;;  %9643 = vst [vmem:[#allocation53_spill] sm:$0xff] %v7556_v20  ;;  %9644 = vst [vmem:[#allocation27_spill] sm:$0xff] %v7560_v32  ;;  %v7568_v3 = vld [vmem:[#allocation2 + $0x38] sm:$0xff]  ;;  %v7574_v41 = vld [vmem:[#allocation2 + $0x140] sm:$0xff]  ;;  %v3290_v37 = vadd.f32 %v3289_v53, %v3212_v9 }
 0x62f   :  { %v3276_v35 = vadd.f32 %v3275_v1, %v3203_v17  ;;  %v3224_v17 = vmul.f32 %v7560_v32, %v7262_v49  ;;  %9646 = vst [vmem:[#allocation99_spill] sm:$0xff] %v7568_v3  ;;  %v3301_v1 = vadd.f32 %v3300_v51, %v3218_v55  ;;  %9648 = vst [vmem:[#allocation94_spill] sm:$0xff] %v7574_v41  ;;  %v7578_v32 = vld [vmem:[#allocation2 + $0x1d8] sm:$0xff]  ;;  %v7592_v55 = vld [vmem:[#allocation2 + $0x120] sm:$0xff] }
 0x630   :  { %v7400_v48 = vpop.permute.xlu0 %3115  ;;  %v7434_v29 = vpop.permute.xlu1 %3020  ;;  %v3223_v54 = vmul.f32 %v7574_v41, %v7378_v23  ;;  %9649 = vst [vmem:[#allocation75_spill] sm:$0xff] %v7578_v32  ;;  %v7584_v49 = vld [vmem:[#allocation2 + $0xb8] sm:$0xff]  ;;  %9652 = vst [vmem:[#allocation96_spill] sm:$0xff] %v7592_v55  ;;  %v7600_v53 = vld [vmem:[#allocation2 + $0x180] sm:$0xff] }
 0x631   :  { %9605 = vst [vmem:[#allocation43_spill] sm:$0xff] %v7400_v48  ;;  %9650 = vst [vmem:[#allocation28_spill] sm:$0xff] %v7584_v49  ;;  %v3231_v9 = vmul.f32 %v7600_v53, %v7384_v58  ;;  %v7654_v58 = vld [vmem:[#allocation2 + $0x160] sm:$0xff] }
 0x632   :  { %9654 = vst [vmem:[#allocation47_spill] sm:$0xff] %v7600_v53  ;;  %9669 = vst [vmem:[#allocation58_spill] sm:$0xff] %v7654_v58 }
 0x634   :  { %v7404_v56 = vpop.permute.xlu0 %2930  ;;  %v7464_v7 = vpop.permute.xlu1 %3170 }
 0x635   :  { %9619 = vst [vmem:[#allocation20_spill] sm:$0xff] %v7464_v7  ;;  %v3196_v18 = vmul.f32 %v7522_v10, %v7404_v56 }
 0x637   :  { %v3264_v0 = vadd.f32 %v3263_v19, %v3196_v18  ;;  %v3190_v19 = vmul.f32 %v7568_v3, %v7402_v47 }
 0x638   :  { %v7408_v5 = vpop.permute.xlu0 %3080  ;;  %v7512_v8 = vpop.permute.xlu1 %3135 }
 0x639   :  { %9606 = vst [vmem:[#allocation93_spill] sm:$0xff] %v7408_v5  ;;  %9631 = vst [vmem:[#allocation103_spill] sm:$0xff] %v7512_v8 }
 0x63c   :  { %v7410_v27 = vpop.permute.xlu0 %2970  ;;  %v7572_v43 = vpop.permute.xlu1 %3175 }
 0x63d   :  { %v3204_v39 = vmul.f32 %v7534_v34, %v7410_v27  ;;  %9647 = vst [vmem:[#allocation105_spill] sm:$0xff] %v7572_v43 }
 0x63f   :  { %v3277_v18 = vadd.f32 %v3276_v35, %v3204_v39  ;;  %v7588_v35 = vld [vmem:[#allocation2 + $0x188] sm:$0xff] }
 0x640   :  { %v7414_v36 = vpop.permute.xlu0 %3120  ;;  %9651 = vst [vmem:[#allocation24_spill] sm:$0xff] %v7588_v35  ;;  %v3232_v39 = vmul.f32 %v7588_v35, %v7283_v30 }
 0x641   :  { %9608 = vst [vmem:[#allocation21_spill] sm:$0xff] %v7414_v36 }
 0x644   :  { %v7418_v24 = vpop.permute.xlu0 %2935 }
 0x645   :  { %v3197_v22 = vmul.f32 %v7542_v50, %v7418_v24  ;;  %v3253_v50 = vadd.f32 %v3252_v52, %v3190_v19  ;;  %v7596_v52 = vld [vmem:[#allocation2 + $0x150] sm:$0xff] }
 0x646   :  { %9653 = vst [vmem:[#allocation106_spill] sm:$0xff] %v7596_v52  ;;  %v7604_v19 = vld [vmem:[#allocation2 + $0xf0] sm:$0xff] }
 0x647   :  { %v3265_v14 = vadd.f32 %v3264_v0, %v3197_v22  ;;  %v3219_v22 = vmul.f32 %v7592_v55, %v7376_v6  ;;  %9655 = vst [vmem:[#allocation18_spill] sm:$0xff] %v7604_v19  ;;  %v7608_v55 = vld [vmem:[#allocation2 + $0x1e0] sm:$0xff] }
 0x648   :  { %v7424_v59 = vpop.permute.xlu0 %3085  ;;  %9656 = vst [vmem:[#allocation100_spill] sm:$0xff] %v7608_v55 }
 0x649   :  { %9610 = vst [vmem:[#allocation25_spill] sm:$0xff] %v7424_v59  ;;  %v3302_v41 = vadd.f32 %v3301_v1, %v3219_v22 }
 0x64c   :  { %v7445_v15 = vpop.permute.xlu0 %2975 }
 0x64d   :  { %v3205_v34 = vmul.f32 %v7548_v63, %v7445_v15  ;;  %v3242_v63 = vmul.f32 %v7578_v32, %v7392_v25  ;;  %v7632_v25 = vld [vmem:[#allocation2 + $0x1f0] sm:$0xff] }
 0x64e   :  { %9663 = vst [vmem:[#allocation44_spill] sm:$0xff] %v7632_v25 }
 0x64f   :  { %v3278_v3 = vadd.f32 %v3277_v18, %v3205_v34  ;;  %v3340_v0 = vadd.f32 %v3339_v42, %v3242_v63  ;;  %v3225_v34 = vmul.f32 %v7596_v52, %v7305_v62  ;;  %v3213_v18 = vmul.f32 %v7604_v19, %v7406_v16 }
 0x650   :  { %v7478_v38 = vpop.permute.xlu0 %3125  ;;  %v3243_v63 = vmul.f32 %v7608_v55, %v7412_v21  ;;  %v3312_v19 = vadd.f32 %v3224_v17, %v3223_v54  ;;  %v7626_v55 = vpop.permute.xlu1 %3180  ;;  %v3245_v54 = vmul.f32 %v7632_v25, %v7572_v43  ;;  %v7648_v43 = vld [vmem:[#allocation2 + $0x198] sm:$0xff] }
 0x651   :  { %9623 = vst [vmem:[#allocation101_spill] sm:$0xff] %v7478_v38  ;;  %v3291_v22 = vadd.f32 %v3290_v37, %v3213_v18  ;;  %9661 = vst [vmem:[#allocation102_spill] sm:$0xff] %v7626_v55  ;;  %v7640_v18 = vld [vmem:[#allocation2 + $0x158] sm:$0xff] }
 0x652   :  { %v3341_v21 = vadd.f32 %v3340_v0, %v3243_v63  ;;  %9665 = vst [vmem:[#allocation107_spill] sm:$0xff] %v7640_v18  ;;  %v7644_v63 = vld [vmem:[#allocation2 + $0x1f8] sm:$0xff]  ;;  %9667 = vst [vmem:[#allocation98_spill] sm:$0xff] %v7648_v43 }
 0x653   :  { %9666 = vst [vmem:[#allocation55_spill] sm:$0xff] %v7644_v63  ;;  %v3246_v25 = vmul.f32 %v7644_v63, %v7626_v55  ;;  %v7658_v63 = vld [vmem:[#allocation2 + $0x1a0] sm:$0xff] }
 0x654   :  { %v7506_v31 = vpop.permute.xlu0 %2940  ;;  %9670 = vst [vmem:[#allocation23_spill] sm:$0xff] %v7658_v63  ;;  %v3235_v55 = vmul.f32 %v7658_v63, %v7478_v38 }
 0x655   :  { %v3198_v12 = vmul.f32 %v7556_v20, %v7506_v31 }
 0x657   :  { %v3266_v32 = vadd.f32 %v3265_v14, %v3198_v12  ;;  %v7612_v12 = vld [vmem:[#allocation2 + $0xf8] sm:$0xff]  ;;  %v7616_v14 = vld [vmem:[#allocation2 + $0x1e8] sm:$0xff] }
 0x658   :  { %v7546_v10 = vpop.permute.xlu0 %3090  ;;  %9657 = vst [vmem:[#allocation50_spill] sm:$0xff] %v7612_v12  ;;  %v3214_v42 = vmul.f32 %v7612_v12, %v7434_v29  ;;  %9658 = vst [vmem:[#allocation16_spill] sm:$0xff] %v7616_v14  ;;  %v3244_v53 = vmul.f32 %v7616_v14, %v7464_v7  ;;  %v3325_v14 = vadd.f32 %v3232_v39, %v3231_v9  ;;  %v7636_v7 = vld [vmem:[#allocation2 + $0x130] sm:$0xff] }
 0x659   :  { %9640 = vst [vmem:[#allocation91_spill] sm:$0xff] %v7546_v10  ;;  %v3267_v17 = vrot.slane %v3266_v32, 4  ;;  %9664 = vst [vmem:[#allocation48_spill] sm:$0xff] %v7636_v7  ;;  %v3221_v37 = vmul.f32 %v7636_v7, %v7416_v44  ;;  %v3234_v39 = vmul.f32 %v7648_v43, %v7414_v36  ;;  %v7662_v43 = vld [vmem:[#allocation2 + $0x168] sm:$0xff] }
 0x65a   :  { %v3342_v0 = vadd.f32 %v3341_v21, %v3244_v53  ;;  %9671 = vst [vmem:[#allocation51_spill] sm:$0xff] %v7662_v43 }
 0x65c   :  { %v7582_v20 = vpop.permute.xlu0 %2980 }
 0x65d   :  { %v3206_v51 = vmul.f32 %v7584_v49, %v7582_v20  ;;  %v7628_v49 = vld [vmem:[#allocation2 + $0x190] sm:$0xff] }
 0x65e   :  { %9662 = vst [vmem:[#allocation83_spill] sm:$0xff] %v7628_v49  ;;  %v3233_v12 = vmul.f32 %v7628_v49, %v7400_v48  ;;  %v3292_v49 = vadd.f32 %v3291_v22, %v3214_v42  ;;  %v3313_v48 = vadd.f32 %v3312_v19, %v3225_v34  ;;  %v3227_v42 = vmul.f32 %v7654_v58, %v7424_v59 }
 0x65f   :  { %v3279_v35 = vadd.f32 %v3278_v3, %v3206_v51  ;;  %v7622_v3 = vld [vmem:[#allocation2 + $0x128] sm:$0xff]  ;;  %v3254_v51 = vrot.slane %v3253_v50, 4  ;;  %v3343_v22 = vadd.f32 %v3342_v0, %v3245_v54 }
 0x660   :  { %v7620_v52 = vpop.permute.xlu0 %3130  ;;  %9660 = vst [vmem:[#allocation104_spill] sm:$0xff] %v7622_v3  ;;  %v3220_v1 = vmul.f32 %v7622_v3, %v7396_v26  ;;  %v3226_v3 = vmul.f32 %v7640_v18, %v7408_v5  ;;  %v3326_v53 = vadd.f32 %v3325_v14, %v3233_v12  ;;  %v3268_v18 = vadd.f32 %v3267_v17, %v3266_v32  ;;  %v7668_v32 = vld [vmem:[#allocation2 + $0x1a8] sm:$0xff]  ;;  %v7672_v14 = vld [vmem:[#allocation2 + $0x170] sm:$0xff] }
 0x661   :  { %9659 = vst [vmem:[#allocation31_spill] sm:$0xff] %v7620_v52  ;;  %v3280_v30 = vrot.slane %v3279_v35, 4  ;;  %v3255_v21 = vadd.f32 %v3254_v51, %v3253_v50  ;;  %v3344_v36 = vadd.f32 %v3343_v22, %v3246_v25  ;;  %9672 = vst [vmem:[#allocation108_spill] sm:$0xff] %v7668_v32  ;;  %v7676_v51 = vld [vmem:[#allocation2 + $0x138] sm:$0xff] }
 0x662   :  { %v3303_v7 = vadd.f32 %v3302_v41, %v3220_v1  ;;  %v3314_v5 = vadd.f32 %v3313_v48, %v3226_v3  ;;  %v3228_v41 = vmul.f32 %v7662_v43, %v7546_v10  ;;  %v3293_v1 = vrot.slane %v3292_v49, 4  ;;  %9673 = vst [vmem:[#allocation109_spill] sm:$0xff] %v7672_v14  ;;  %9674 = vst [vmem:[#allocation110_spill] sm:$0xff] %v7676_v51  ;;  %v7686_v43 = vld [vmem:[#allocation2 + $0x1b0] sm:$0xff] }
 0x663   :  { %v3281_v34 = vadd.f32 %v3280_v30, %v3279_v35  ;;  %v3327_v58 = vadd.f32 %v3326_v53, %v3234_v39  ;;  %v3236_v48 = vmul.f32 %v7668_v32, %v7620_v52  ;;  %v3269_v30 = vrot.slane %v3268_v18, 2  ;;  %v7682_v32 = vld [vmem:[#allocation2 + $0x178] sm:$0xff]  ;;  %9677 = vst [vmem:[#allocation113_spill] sm:$0xff] %v7686_v43 }
 0x664   :  { %v7652_v9 = vpop.permute.xlu0 %3095  ;;  %v3304_v19 = vadd.f32 %v3303_v7, %v3221_v37  ;;  %v3315_v12 = vadd.f32 %v3314_v5, %v3227_v42  ;;  %v3256_v17 = vrot.slane %v3255_v21, 2  ;;  %v3294_v37 = vadd.f32 %v3293_v1, %v3292_v49  ;;  %9676 = vst [vmem:[#allocation112_spill] sm:$0xff] %v7682_v32 }
 0x665   :  { %9668 = vst [vmem:[#allocation17_spill] sm:$0xff] %v7652_v9  ;;  %v3229_v3 = vmul.f32 %v7672_v14, %v7652_v9  ;;  %v3328_v25 = vadd.f32 %v3327_v58, %v3235_v55  ;;  %v3282_v54 = vrot.slane %v3281_v34, 2  ;;  %v3345_v0 = vrot.slane %v3344_v36, 4 }
 0x666   :  { %v3316_v35 = vadd.f32 %v3315_v12, %v3228_v41  ;;  %v3270_v14 = vadd.f32 %v3269_v30, %v3268_v18  ;;  %v3237_v58 = vmul.f32 %v7686_v43, %v7512_v8  ;;  %v3295_v1 = vrot.slane %v3294_v37, 2 }
 0x667   :  { %v3329_v42 = vadd.f32 %v3328_v25, %v3236_v48  ;;  %v3283_v55 = vadd.f32 %v3282_v54, %v3281_v34  ;;  %v3346_v12 = vadd.f32 %v3345_v0, %v3344_v36 }
 0x668   :  { %v7666_v50 = vpop.permute.xlu0 %3060  ;;  %v3317_v53 = vadd.f32 %v3316_v35, %v3229_v3  ;;  %v7692_v35 = vld [vmem:[#allocation2 + $0x1b8] sm:$0xff]  ;;  %v3271_v30 = vrot.slane %v3270_v14, 1 }
 0x669   :  { %v3222_v7 = vmul.f32 %v7676_v51, %v7666_v50  ;;  %v3330_v25 = vadd.f32 %v3329_v42, %v3237_v58  ;;  %9679 = vst [vmem:[#allocation115_spill] sm:$0xff] %v7692_v35 }
 0x66b   :  { %v3305_v5 = vadd.f32 %v3304_v19, %v3222_v7  ;;  %v3257_v19 = vadd.f32 %v3256_v17, %v3255_v21  ;;  %v3347_v21 = vrot.slane %v3346_v12, 2  ;;  %v3272_v17 = vadd.f32 %v3271_v30, %v3270_v14 }
 0x66c   :  { %v7680_v39 = vpop.permute.xlu0 %3100 }
 0x66d   :  { %9675 = vst [vmem:[#allocation111_spill] sm:$0xff] %v7680_v39  ;;  %v3306_v22 = vrot.slane %v3305_v5, 4  ;;  %v3230_v63 = vmul.f32 %v7682_v32, %v7680_v39  ;;  %v3284_v32 = vrot.slane %v3283_v55, 1  ;;  %v3258_v54 = vrot.slane %v3257_v19, 1 }
 0x66e   :  { %v3348_v52 = vadd.f32 %v3347_v21, %v3346_v12 }
 0x66f   :  { %v3307_v41 = vadd.f32 %v3306_v22, %v3305_v5  ;;  %v3318_v49 = vadd.f32 %v3317_v53, %v3230_v63  ;;  %v3296_v63 = vadd.f32 %v3295_v1, %v3294_v37  ;;  %v3285_v0 = vadd.f32 %v3284_v32, %v3283_v55 }
 0x670   :  { %v7690_v48 = vpop.permute.xlu0 %3140  ;;  %v3259_v58 = vadd.f32 %v3258_v54, %v3257_v19 }
 0x671   :  { %9678 = vst [vmem:[#allocation114_spill] sm:$0xff] %v7690_v48  ;;  %v3308_v3 = vrot.slane %v3307_v41, 2  ;;  %v3319_v7 = vrot.slane %v3318_v49, 4  ;;  %v3238_v18 = vmul.f32 %v7692_v35, %v7690_v48  ;;  %v3297_v8 = vrot.slane %v3296_v63, 1 }
 0x672   :  { %v3365_v48 = vsel %vm1926_vm10, %v3272_v17, %v3259_v58  ;;  %v82_v58 = vld [vmem:[%s8736_s6 + $0x10] sm:$0xff] }
 0x673   :  { %v3309_v51 = vadd.f32 %v3308_v3, %v3307_v41  ;;  %v3320_v43 = vadd.f32 %v3319_v7, %v3318_v49  ;;  %v3331_v34 = vadd.f32 %v3330_v25, %v3238_v18  ;;  %v3366_v3 = vsel %vm1928_vm11, %v3285_v0, %v3365_v48 }
 0x674   :  { %v3298_v37 = vadd.f32 %v3297_v8, %v3296_v63  ;;  %v3349_v7 = vrot.slane %v3348_v52, 1  ;;  %v4194_v8 = vld [vmem:[%s8735_s5] ss:$0 sm:$0xff]  ;;  %v3453_v21 = vpop.permute.xlu0 %3452  ;;  %s4799_s5 = smov 32  }
 0x675   :  { %v3321_v5 = vrot.slane %v3320_v43, 2  ;;  %v3332_v36 = vrot.slane %v3331_v34, 4  ;;  %v3310_v53 = vrot.slane %v3309_v51, 1 }
 0x676   :  { %v3367_v32 = vsel %vm1930_vm12, %v3298_v37, %v3366_v3  ;;  %v3350_v55 = vadd.f32 %v3349_v7, %v3348_v52  ;;  %v86_v7 = vld [vmem:[%s8736_s6 + $0x30] sm:$0xff] }
 0x677   :  { %v3322_v22 = vadd.f32 %v3321_v5, %v3320_v43  ;;  %v3333_v42 = vadd.f32 %v3332_v36, %v3331_v34  ;;  %v3311_v41 = vadd.f32 %v3310_v53, %v3309_v51  ;;  %v4667_v36 = vld [vmem:[%s8730_s0] sm:$0xff]  ;;  %v83_v53 = vld [vmem:[%s8736_s6 + $0x18] sm:$0xff] }
 0x679   :  { %v3323_v38 = vrot.slane %v3322_v22, 1  ;;  %v3334_v35 = vrot.slane %v3333_v42, 2  ;;  %v3368_v43 = vsel %vm1932_vm13, %v3311_v41, %v3367_v32  ;;  %v85_v41 = vld [vmem:[%s8736_s6 + $0x28] sm:$0xff] }
 0x67b   :  { %v3335_v49 = vadd.f32 %v3334_v35, %v3333_v42  ;;  %v3324_v1 = vadd.f32 %v3323_v38, %v3322_v22  ;;  %v80_v22 = vld [vmem:[%s8736_s6] sm:$0xff] }
 0x67c   :  { %v4307_v3 = vpack.c.bf16 %v82_v58, %v80_v22 }
 0x67d   :  { %v3336_v25 = vrot.slane %v3335_v49, 1  ;;  %v3369_v19 = vsel %vm1934_vm14, %v3324_v1, %v3368_v43  ;;  %v84_v1 = vld [vmem:[%s8736_s6 + $0x20] sm:$0xff] }
 0x67f   :  { %v3337_v14 = vadd.f32 %v3336_v25, %v3335_v49  ;;  %v87_v49 = vld [vmem:[%s8736_s6 + $0x38] sm:$0xff]  ;;  %v4311_v25 = vpack.c.bf16 %v86_v7, %v84_v1 }
 0x680   :  { %v4309_v37 = vpack.c.bf16 %v87_v49, %v85_v41 }
 0x681   :  { %v3370_v12 = vsel %vm1936_vm15, %v3337_v14, %v3369_v19 }
 0x682   :  { %v3371_v18 = vsel %vm1938_vm0, %v3350_v55, %v3370_v12 }
 0x683   :  { %4265 = vmatmul.mubr.f32.vlgmr.msra.gmra.mrb[0].mxu0 %v3371_v18  ;;  %4133 = vst [vmem:[#allocation9] sm:$0xff] %v3371_v18 }
 0x756   :  { %v3439_v38 = vpop.f32.mrb[0].mxu0 }
 0x757   :  { %v3440_v51 = vadd.f32 %v4194_v8, %v3439_v38  ;;  %v4266_v48 = vpop.f32.mrb[1].mxu0 }
 0x759   :  { %v3443_v35 = vadd.f32 %v3440_v51, %v7302_v40  ;;  %v81_v40 = vld [vmem:[%s8736_s6 + $0x8] sm:$0xff]  ;;  %s4801_s6 = smov [#allocation5]  }
 0x75a   :  { %v4305_v42 = vpack.c.bf16 %v83_v53, %v81_v40  ;;  %s4140_s16 = sshll.u32 %s4801_s6, 4  ;;  %s4141_s16 = int_to_ptr.vmem [resolvable:$true] %s4140_s16 }
 0x75b   :  { %v4195_v30 = vmul.f32 -1.442695, %v3443_v35  ;;  %s4694_s4 = scalar_lea.vmem %s4141_s16, 128  ;;  %p4699_p9 = scmp.lt.s32.totalorder %s4141_s16, %s4141_s16 }
 0x75c   :  { %4306 = vmatprep.subr.bf16.mxu1 %v4305_v42  ;;  %p4695_p8 = scmp.ne.s32.totalorder %s4141_s16, %s4694_s4  ;;  %p4700_p10 = scmp.lt.s32.totalorder %s4694_s4, %s4694_s4 }
 0x75d   :  { %4592 = vpow2.f32 %v4195_v30  ;;  %4308 = vmatpush1.bf16.msra.mxu1 %v4307_v3 }
 0x75e   :  { %4310 = vmatprep.subr.bf16.mxu1 %v4309_v37  ;;  %p4701_p11 = por %p4700_p10, %p4699_p9 }
 0x760   :  { %p4702_p12 = pnand %p4701_p11, %p4695_p8 }
 0x761   :  { %4312 = vmatpush1.bf16.msra.mxu1 %v4311_v25 }
 0x767   :  { %v4593_v52 = vpop.eup %4592 }
 0x768   :  { %v3447_v34 = vadd.f32 1.0, %v4593_v52 }
 0x76a   :  { %4594 = vrcp.f32 %v3447_v34 }
 0x774   :  { %v4595_v54 = vpop.eup %4594 }
 0x775   :  { %v4196_v63 = vadd.f32 -1.0, %v4595_v54  ;;  %v3462_v43 = vsub.f32 1.0, %v4595_v54 }
 0x777   :  { %v3455_v5 = vmul.f32 %v4196_v63, %v3453_v21 }
 0x779   :  { %3457 = vrot.lane.b32.xlu1 %v3455_v5, %s4798_s3 }
 0x77d   :  { %3468 = vrot.lane.b32.xlu1 %v4667_v36, %s4799_s5 }
 0x7eb   :  { %v3458_v17 = vpop.permute.xlu1 %3457 }
 0x7ec   :  { %v3460_v0 = vadd.f32 %v3458_v17, %v3443_v35 }
 0x7ee   :  { %4596 = vtanh.f32 %v3460_v0 }
 0x7ef   :  { %v3469_v14 = vpop.permute.xlu1 %3468 }
 0x7f0   :  { %v3471_v19 = vmul.f32 %v4595_v54, %v3469_v14 }
 0x7f8   :  { %v4597_v32 = vpop.eup %4596 }
 0x7f9   :  { %3464 = vrot.lane.b32.xlu0 %v4597_v32, %s4800_s1 }
 0x86b   :  { %v3465_v55 = vpop.permute.xlu0 %3464 }
 0x86c   :  { %v3467_v12 = vmul.f32 %v3465_v55, %v3462_v43 }
 0x86e   :  { %v3472_v18 = vadd.f32 %v3471_v19, %v3467_v12 }
 0x870   :  { %3485 = vrot.lane.b32.xlu0 %v3472_v18, %s4800_s1 }
 0x8e2   :  { %v3486_v8 = vpop.permute.xlu0 %3485 }
 0x8e3   :  { %4131 = vst.msk [vmem:[#allocation5] sm:$0xff] %vm298_vm1, %v3486_v8  ;;  %4197 = vmatmul.mubr.msk.f32.vlgmr.msra.gmra.mrb[4].mxu1 %vm298_vm1, %v3486_v8 }
 0x8e4   :  { %4705 = shalt.err (!%p4702_p12)
}
 0x8e5   :  { %s4706_s2 = scalar_lea.hbm %s8738_s8, 128 }
 0x8e6   :  { %p4707_p13 = scmp.ne.s32.totalorder %s8738_s8, %s4706_s2  ;;  %p4710_p0 = scmp.lt.u32.totalorder %s4706_s2, %s8738_s8 }
 0x8e8   :  { %p4712_p1 = pnand %p4710_p0, %p4707_p13 }
 0x8ea   :  { %4715 = shalt.err (!%p4712_p1)
}
 0x8eb   :  { %4143 = dma.vmem_to_hbm [thread:$0]  %s4141_s16, 128, %s8738_s8, [#allocation4]  }
 0x8ec   :  { %s4802_s24 = smov [#allocation9]  }
 0x8ed   :  { %s4172_s3 = sshll.u32 %s4802_s24, 4  ;;  %s4173_s3 = int_to_ptr.vmem [resolvable:$true] %s4172_s3 }
 0x8ee   :  { %s4716_s0 = scalar_lea.vmem %s4173_s3, 128  ;;  %p4721_p3 = scmp.lt.s32.totalorder %s4173_s3, %s4173_s3 }
 0x8ef   :  { %p4717_p2 = scmp.ne.s32.totalorder %s4173_s3, %s4716_s0  ;;  %p4722_p4 = scmp.lt.s32.totalorder %s4716_s0, %s4716_s0 }
 0x8f1   :  { %p4723_p5 = por %p4722_p4, %p4721_p3 }
 0x8f3   :  { %p4724_p6 = pnand %p4723_p5, %p4717_p2 }
 0x8f5   :  { %4727 = shalt.err (!%p4724_p6)
}
 0x8f6   :  { %s4728_s29 = scalar_lea.hbm %s8741_s11, 128 }
 0x8f7   :  { %p4729_p7 = scmp.ne.s32.totalorder %s8741_s11, %s4728_s29  ;;  %p4732_p8 = scmp.lt.u32.totalorder %s4728_s29, %s8741_s11 }
 0x8f9   :  { %p4734_p9 = pnand %p4732_p8, %p4729_p7 }
 0x8fb   :  { %4737 = shalt.err (!%p4734_p9)
}
 0x8fc   :  { %4175 = dma.vmem_to_hbm [thread:$0]  %s4173_s3, 128, %s8741_s11, [#allocation10]   ;;  %v88_v38 = vld [vmem:[%s8737_s7] sm:$0x3]  ;;  %v9680_v21 = vld [vmem:[#allocation49_spill] sm:$0xff]  ;;  %v9681_v43 = vld [vmem:[#allocation66_spill] sm:$0xff] }
 0x8fd   :  { %v3477_v51 = vrot.slane %v88_v38, %v9507_v46  ;;  %v3481_v48 = vrot.slane %v88_v38, %v9513_v60  ;;  %v9683_v19 = vld [vmem:[#allocation69_spill] sm:$0xff]  ;;  %v9685_v38 = vld [vmem:[#allocation92_spill] sm:$0xff]  ;;  %s4803_s7 = smov [#allocation6]   ;;  %s4804_s16 = smov [#allocation8]  }
 0x8fe   :  { %s4149_s11 = sshll.u32 %s4803_s7, 4  ;;  %s4162_s4 = sshll.u32 %s4804_s16, 4  ;;  %s4150_s11 = int_to_ptr.vmem [resolvable:$true] %s4149_s11  ;;  %s8696_s4 = int_to_ptr.vmem [resolvable:$true] %s4162_s4 }
 0x8ff   :  { %s4738_s17 = scalar_lea.vmem %s4150_s11, 8192  ;;  %p4743_p11 = scmp.lt.s32.totalorder %s4150_s11, %s4150_s11 }
 0x900   :  { %p4739_p10 = scmp.ne.s32.totalorder %s4150_s11, %s4738_s17  ;;  %p4744_p12 = scmp.lt.s32.totalorder %s4738_s17, %s4738_s17 }
 0x902   :  { %p4745_p13 = por %p4744_p12, %p4743_p11 }
 0x904   :  { %p4746_p0 = pnand %p4745_p13, %p4739_p10 }
 0x9b6   :  { %v3555_v35 = vpop.f32.mrb[4].mxu1 }
 0x9b7   :  { %v3556_v30 = vadd.f32 %v3555_v35, %v3477_v51  ;;  %v3557_v52 = vpop.f32.mrb[5].mxu1 }
 0x9b8   :  { %v3558_v34 = vadd.f32 %v3557_v52, %v3481_v48 }
 0x9b9   :  { %v4198_v54 = vmul.f32 -1.442695, %v3556_v30  ;;  %v9688_v30 = vld [vmem:[#allocation64_spill] sm:$0xff] }
 0x9ba   :  { %v3849_v63 = vcombine.high %v3558_v34, %v3558_v34  ;;  %v3856_v5 = vrot.slane %v3558_v34, %v9680_v21  ;;  %v9690_v34 = vld [vmem:[#allocation26_spill] sm:$0xff] }
 0x9bb   :  { %4598 = vpow2.f32 %v4198_v54 }
 0x9bc   :  { %v3863_v36 = vrot.slane %v3849_v63, %v9680_v21  ;;  %v3864_v17 = vcombine.high %v3856_v5, %v3856_v5  ;;  %v3872_v0 = vrot.slane %v3856_v5, %v9680_v21 }
 0x9be   :  { %v3865_v40 = vcombine.high %v3863_v36, %v3863_v36  ;;  %v3879_v53 = vrot.slane %v3863_v36, %v9680_v21  ;;  %v3886_v22 = vrot.slane %v3864_v17, %v9680_v21  ;;  %v3894_v42 = vcombine.high %v3872_v0, %v3872_v0  ;;  %v9694_v36 = vld [vmem:[#allocation97_spill] sm:$0xff] }
 0x9bf   :  { %v3901_v41 = vrot.slane %v3872_v0, %v9507_v46  ;;  %v9696_v0 = vld [vmem:[#allocation72_spill] sm:$0xff] }
 0x9c0   :  { %v3893_v60 = vrot.slane %v3865_v40, %v9680_v21  ;;  %v3896_v58 = vcombine.high %v3886_v22, %v3886_v22  ;;  %v3895_v49 = vcombine.high %v3879_v53, %v3879_v53  ;;  %v3905_v37 = vrot.slane %v3886_v22, %v9507_v46 }
 0x9c1   :  { %v3909_v1 = vrot.slane %v3894_v42, %v9507_v46  ;;  %v3917_v7 = vrot.slane %v3879_v53, %v9507_v46  ;;  %v7779_v55 = vmul.f32 %v3901_v41, %v9681_v43  ;;  %v7782_v12 = vmul.f32 %v3901_v41, %v9683_v19  ;;  %v9698_v53 = vld [vmem:[#allocation60_spill] sm:$0xff] }
 0x9c2   :  { %v3897_v3 = vcombine.high %v3893_v60, %v3893_v60  ;;  %v3913_v32 = vrot.slane %v3896_v58, %v9507_v46  ;;  %v3921_v14 = vrot.slane %v3893_v60, %v9507_v46  ;;  %v3925_v8 = vrot.slane %v3895_v49, %v9507_v46  ;;  %v9700_v60 = vld [vmem:[#allocation39_spill] sm:$0xff] }
 0x9c3   :  { %9682 = vst [vmem:[#allocation49_spill] sm:$0xff] %v7779_v55  ;;  %9684 = vst [vmem:[#allocation66_spill] sm:$0xff] %v7782_v12  ;;  %v7786_v51 = vmul.f32 %v3901_v41, %v9685_v38  ;;  %v7789_v48 = vmul.f32 %v3901_v41, %v7370_v61  ;;  %v7795_v52 = vmul.f32 %v3901_v41, %v9688_v30 }
 0x9c4   :  { %v7792_v35 = vrot.slane %v3897_v3, %v9507_v46  ;;  %v7798_v54 = vmul.f32 %v3901_v41, %v9690_v34  ;;  %v7801_v63 = vmul.f32 %v3901_v41, %v7382_v4  ;;  %v7804_v5 = vmul.f32 %v3901_v41, %v7402_v47 }
 0x9c5   :  { %v4599_v25 = vpop.eup %4598  ;;  %9686 = vst [vmem:[#allocation69_spill] sm:$0xff] %v7786_v51  ;;  %9687 = vst [vmem:[#allocation92_spill] sm:$0xff] %v7789_v48  ;;  %v7807_v17 = vmul.f32 %v3905_v37, %v9694_v36  ;;  %v7810_v40 = vmul.f32 %v3905_v37, %v9696_v0  ;;  %v7813_v22 = vmul.f32 %v3905_v37, %v9698_v53  ;;  %v9743_v48 = vld [vmem:[#allocation93_spill] sm:$0xff] }
 0x9c6   :  { %v3563_v18 = vadd.f32 1.0, %v4599_v25  ;;  %9689 = vst [vmem:[#allocation64_spill] sm:$0xff] %v7795_v52  ;;  %9691 = vst [vmem:[#allocation26_spill] sm:$0xff] %v7798_v54  ;;  %v7816_v42 = vmul.f32 %v3905_v37, %v9700_v60  ;;  %v7819_v58 = vmul.f32 %v3905_v37, %v7297_v13  ;;  %v7822_v49 = vmul.f32 %v3905_v37, %v7404_v56  ;;  %v9706_v25 = vld [vmem:[#allocation38_spill] sm:$0xff]  ;;  %v9723_v54 = vld [vmem:[#allocation19_spill] sm:$0xff] }
 0x9c7   :  { %9692 = vst [vmem:[#allocation116_spill] sm:$0xff] %v7801_v63  ;;  %9693 = vst [vmem:[#allocation117_spill] sm:$0xff] %v7804_v5  ;;  %v7825_v41 = vmul.f32 %v3905_v37, %v7418_v24  ;;  %v7828_v3 = vmul.f32 %v3905_v37, %v7506_v31  ;;  %v7849_v37 = vmul.f32 %v3909_v1, %v7445_v15  ;;  %v9719_v5 = vld [vmem:[#allocation57_spill] sm:$0xff]  ;;  %v9721_v63 = vld [vmem:[#allocation79_spill] sm:$0xff] }
 0x9c8   :  { %4600 = vrcp.f32 %v3563_v18  ;;  %9695 = vst [vmem:[#allocation97_spill] sm:$0xff] %v7807_v17  ;;  %9697 = vst [vmem:[#allocation72_spill] sm:$0xff] %v7810_v40  ;;  %v7831_v18 = vmul.f32 %v3909_v1, %v9706_v25  ;;  %v9708_v40 = vld [vmem:[#allocation61_spill] sm:$0xff]  ;;  %v9710_v17 = vld [vmem:[#allocation84_spill] sm:$0xff] }
 0x9c9   :  { %9699 = vst [vmem:[#allocation60_spill] sm:$0xff] %v7813_v22  ;;  %9701 = vst [vmem:[#allocation39_spill] sm:$0xff] %v7816_v42  ;;  %v7834_v22 = vmul.f32 %v3909_v1, %v9708_v40  ;;  %v7837_v42 = vmul.f32 %v3909_v1, %v9710_v17  ;;  %v9731_v52 = vld [vmem:[#allocation56_spill] sm:$0xff] }
 0x9ca   :  { %9702 = vst [vmem:[#allocation118_spill] sm:$0xff] %v7819_v58  ;;  %9703 = vst [vmem:[#allocation119_spill] sm:$0xff] %v7822_v49  ;;  %v7840_v58 = vmul.f32 %v3909_v1, %v7380_v57  ;;  %v7843_v49 = vmul.f32 %v3909_v1, %v7398_v11 }
 0x9cb   :  { %9704 = vst [vmem:[#allocation120_spill] sm:$0xff] %v7825_v41  ;;  %9705 = vst [vmem:[#allocation121_spill] sm:$0xff] %v7828_v3  ;;  %v7846_v41 = vmul.f32 %v3909_v1, %v7410_v27  ;;  %v9717_v3 = vld [vmem:[#allocation81_spill] sm:$0xff] }
 0x9cc   :  { %9707 = vst [vmem:[#allocation38_spill] sm:$0xff] %v7831_v18  ;;  %9709 = vst [vmem:[#allocation61_spill] sm:$0xff] %v7834_v22  ;;  %v7852_v18 = vmul.f32 %v3909_v1, %v7582_v20  ;;  %v7855_v22 = vmul.f32 %v3913_v32, %v9717_v3  ;;  %v7873_v1 = vmul.f32 %v3913_v32, %v7406_v16 }
 0x9cd   :  { %9711 = vst [vmem:[#allocation84_spill] sm:$0xff] %v7837_v42  ;;  %9712 = vst [vmem:[#allocation122_spill] sm:$0xff] %v7840_v58  ;;  %v7858_v42 = vmul.f32 %v3913_v32, %v9719_v5  ;;  %v7861_v58 = vmul.f32 %v3913_v32, %v9721_v63 }
 0x9ce   :  { %9713 = vst [vmem:[#allocation123_spill] sm:$0xff] %v7843_v49  ;;  %9714 = vst [vmem:[#allocation124_spill] sm:$0xff] %v7846_v41  ;;  %v7864_v49 = vmul.f32 %v3913_v32, %v9723_v54  ;;  %v7867_v41 = vmul.f32 %v3913_v32, %v7358_v45 }
 0x9cf   :  { %9715 = vst [vmem:[#allocation125_spill] sm:$0xff] %v7849_v37  ;;  %9716 = vst [vmem:[#allocation126_spill] sm:$0xff] %v7852_v18  ;;  %v7870_v37 = vmul.f32 %v3913_v32, %v7386_v28  ;;  %v9729_v18 = vld [vmem:[#allocation62_spill] sm:$0xff] }
 0x9d0   :  { %9718 = vst [vmem:[#allocation81_spill] sm:$0xff] %v7855_v22  ;;  %9720 = vst [vmem:[#allocation57_spill] sm:$0xff] %v7858_v42  ;;  %v7876_v22 = vmul.f32 %v3913_v32, %v7434_v29  ;;  %v7879_v42 = vmul.f32 %v3917_v7, %v9729_v18  ;;  %v7897_v32 = vmul.f32 %v3917_v7, %v7416_v44 }
 0x9d1   :  { %9722 = vst [vmem:[#allocation79_spill] sm:$0xff] %v7861_v58  ;;  %9724 = vst [vmem:[#allocation19_spill] sm:$0xff] %v7864_v49  ;;  %v7882_v58 = vmul.f32 %v3917_v7, %v9731_v52  ;;  %v7885_v49 = vmul.f32 %v3917_v7, %v7268_v33 }
 0x9d2   :  { %9725 = vst [vmem:[#allocation127_spill] sm:$0xff] %v7867_v41  ;;  %9726 = vst [vmem:[#allocation128_spill] sm:$0xff] %v7870_v37  ;;  %v7888_v41 = vmul.f32 %v3917_v7, %v7334_v2  ;;  %v7891_v37 = vmul.f32 %v3917_v7, %v7376_v6 }
 0x9d3   :  { %9727 = vst [vmem:[#allocation129_spill] sm:$0xff] %v7873_v1  ;;  %9728 = vst [vmem:[#allocation130_spill] sm:$0xff] %v7876_v22  ;;  %v7894_v1 = vmul.f32 %v3917_v7, %v7396_v26  ;;  %v9740_v22 = vld [vmem:[#allocation80_spill] sm:$0xff] }
 0x9d4   :  { %9730 = vst [vmem:[#allocation62_spill] sm:$0xff] %v7879_v42  ;;  %9732 = vst [vmem:[#allocation56_spill] sm:$0xff] %v7882_v58  ;;  %v7900_v42 = vmul.f32 %v3917_v7, %v7666_v50  ;;  %v7903_v58 = vmul.f32 %v3921_v14, %v7378_v23  ;;  %v4601_v7 = vpop.eup %4600 }
 0x9d5   :  { %9733 = vst [vmem:[#allocation131_spill] sm:$0xff] %v7885_v49  ;;  %9734 = vst [vmem:[#allocation132_spill] sm:$0xff] %v7888_v41  ;;  %v7906_v49 = vmul.f32 %v3921_v14, %v9740_v22  ;;  %v7909_v41 = vmul.f32 %v3921_v14, %v7305_v62  ;;  %v3574_v55 = vrot.slane %v4601_v7, %v9680_v21 }
 0x9d6   :  { %9735 = vst [vmem:[#allocation133_spill] sm:$0xff] %v7891_v37  ;;  %9736 = vst [vmem:[#allocation134_spill] sm:$0xff] %v7894_v1  ;;  %v7912_v37 = vmul.f32 %v3921_v14, %v9743_v48  ;;  %v7915_v1 = vmul.f32 %v3921_v14, %v7424_v59 }
 0x9d7   :  { %9737 = vst [vmem:[#allocation135_spill] sm:$0xff] %v7897_v32  ;;  %9738 = vst [vmem:[#allocation136_spill] sm:$0xff] %v7900_v42  ;;  %v7918_v32 = vmul.f32 %v3921_v14, %v7546_v10  ;;  %v7921_v42 = vmul.f32 %v3921_v14, %v7652_v9  ;;  %v9757_v9 = vld [vmem:[#allocation101_spill] sm:$0xff] }
 0x9d8   :  { %9739 = vst [vmem:[#allocation137_spill] sm:$0xff] %v7903_v58  ;;  %9741 = vst [vmem:[#allocation80_spill] sm:$0xff] %v7906_v49  ;;  %v7924_v58 = vmul.f32 %v3921_v14, %v7680_v39  ;;  %v9749_v49 = vld [vmem:[#allocation46_spill] sm:$0xff]  ;;  %v9759_v14 = vld [vmem:[#allocation31_spill] sm:$0xff]  ;;  %v3582_v39 = vcombine.high %v3574_v55, %v3574_v55 }
 0x9d9   :  { %9742 = vst [vmem:[#allocation138_spill] sm:$0xff] %v7909_v41  ;;  %9744 = vst [vmem:[#allocation93_spill] sm:$0xff] %v7912_v37  ;;  %v7927_v51 = vmul.f32 %v3925_v8, %v9749_v49  ;;  %v9751_v41 = vld [vmem:[#allocation76_spill] sm:$0xff]  ;;  %v3567_v37 = vcombine.high %v4601_v7, %v4601_v7  ;;  %v9761_v49 = vld [vmem:[#allocation103_spill] sm:$0xff] }
 0x9da   :  { %9745 = vst [vmem:[#allocation139_spill] sm:$0xff] %v7915_v1  ;;  %9746 = vst [vmem:[#allocation140_spill] sm:$0xff] %v7918_v32  ;;  %v7930_v12 = vmul.f32 %v3925_v8, %v9751_v41  ;;  %v9753_v1 = vld [vmem:[#allocation43_spill] sm:$0xff]  ;;  %v9755_v32 = vld [vmem:[#allocation21_spill] sm:$0xff] }
 0x9db   :  { %9747 = vst [vmem:[#allocation141_spill] sm:$0xff] %v7921_v42  ;;  %9748 = vst [vmem:[#allocation142_spill] sm:$0xff] %v7924_v58  ;;  %v7934_v59 = vmul.f32 %v3925_v8, %v9753_v1  ;;  %v7937_v10 = vmul.f32 %v3925_v8, %v9755_v32  ;;  %v7940_v42 = vmul.f32 %v3925_v8, %v9757_v9  ;;  %v9763_v41 = vld [vmem:[#allocation114_spill] sm:$0xff] }
 0x9dc   :  { %9750 = vst [vmem:[#allocation143_spill] sm:$0xff] %v7927_v51  ;;  %9752 = vst [vmem:[#allocation144_spill] sm:$0xff] %v7930_v12  ;;  %v7943_v58 = vmul.f32 %v3925_v8, %v9759_v14  ;;  %v7946_v51 = vmul.f32 %v3925_v8, %v9761_v49  ;;  %v7949_v12 = vmul.f32 %v3925_v8, %v9763_v41  ;;  %v9765_v1 = vld [vmem:[#allocation70_spill] sm:$0xff] }
 0x9dd   :  { %9754 = vst [vmem:[#allocation145_spill] sm:$0xff] %v7934_v59  ;;  %9756 = vst [vmem:[#allocation146_spill] sm:$0xff] %v7937_v10  ;;  %v3581_v7 = vrot.slane %v3567_v37, %v9680_v21  ;;  %v3590_v59 = vrot.slane %v3574_v55, %v9680_v21  ;;  %v7955_v10 = vmul.f32 %v7792_v35, %v9765_v1  ;;  %v9767_v9 = vld [vmem:[#allocation78_spill] sm:$0xff]  ;;  %v9773_v37 = vld [vmem:[#allocation15_spill] sm:$0xff] }
 0x9de   :  { %9758 = vst [vmem:[#allocation147_spill] sm:$0xff] %v7940_v42  ;;  %9760 = vst [vmem:[#allocation148_spill] sm:$0xff] %v7943_v58  ;;  %v7959_v42 = vmul.f32 %v7792_v35, %v9767_v9  ;;  %v9769_v58 = vld [vmem:[#allocation22_spill] sm:$0xff]  ;;  %v9775_v9 = vld [vmem:[#allocation20_spill] sm:$0xff] }
 0x9df   :  { %9762 = vst [vmem:[#allocation149_spill] sm:$0xff] %v7946_v51  ;;  %9764 = vst [vmem:[#allocation150_spill] sm:$0xff] %v7949_v12  ;;  %v7963_v49 = vmul.f32 %v7792_v35, %v9769_v58  ;;  %v9771_v51 = vld [vmem:[#allocation32_spill] sm:$0xff]  ;;  %v7971_v12 = vmul.f32 %v7792_v35, %v9773_v37  ;;  %v3583_v55 = vcombine.high %v3581_v7, %v3581_v7 }
 0x9e0   :  { %9766 = vst [vmem:[#allocation151_spill] sm:$0xff] %v7955_v10  ;;  %9768 = vst [vmem:[#allocation152_spill] sm:$0xff] %v7959_v42  ;;  %v7967_v8 = vmul.f32 %v7792_v35, %v9771_v51  ;;  %v3597_v1 = vrot.slane %v3581_v7, %v9680_v21  ;;  %v3604_v10 = vrot.slane %v3582_v39, %v9680_v21 }
 0x9e1   :  { %9770 = vst [vmem:[#allocation153_spill] sm:$0xff] %v7963_v49  ;;  %9774 = vst [vmem:[#allocation155_spill] sm:$0xff] %v7971_v12  ;;  %v3612_v41 = vcombine.high %v3590_v59, %v3590_v59  ;;  %v3619_v42 = vrot.slane %v3590_v59, %v9507_v46  ;;  %v7978_v58 = vmul.f32 %v7792_v35, %v9775_v9  ;;  %v9777_v49 = vld [vmem:[#allocation105_spill] sm:$0xff] }
 0x9e2   :  { %9772 = vst [vmem:[#allocation154_spill] sm:$0xff] %v7967_v8  ;;  %v7982_v51 = vmul.f32 %v7792_v35, %v9777_v49  ;;  %v9779_v8 = vld [vmem:[#allocation102_spill] sm:$0xff]  ;;  %v3611_v12 = vrot.slane %v3583_v55, %v9680_v21  ;;  %v3613_v7 = vcombine.high %v3597_v1, %v3597_v1  ;;  %v3614_v14 = vcombine.high %v3604_v10, %v3604_v10 }
 0x9e3   :  { %9776 = vst [vmem:[#allocation20_spill] sm:$0xff] %v7978_v58  ;;  %v7986_v37 = vmul.f32 %v7792_v35, %v9779_v8  ;;  %v3623_v39 = vrot.slane %v3604_v10, %v9507_v46  ;;  %v3627_v59 = vrot.slane %v3612_v41, %v9507_v46  ;;  %v3635_v32 = vrot.slane %v3597_v1, %v9507_v46 }
 0x9e4   :  { %9778 = vst [vmem:[#allocation156_spill] sm:$0xff] %v7982_v51  ;;  %v7993_v58 = vmul.f32 %v3619_v42, %v9681_v43  ;;  %v7996_v49 = vmul.f32 %v3619_v42, %v9683_v19  ;;  %v3615_v51 = vcombine.high %v3611_v12, %v3611_v12  ;;  %v3631_v35 = vrot.slane %v3614_v14, %v9507_v46 }
 0x9e5   :  { %9780 = vst [vmem:[#allocation102_spill] sm:$0xff] %v7986_v37  ;;  %v3639_v37 = vrot.slane %v3611_v12, %v9507_v46  ;;  %v3643_v21 = vrot.slane %v3613_v7, %v9507_v46  ;;  %v8002_v55 = vmul.f32 %v3619_v42, %v9685_v38  ;;  %v8005_v10 = vmul.f32 %v3619_v42, %v7370_v61 }
 0x9e6   :  { %v8008_v41 = vmul.f32 %v3619_v42, %v9688_v30  ;;  %v8011_v43 = vmul.f32 %v3619_v42, %v9690_v34  ;;  %v3647_v19 = vrot.slane %v3615_v51, %v9507_v46  ;;  %v8015_v1 = vmul.f32 %v3619_v42, %v7382_v4 }
 0x9e7   :  { %v8018_v12 = vmul.f32 %v3619_v42, %v7402_v47  ;;  %v8021_v38 = vmul.f32 %v3623_v39, %v9694_v36  ;;  %v8024_v61 = vmul.f32 %v3623_v39, %v9696_v0  ;;  %v8027_v30 = vmul.f32 %v3623_v39, %v9698_v53 }
 0x9e8   :  { %v8030_v34 = vmul.f32 %v3623_v39, %v9700_v60  ;;  %v8033_v46 = vmul.f32 %v3623_v39, %v7297_v13  ;;  %v8036_v4 = vmul.f32 %v3623_v39, %v7404_v56  ;;  %v8039_v47 = vmul.f32 %v3623_v39, %v7418_v24 }
 0x9e9   :  { %v8042_v51 = vmul.f32 %v3623_v39, %v7506_v31  ;;  %v8045_v36 = vmul.f32 %v3627_v59, %v9706_v25  ;;  %v8048_v0 = vmul.f32 %v3627_v59, %v9708_v40  ;;  %v8051_v53 = vmul.f32 %v3627_v59, %v9710_v17 }
 0x9ea   :  { %v8054_v13 = vmul.f32 %v3627_v59, %v7380_v57  ;;  %v8057_v56 = vmul.f32 %v3627_v59, %v7398_v11  ;;  %v8060_v24 = vmul.f32 %v3627_v59, %v7410_v27  ;;  %v8063_v31 = vmul.f32 %v3627_v59, %v7445_v15 }
 0x9eb   :  { %v8066_v60 = vmul.f32 %v3627_v59, %v7582_v20  ;;  %v8069_v40 = vmul.f32 %v3631_v35, %v9717_v3  ;;  %v8072_v17 = vmul.f32 %v3631_v35, %v9719_v5  ;;  %v8075_v57 = vmul.f32 %v3631_v35, %v9721_v63 }
 0x9ec   :  { %v8078_v11 = vmul.f32 %v3631_v35, %v9723_v54  ;;  %v8081_v27 = vmul.f32 %v3631_v35, %v7358_v45  ;;  %v8084_v15 = vmul.f32 %v3631_v35, %v7386_v28  ;;  %v8087_v20 = vmul.f32 %v3631_v35, %v7406_v16 }
 0x9ed   :  { %v8090_v42 = vmul.f32 %v3631_v35, %v7434_v29  ;;  %v8093_v5 = vmul.f32 %v3635_v32, %v9729_v18  ;;  %v8096_v63 = vmul.f32 %v3635_v32, %v9731_v52  ;;  %v8099_v54 = vmul.f32 %v3635_v32, %v7268_v33  ;;  %v9801_v35 = vld [vmem:[#allocation21_spill] sm:$0xff] }
 0x9ee   :  { %v8102_v45 = vmul.f32 %v3635_v32, %v7334_v2  ;;  %v8105_v28 = vmul.f32 %v3635_v32, %v7376_v6  ;;  %v8108_v16 = vmul.f32 %v3635_v32, %v7396_v26  ;;  %v8111_v29 = vmul.f32 %v3635_v32, %v7416_v44  ;;  %v9788_v26 = vld [vmem:[#allocation25_spill] sm:$0xff]  ;;  %v9789_v44 = vld [vmem:[#allocation91_spill] sm:$0xff] }
 0x9ef   :  { %v8114_v3 = vmul.f32 %v3635_v32, %v7666_v50  ;;  %v8117_v52 = vmul.f32 %v3639_v37, %v7378_v23  ;;  %v8120_v33 = vmul.f32 %v3639_v37, %v9740_v22  ;;  %v8123_v2 = vmul.f32 %v3639_v37, %v7305_v62  ;;  %v9791_v50 = vld [vmem:[#allocation17_spill] sm:$0xff]  ;;  %v9793_v23 = vld [vmem:[#allocation111_spill] sm:$0xff]  ;;  %v9795_v22 = vld [vmem:[#allocation46_spill] sm:$0xff] }
 0x9f0   :  { %9781 = vst [vmem:[#allocation157_spill] sm:$0xff] %v8102_v45  ;;  %9782 = vst [vmem:[#allocation158_spill] sm:$0xff] %v8108_v16  ;;  %v8126_v6 = vmul.f32 %v3639_v37, %v9743_v48  ;;  %v8129_v25 = vmul.f32 %v3639_v37, %v9788_v26  ;;  %v8132_v18 = vmul.f32 %v3639_v37, %v9789_v44  ;;  %v9797_v62 = vld [vmem:[#allocation76_spill] sm:$0xff]  ;;  %v9799_v48 = vld [vmem:[#allocation43_spill] sm:$0xff] }
 0x9f1   :  { %9783 = vst [vmem:[#allocation159_spill] sm:$0xff] %v8111_v29  ;;  %9784 = vst [vmem:[#allocation160_spill] sm:$0xff] %v8114_v3  ;;  %v8135_v32 = vmul.f32 %v3639_v37, %v9791_v50  ;;  %v8138_v14 = vmul.f32 %v3639_v37, %v9793_v23  ;;  %v8141_v7 = vmul.f32 %v3643_v21, %v9795_v22  ;;  %v9803_v44 = vld [vmem:[#allocation101_spill] sm:$0xff]  ;;  %v9805_v50 = vld [vmem:[#allocation31_spill] sm:$0xff] }
 0x9f2   :  { %9785 = vst [vmem:[#allocation161_spill] sm:$0xff] %v8117_v52  ;;  %9786 = vst [vmem:[#allocation162_spill] sm:$0xff] %v8120_v33  ;;  %v8144_v39 = vmul.f32 %v3643_v21, %v9797_v62  ;;  %v8147_v59 = vmul.f32 %v3643_v21, %v9799_v48  ;;  %v8150_v26 = vmul.f32 %v3643_v21, %v9801_v35  ;;  %v9807_v37 = vld [vmem:[#allocation103_spill] sm:$0xff]  ;;  %v9809_v22 = vld [vmem:[#allocation114_spill] sm:$0xff] }
 0x9f3   :  { %9787 = vst [vmem:[#allocation163_spill] sm:$0xff] %v8123_v2  ;;  %9790 = vst [vmem:[#allocation25_spill] sm:$0xff] %v8132_v18  ;;  %v8153_v18 = vmul.f32 %v3643_v21, %v9803_v44  ;;  %v8159_v23 = vmul.f32 %v3643_v21, %v9807_v37  ;;  %v9810_v62 = vld [vmem:[#allocation70_spill] sm:$0xff]  ;;  %v9815_v44 = vld [vmem:[#allocation32_spill] sm:$0xff]  ;;  %v8180_v37 = vmul.f32 %v3647_v19, %v9775_v9  ;;  %v9833_v9 = vsub.f32 1.0, %v7996_v49 }
 0x9f4   :  { %9792 = vst [vmem:[#allocation91_spill] sm:$0xff] %v8135_v32  ;;  %9794 = vst [vmem:[#allocation17_spill] sm:$0xff] %v8138_v14  ;;  %v8156_v32 = vmul.f32 %v3643_v21, %v9805_v50  ;;  %v9811_v48 = vld [vmem:[#allocation78_spill] sm:$0xff]  ;;  %v9816_v50 = vld [vmem:[#allocation15_spill] sm:$0xff]  ;;  %v9841_v49 = vsub.f32 1.0, %v8011_v43  ;;  %v9849_v43 = vsub.f32 1.0, %v8024_v61 }
 0x9f5   :  { %9796 = vst [vmem:[#allocation111_spill] sm:$0xff] %v8141_v7  ;;  %9798 = vst [vmem:[#allocation46_spill] sm:$0xff] %v8144_v39  ;;  %v8162_v7 = vmul.f32 %v3643_v21, %v9809_v22  ;;  %v8165_v39 = vmul.f32 %v3647_v19, %v9810_v62  ;;  %v9813_v35 = vld [vmem:[#allocation22_spill] sm:$0xff]  ;;  %v9818_v21 = vld [vmem:[#allocation105_spill] sm:$0xff]  ;;  %v8186_v62 = vmul.f32 %v3647_v19, %v9779_v8  ;;  %v9835_v8 = vsub.f32 1.0, %v8002_v55 }
 0x9f6   :  { %9800 = vst [vmem:[#allocation76_spill] sm:$0xff] %v8147_v59  ;;  %9802 = vst [vmem:[#allocation43_spill] sm:$0xff] %v8150_v26  ;;  %v8168_v59 = vmul.f32 %v3647_v19, %v9811_v48  ;;  %v8171_v26 = vmul.f32 %v3647_v19, %v9813_v35  ;;  %v8183_v22 = vmul.f32 %v3647_v19, %v9818_v21  ;;  %v9834_v21 = vld [vmem:[#allocation35_spill] sm:$0xff]  ;;  %v9837_v35 = vsub.f32 1.0, %v8005_v10 }
 0x9f7   :  { %9804 = vst [vmem:[#allocation21_spill] sm:$0xff] %v8153_v18  ;;  %9806 = vst [vmem:[#allocation101_spill] sm:$0xff] %v8156_v32  ;;  %v8174_v18 = vmul.f32 %v3647_v19, %v9815_v44  ;;  %v8177_v32 = vmul.f32 %v3647_v19, %v9816_v50  ;;  %v9831_v50 = vsub.f32 1.0, %v7993_v58  ;;  %v9839_v58 = vsub.f32 1.0, %v8008_v41  ;;  %v9840_v44 = vld [vmem:[#allocation34_spill] sm:$0xff] }
 0x9f8   :  { %9808 = vst [vmem:[#allocation31_spill] sm:$0xff] %v8159_v23  ;;  %9812 = vst [vmem:[#allocation103_spill] sm:$0xff] %v8168_v59  ;;  %v9828_v14 = vmov %v8171_v26  ;;  %v9832_v23 = vld [vmem:[#allocation73_spill] sm:$0xff]  ;;  %v8260_v59 = vmul.f32 %v9834_v21, %v9833_v9  ;;  %v9843_v55 = vsub.f32 1.0, %v8015_v1  ;;  %v9844_v21 = vld [vmem:[#allocation71_spill] sm:$0xff]  ;;  %v9845_v10 = vsub.f32 1.0, %v8018_v12 }
 0x9f9   :  { %9814 = vst [vmem:[#allocation114_spill] sm:$0xff] %v8171_v26  ;;  %9817 = vst [vmem:[#allocation70_spill] sm:$0xff] %v8177_v32  ;;  %v9829_v29 = vmov %v8177_v32  ;;  %v8255_v32 = vmul.f32 %v9832_v23, %v9831_v50  ;;  %v9838_v26 = vld [vmem:[#allocation65_spill] sm:$0xff]  ;;  %v8275_v23 = vmul.f32 %v9840_v44, %v9839_v58  ;;  %v9847_v41 = vsub.f32 1.0, %v8021_v38  ;;  %v9850_v58 = vld [vmem:[#allocation42_spill] sm:$0xff] }
 0x9fa   :  { %9819 = vst [vmem:[#allocation78_spill] sm:$0xff] %v8183_v22  ;;  %v9820_v48 = vld [vmem:[#allocation25_spill] sm:$0xff]  ;;  %v8270_v52 = vmul.f32 %v9838_v26, %v9837_v35  ;;  %v9848_v35 = vld [vmem:[#allocation67_spill] sm:$0xff]  ;;  %v9851_v1 = vsub.f32 1.0, %v8027_v30  ;;  %v9853_v12 = vsub.f32 1.0, %v8030_v34  ;;  %v9855_v38 = vsub.f32 1.0, %v8033_v46 }
 0x9fb   :  { %v9821_v45 = vld [vmem:[#allocation91_spill] sm:$0xff]  ;;  %v9836_v22 = vld [vmem:[#allocation41_spill] sm:$0xff]  ;;  %v8295_v44 = vmul.f32 %v9848_v35, %v9847_v41  ;;  %v9857_v61 = vsub.f32 1.0, %v8036_v4  ;;  %v9859_v30 = vsub.f32 1.0, %v8039_v47  ;;  %v9861_v34 = vsub.f32 1.0, %v8042_v51 }
 0x9fc   :  { %v9822_v16 = vld [vmem:[#allocation111_spill] sm:$0xff]  ;;  %v8265_v19 = vmul.f32 %v9836_v22, %v9835_v8  ;;  %v9842_v50 = vld [vmem:[#allocation89_spill] sm:$0xff]  ;;  %v8285_v22 = vmul.f32 %v9844_v21, %v9843_v55  ;;  %v9854_v21 = vld [vmem:[#allocation36_spill] sm:$0xff]  ;;  %v9863_v46 = vsub.f32 1.0, %v8045_v36  ;;  %v9865_v4 = vsub.f32 1.0, %v8048_v0 }
 0x9fd   :  { %v9824_v3 = vld [vmem:[#allocation76_spill] sm:$0xff]  ;;  %v8280_v9 = vmul.f32 %v9842_v50, %v9841_v49  ;;  %v9846_v8 = vld [vmem:[#allocation99_spill] sm:$0xff]  ;;  %v8300_v49 = vmul.f32 %v9850_v58, %v9849_v43  ;;  %v9860_v58 = vld [vmem:[#allocation33_spill] sm:$0xff]  ;;  %v9867_v47 = vsub.f32 1.0, %v8051_v53  ;;  %v9869_v51 = vsub.f32 1.0, %v8054_v13 }
 0x9fe   :  { %v9826_v33 = vld [vmem:[#allocation21_spill] sm:$0xff]  ;;  %v8290_v26 = vmul.f32 %v9846_v8, %v9845_v10  ;;  %v9852_v50 = vld [vmem:[#allocation40_spill] sm:$0xff]  ;;  %v8310_v10 = vmul.f32 %v9854_v21, %v9853_v12  ;;  %v9856_v8 = vld [vmem:[#allocation59_spill] sm:$0xff]  ;;  %v9871_v36 = vsub.f32 1.0, %v8057_v56  ;;  %v9873_v0 = vsub.f32 1.0, %v8060_v24 }
 0x9ff   :  { %v9827_v2 = vld [vmem:[#allocation101_spill] sm:$0xff]  ;;  %v8305_v55 = vmul.f32 %v9852_v50, %v9851_v1  ;;  %v8315_v41 = vmul.f32 %v9856_v8, %v9855_v38  ;;  %v9858_v35 = vld [vmem:[#allocation95_spill] sm:$0xff]  ;;  %v8325_v1 = vmul.f32 %v9860_v58, %v9859_v30  ;;  %v9866_v8 = vld [vmem:[#allocation86_spill] sm:$0xff]  ;;  %v9875_v53 = vsub.f32 1.0, %v8063_v31 }
 0xa00   :  { %v8320_v43 = vmul.f32 %v9858_v35, %v9857_v61  ;;  %v9862_v50 = vld [vmem:[#allocation53_spill] sm:$0xff]  ;;  %v9864_v21 = vld [vmem:[#allocation87_spill] sm:$0xff]  ;;  %v8340_v61 = vmul.f32 %v9866_v8, %v9865_v4  ;;  %v9870_v58 = vld [vmem:[#allocation30_spill] sm:$0xff]  ;;  %v9877_v13 = vsub.f32 1.0, %v8066_v60  ;;  %v9879_v56 = vsub.f32 1.0, %v8069_v40 }
 0xa01   :  { %v8330_v12 = vmul.f32 %v9862_v50, %v9861_v34  ;;  %v8335_v38 = vmul.f32 %v9864_v21, %v9863_v46  ;;  %v9868_v35 = vld [vmem:[#allocation37_spill] sm:$0xff]  ;;  %v8350_v34 = vmul.f32 %v9870_v58, %v9869_v51  ;;  %v9872_v50 = vld [vmem:[#allocation74_spill] sm:$0xff]  ;;  %v4668_v58 = vld [vmem:[#allocation2 + $0xc0] sm:$0xff]  ;;  %v9880_v24 = vsub.f32 1.0, %v8072_v17 }
 0xa02   :  { %v8345_v30 = vmul.f32 %v9868_v35, %v9867_v47  ;;  %v8355_v46 = vmul.f32 %v9872_v50, %v9871_v36  ;;  %v9874_v21 = vld [vmem:[#allocation54_spill] sm:$0xff]  ;;  %v9876_v8 = vld [vmem:[#allocation29_spill] sm:$0xff]  ;;  %v9878_v35 = vld [vmem:[#allocation28_spill] sm:$0xff]  ;;  %v8374_v36 = vmul.f32 %v4668_v58, %v9879_v56  ;;  %v9881_v31 = vsub.f32 1.0, %v8075_v57 }
 0xa03   :  { %v8360_v4 = vmul.f32 %v9874_v21, %v9873_v0  ;;  %v8365_v47 = vmul.f32 %v9876_v8, %v9875_v53  ;;  %v8370_v51 = vmul.f32 %v9878_v35, %v9877_v13  ;;  %v4669_v50 = vld [vmem:[#allocation2 + $0xc8] sm:$0xff]  ;;  %v9883_v60 = vsub.f32 1.0, %v8078_v11  ;;  %v9884_v8 = vld [vmem:[#allocation52_spill] sm:$0xff] }
 0xa04   :  { %v8378_v0 = vmul.f32 %v4669_v50, %v9880_v24  ;;  %v9882_v21 = vld [vmem:[#allocation85_spill] sm:$0xff]  ;;  %v9885_v35 = vsub.f32 1.0, %v8081_v27  ;;  %v9887_v56 = vsub.f32 1.0, %v8084_v15  ;;  %v9889_v57 = vsub.f32 1.0, %v8087_v20  ;;  %v9890_v24 = vld [vmem:[#allocation18_spill] sm:$0xff] }
 0xa05   :  { %v8383_v53 = vmul.f32 %v9882_v21, %v9881_v31  ;;  %v8388_v13 = vmul.f32 %v9884_v8, %v9883_v60  ;;  %v9886_v40 = vld [vmem:[#allocation45_spill] sm:$0xff]  ;;  %v9892_v11 = vsub.f32 1.0, %v8090_v42  ;;  %v9893_v21 = vld [vmem:[#allocation50_spill] sm:$0xff]  ;;  %v9894_v27 = vsub.f32 1.0, %v8093_v5 }
 0xa06   :  { %v8393_v58 = vmul.f32 %v9886_v40, %v9885_v35  ;;  %v9888_v17 = vld [vmem:[#allocation77_spill] sm:$0xff]  ;;  %v8403_v31 = vmul.f32 %v9890_v24, %v9889_v57  ;;  %v9895_v8 = vld [vmem:[#allocation82_spill] sm:$0xff]  ;;  %v9897_v15 = vsub.f32 1.0, %v8096_v63  ;;  %v9898_v40 = vld [vmem:[#allocation63_spill] sm:$0xff]  ;;  %v9900_v20 = vsub.f32 1.0, %v8099_v54 }
 0xa07   :  { %v8398_v50 = vmul.f32 %v9888_v17, %v9887_v56  ;;  %v8408_v60 = vmul.f32 %v9893_v21, %v9892_v11  ;;  %v8413_v35 = vmul.f32 %v9895_v8, %v9894_v27  ;;  %v9901_v17 = vld [vmem:[#allocation68_spill] sm:$0xff]  ;;  %v9903_v24 = vld [vmem:[#allocation157_spill] sm:$0xff]  ;;  %v9907_v5 = vsub.f32 1.0, %v8105_v28  ;;  %v9910_v8 = vld [vmem:[#allocation158_spill] sm:$0xff] }
 0xa08   :  { %9891 = vst [vmem:[#allocation22_spill] sm:$0xff] %v8403_v31  ;;  %v8418_v56 = vmul.f32 %v9898_v40, %v9897_v15  ;;  %v8423_v57 = vmul.f32 %v9901_v17, %v9900_v20  ;;  %v9904_v42 = vsub.f32 1.0, %v9903_v24  ;;  %v9905_v31 = vld [vmem:[#allocation90_spill] sm:$0xff]  ;;  %v9908_v21 = vld [vmem:[#allocation96_spill] sm:$0xff]  ;;  %v9911_v63 = vsub.f32 1.0, %v9910_v8  ;;  %v9914_v40 = vld [vmem:[#allocation159_spill] sm:$0xff] }
 0xa09   :  { %9896 = vst [vmem:[#allocation32_spill] sm:$0xff] %v8413_v35  ;;  %v8433_v27 = vmul.f32 %v9908_v21, %v9907_v5  ;;  %v9912_v35 = vld [vmem:[#allocation104_spill] sm:$0xff]  ;;  %v9915_v54 = vsub.f32 1.0, %v9914_v40  ;;  %v9923_v21 = vld [vmem:[#allocation162_spill] sm:$0xff] }
 0xa0a   :  { %9899 = vst [vmem:[#allocation15_spill] sm:$0xff] %v8418_v56  ;;  %9902 = vst [vmem:[#allocation105_spill] sm:$0xff] %v8423_v57  ;;  %v8428_v11 = vmul.f32 %v9905_v31, %v9904_v42  ;;  %v8438_v15 = vmul.f32 %v9912_v35, %v9911_v63  ;;  %v9916_v56 = vld [vmem:[#allocation48_spill] sm:$0xff]  ;;  %v9919_v57 = vld [vmem:[#allocation110_spill] sm:$0xff]  ;;  %v9924_v8 = vsub.f32 1.0, %v9923_v21 }
 0xa0b   :  { %9909 = vst [vmem:[#allocation91_spill] sm:$0xff] %v8433_v27  ;;  %v8443_v20 = vmul.f32 %v9916_v56, %v9915_v54  ;;  %v9917_v17 = vld [vmem:[#allocation160_spill] sm:$0xff]  ;;  %v9920_v42 = vld [vmem:[#allocation161_spill] sm:$0xff]  ;;  %v9925_v27 = vld [vmem:[#allocation27_spill] sm:$0xff]  ;;  %v9930_v54 = vsub.f32 1.0, %v8126_v6 }
 0xa0c   :  { %9906 = vst [vmem:[#allocation25_spill] sm:$0xff] %v8428_v11  ;;  %9913 = vst [vmem:[#allocation111_spill] sm:$0xff] %v8438_v15  ;;  %v9918_v24 = vsub.f32 1.0, %v9917_v17  ;;  %v9921_v28 = vsub.f32 1.0, %v9920_v42  ;;  %v9922_v11 = vld [vmem:[#allocation94_spill] sm:$0xff]  ;;  %v8458_v35 = vmul.f32 %v9925_v27, %v9924_v8  ;;  %v9926_v63 = vld [vmem:[#allocation163_spill] sm:$0xff] }
 0xa0d   :  { %v9927_v40 = vsub.f32 1.0, %v9926_v63  ;;  %v9928_v15 = vld [vmem:[#allocation106_spill] sm:$0xff]  ;;  %v9931_v17 = vld [vmem:[#allocation107_spill] sm:$0xff]  ;;  %v9937_v8 = vsub.f32 1.0, %v9821_v45  ;;  %v9938_v63 = vld [vmem:[#allocation109_spill] sm:$0xff]  ;;  %v9949_v45 = vsub.f32 1.0, %v9824_v3 }
 0xa0e   :  { %v8448_v31 = vmul.f32 %v9919_v57, %v9918_v24  ;;  %v8453_v5 = vmul.f32 %v9922_v11, %v9921_v28  ;;  %v8468_v57 = vmul.f32 %v9931_v17, %v9930_v54  ;;  %v9932_v24 = vsub.f32 1.0, %v8129_v25  ;;  %v9933_v42 = vld [vmem:[#allocation58_spill] sm:$0xff]  ;;  %v9936_v21 = vld [vmem:[#allocation51_spill] sm:$0xff] }
 0xa0f   :  { %v8463_v56 = vmul.f32 %v9928_v15, %v9927_v40  ;;  %v9935_v28 = vsub.f32 1.0, %v9820_v48  ;;  %v8483_v15 = vmul.f32 %v9938_v63, %v9937_v8  ;;  %v9940_v40 = vld [vmem:[#allocation17_spill] sm:$0xff]  ;;  %v9943_v25 = vsub.f32 1.0, %v9822_v16  ;;  %v9944_v17 = vld [vmem:[#allocation47_spill] sm:$0xff] }
 0xa10   :  { %v8473_v11 = vmul.f32 %v9933_v42, %v9932_v24  ;;  %v9941_v6 = vsub.f32 1.0, %v9940_v40  ;;  %v9945_v42 = vld [vmem:[#allocation46_spill] sm:$0xff]  ;;  %v9951_v63 = vld [vmem:[#allocation43_spill] sm:$0xff]  ;;  %v9954_v16 = vsub.f32 1.0, %v9826_v33  ;;  %v9964_v33 = vsub.f32 1.0, %v8165_v39  ;;  %v9973_v39 = vld [vmem:[#allocation100_spill] sm:$0xff] }
 0xa11   :  { %9929 = vst [vmem:[#allocation76_spill] sm:$0xff] %v8463_v56  ;;  %v8478_v27 = vmul.f32 %v9936_v21, %v9935_v28  ;;  %9939 = vst [vmem:[#allocation101_spill] sm:$0xff] %v8483_v15  ;;  %v9942_v56 = vld [vmem:[#allocation112_spill] sm:$0xff]  ;;  %v8493_v24 = vmul.f32 %v9944_v17, %v9943_v25  ;;  %v9946_v48 = vsub.f32 1.0, %v9945_v42  ;;  %v9950_v21 = vld [vmem:[#allocation83_spill] sm:$0xff]  ;;  %v9952_v40 = vsub.f32 1.0, %v9951_v63 }
 0xa12   :  { %9934 = vst [vmem:[#allocation21_spill] sm:$0xff] %v8473_v11  ;;  %v8488_v54 = vmul.f32 %v9942_v56, %v9941_v6  ;;  %v9947_v11 = vld [vmem:[#allocation24_spill] sm:$0xff]  ;;  %v8503_v8 = vmul.f32 %v9950_v21, %v9949_v45  ;;  %v9953_v15 = vld [vmem:[#allocation98_spill] sm:$0xff]  ;;  %v9955_v6 = vld [vmem:[#allocation23_spill] sm:$0xff]  ;;  %v9957_v17 = vsub.f32 1.0, %v9827_v2  ;;  %v9962_v21 = vsub.f32 1.0, %v8162_v7 }
 0xa13   :  { %v8498_v28 = vmul.f32 %v9947_v11, %v9946_v48  ;;  %v8508_v56 = vmul.f32 %v9953_v15, %v9952_v40  ;;  %v8513_v25 = vmul.f32 %v9955_v6, %v9954_v16  ;;  %v9958_v42 = vld [vmem:[#allocation108_spill] sm:$0xff]  ;;  %v9959_v48 = vld [vmem:[#allocation31_spill] sm:$0xff]  ;;  %v4671_v6 = vld [vmem:[#allocation2 + $0x1c8] sm:$0xff]  ;;  %v9970_v7 = vsub.f32 1.0, %v8174_v18 }
 0xa14   :  { %v8518_v11 = vmul.f32 %v9958_v42, %v9957_v17  ;;  %v9960_v3 = vsub.f32 1.0, %v9959_v48  ;;  %v9963_v63 = vld [vmem:[#allocation115_spill] sm:$0xff]  ;;  %v4670_v40 = vld [vmem:[#allocation2 + $0x1c0] sm:$0xff]  ;;  %v9968_v42 = vsub.f32 1.0, %v9828_v14  ;;  %v9980_v18 = vsub.f32 1.0, %v8186_v62  ;;  %v9987_v62 = vld [vmem:[#allocation26_spill] sm:$0xff] }
 0xa15   :  { %9948 = vst [vmem:[#allocation114_spill] sm:$0xff] %v8498_v28  ;;  %9956 = vst [vmem:[#allocation70_spill] sm:$0xff] %v8513_v25  ;;  %v9961_v28 = vld [vmem:[#allocation113_spill] sm:$0xff]  ;;  %v8528_v15 = vmul.f32 %v9963_v63, %v9962_v21  ;;  %v8532_v16 = vmul.f32 %v4670_v40, %v9964_v33  ;;  %v9965_v2 = vld [vmem:[#allocation103_spill] sm:$0xff]  ;;  %v9972_v63 = vsub.f32 1.0, %v9829_v29  ;;  %v9974_v33 = vsub.f32 1.0, %v8180_v37 }
 0xa16   :  { %v8523_v45 = vmul.f32 %v9961_v28, %v9960_v3  ;;  %v9966_v25 = vsub.f32 1.0, %v9965_v2  ;;  %v9969_v48 = vld [vmem:[#allocation88_spill] sm:$0xff]  ;;  %v9971_v3 = vld [vmem:[#allocation75_spill] sm:$0xff]  ;;  %v9982_v29 = vld [vmem:[#allocation49_spill] sm:$0xff] }
 0xa17   :  { %v8541_v28 = vmul.f32 %v9969_v48, %v9968_v42  ;;  %v8546_v21 = vmul.f32 %v9971_v3, %v9970_v7  ;;  %v8551_v40 = vmul.f32 %v9973_v39, %v9972_v63  ;;  %v9975_v2 = vld [vmem:[#allocation16_spill] sm:$0xff]  ;;  %v9981_v48 = vld [vmem:[#allocation55_spill] sm:$0xff]  ;;  %v4002_v3 = vadd.f32 %v9982_v29, %v8255_v32  ;;  %v9983_v63 = vld [vmem:[#allocation66_spill] sm:$0xff] }
 0xa18   :  { %v8536_v17 = vmul.f32 %v4671_v6, %v9966_v25  ;;  %v8556_v25 = vmul.f32 %v9975_v2, %v9974_v33  ;;  %v9976_v6 = vld [vmem:[#allocation78_spill] sm:$0xff]  ;;  %v8566_v7 = vmul.f32 %v9981_v48, %v9980_v18  ;;  %v4003_v39 = vadd.f32 %v9983_v63, %v8260_v59  ;;  %v9984_v37 = vld [vmem:[#allocation69_spill] sm:$0xff]  ;;  %v9985_v2 = vld [vmem:[#allocation92_spill] sm:$0xff] }
 0xa19   :  { %v9977_v14 = vsub.f32 1.0, %v9976_v6  ;;  %v4004_v33 = vadd.f32 %v9984_v37, %v8265_v19  ;;  %v4005_v6 = vadd.f32 %v9985_v2, %v8270_v52  ;;  %v9988_v18 = vld [vmem:[#allocation116_spill] sm:$0xff]  ;;  %v9989_v32 = vld [vmem:[#allocation117_spill] sm:$0xff]  ;;  %4066 = vst [vmem:[#allocation6] sm:$0xff] %v4002_v3 }
 0xa1a   :  { %9967 = vst [vmem:[#allocation73_spill] sm:$0xff] %v8536_v17  ;;  %v9978_v17 = vld [vmem:[#allocation44_spill] sm:$0xff]  ;;  %v4008_v48 = vadd.f32 %v9988_v18, %v8285_v22  ;;  %v4009_v29 = vadd.f32 %v9989_v32, %v8290_v26  ;;  %v9990_v59 = vld [vmem:[#allocation97_spill] sm:$0xff]  ;;  %4067 = vst [vmem:[#allocation6 + $0x8] sm:$0xff] %v4003_v39 }
 0xa1b   :  { %v8561_v42 = vmul.f32 %v9978_v17, %v9977_v14  ;;  %v9986_v17 = vld [vmem:[#allocation64_spill] sm:$0xff]  ;;  %v4010_v63 = vadd.f32 %v9990_v59, %v8295_v44  ;;  %4068 = vst [vmem:[#allocation6 + $0x10] sm:$0xff] %v4004_v33  ;;  %4069 = vst [vmem:[#allocation6 + $0x18] sm:$0xff] %v4005_v6  ;;  %v9995_v22 = vld [vmem:[#allocation119_spill] sm:$0xff] }
 0xa1c   :  { %v4006_v14 = vadd.f32 %v9986_v17, %v8275_v23  ;;  %v9991_v19 = vld [vmem:[#allocation72_spill] sm:$0xff]  ;;  %v9993_v23 = vld [vmem:[#allocation39_spill] sm:$0xff]  ;;  %v4015_v26 = vadd.f32 %v9995_v22, %v8320_v43  ;;  %4072 = vst [vmem:[#allocation6 + $0x30] sm:$0xff] %v4008_v48  ;;  %4073 = vst [vmem:[#allocation6 + $0x38] sm:$0xff] %v4009_v29 }
 0xa1d   :  { %9979 = vst [vmem:[#allocation35_spill] sm:$0xff] %v8561_v42  ;;  %v4007_v42 = vadd.f32 %v9987_v62, %v8280_v9  ;;  %v4011_v37 = vadd.f32 %v9991_v19, %v8300_v49  ;;  %v9992_v52 = vld [vmem:[#allocation60_spill] sm:$0xff]  ;;  %v4013_v17 = vadd.f32 %v9993_v23, %v8310_v10  ;;  %v9994_v9 = vld [vmem:[#allocation118_spill] sm:$0xff]  ;;  %v9997_v49 = vld [vmem:[#allocation121_spill] sm:$0xff] }
 0xa1e   :  { %v4012_v2 = vadd.f32 %v9992_v52, %v8305_v55  ;;  %v4014_v62 = vadd.f32 %v9994_v9, %v8315_v41  ;;  %4070 = vst [vmem:[#allocation6 + $0x20] sm:$0xff] %v4006_v14  ;;  %v9996_v44 = vld [vmem:[#allocation120_spill] sm:$0xff]  ;;  %v4017_v18 = vadd.f32 %v9997_v49, %v8330_v12  ;;  %v9998_v55 = vld [vmem:[#allocation38_spill] sm:$0xff]  ;;  %4074 = vst [vmem:[#allocation6 + $0x40] sm:$0xff] %v4010_v63 }
 0xa1f   :  { %v4016_v3 = vadd.f32 %v9996_v44, %v8325_v1  ;;  %v4018_v32 = vadd.f32 %v9998_v55, %v8335_v38  ;;  %4071 = vst [vmem:[#allocation6 + $0x28] sm:$0xff] %v4007_v42  ;;  %v9999_v10 = vld [vmem:[#allocation61_spill] sm:$0xff]  ;;  %v10000_v39 = vld [vmem:[#allocation84_spill] sm:$0xff]  ;;  %v10001_v43 = vld [vmem:[#allocation122_spill] sm:$0xff] }
 0xa20   :  { %v4019_v41 = vadd.f32 %v9999_v10, %v8340_v61  ;;  %v4020_v33 = vadd.f32 %v10000_v39, %v8345_v30  ;;  %v4021_v6 = vadd.f32 %v10001_v43, %v8350_v34  ;;  %v10002_v1 = vld [vmem:[#allocation123_spill] sm:$0xff]  ;;  %4075 = vst [vmem:[#allocation6 + $0x48] sm:$0xff] %v4011_v37  ;;  %4076 = vst [vmem:[#allocation6 + $0x50] sm:$0xff] %v4012_v2  ;;  %v10003_v12 = vld [vmem:[#allocation124_spill] sm:$0xff] }
 0xa21   :  { %v4022_v14 = vadd.f32 %v10002_v1, %v8355_v46  ;;  %4077 = vst [vmem:[#allocation6 + $0x58] sm:$0xff] %v4013_v17  ;;  %4078 = vst [vmem:[#allocation6 + $0x60] sm:$0xff] %v4014_v62  ;;  %v4023_v38 = vadd.f32 %v10003_v12, %v8360_v4  ;;  %v10004_v42 = vld [vmem:[#allocation125_spill] sm:$0xff]  ;;  %v10005_v61 = vld [vmem:[#allocation126_spill] sm:$0xff] }
 0xa22   :  { %v4024_v48 = vadd.f32 %v10004_v42, %v8365_v47  ;;  %v4025_v29 = vadd.f32 %v10005_v61, %v8370_v51  ;;  %v10006_v30 = vld [vmem:[#allocation81_spill] sm:$0xff]  ;;  %4079 = vst [vmem:[#allocation6 + $0x68] sm:$0xff] %v4015_v26  ;;  %4080 = vst [vmem:[#allocation6 + $0x70] sm:$0xff] %v4016_v3  ;;  %v10008_v63 = vld [vmem:[#allocation79_spill] sm:$0xff] }
 0xa23   :  { %v4026_v59 = vadd.f32 %v10006_v30, %v8374_v36  ;;  %4081 = vst [vmem:[#allocation6 + $0x78] sm:$0xff] %v4017_v18  ;;  %4082 = vst [vmem:[#allocation6 + $0x80] sm:$0xff] %v4018_v32  ;;  %v10007_v34 = vld [vmem:[#allocation57_spill] sm:$0xff]  ;;  %v4028_v19 = vadd.f32 %v10008_v63, %v8383_v53  ;;  %v10009_v4 = vld [vmem:[#allocation19_spill] sm:$0xff] }
 0xa24   :  { %v4027_v46 = vadd.f32 %v10007_v34, %v8378_v0  ;;  %v4029_v37 = vadd.f32 %v10009_v4, %v8388_v13  ;;  %v10010_v47 = vld [vmem:[#allocation127_spill] sm:$0xff]  ;;  %4083 = vst [vmem:[#allocation6 + $0x88] sm:$0xff] %v4019_v41  ;;  %4084 = vst [vmem:[#allocation6 + $0x90] sm:$0xff] %v4020_v33  ;;  %v10011_v51 = vld [vmem:[#allocation128_spill] sm:$0xff] }
 0xa25   :  { %v4030_v52 = vadd.f32 %v10010_v47, %v8393_v58  ;;  %4085 = vst [vmem:[#allocation6 + $0x98] sm:$0xff] %v4021_v6  ;;  %4086 = vst [vmem:[#allocation6 + $0xa0] sm:$0xff] %v4022_v14  ;;  %v4031_v36 = vadd.f32 %v10011_v51, %v8398_v50  ;;  %v10012_v2 = vld [vmem:[#allocation22_spill] sm:$0xff]  ;;  %v10013_v23 = vld [vmem:[#allocation129_spill] sm:$0xff] }
 0xa26   :  { %v4032_v17 = vadd.f32 %v10013_v23, %v10012_v2  ;;  %v10014_v0 = vld [vmem:[#allocation130_spill] sm:$0xff]  ;;  %v10015_v53 = vld [vmem:[#allocation32_spill] sm:$0xff]  ;;  %4087 = vst [vmem:[#allocation6 + $0xa8] sm:$0xff] %v4023_v38  ;;  %4088 = vst [vmem:[#allocation6 + $0xb0] sm:$0xff] %v4024_v48 }
 0xa27   :  { %v4033_v9 = vadd.f32 %v10014_v0, %v8408_v60  ;;  %v10016_v62 = vld [vmem:[#allocation62_spill] sm:$0xff]  ;;  %4089 = vst [vmem:[#allocation6 + $0xb8] sm:$0xff] %v4025_v29  ;;  %4090 = vst [vmem:[#allocation6 + $0xc0] sm:$0xff] %v4026_v59  ;;  %v10017_v13 = vld [vmem:[#allocation15_spill] sm:$0xff] }
 0xa28   :  { %v4034_v22 = vadd.f32 %v10016_v62, %v10015_v53  ;;  %v10018_v58 = vld [vmem:[#allocation56_spill] sm:$0xff]  ;;  %v10019_v44 = vld [vmem:[#allocation105_spill] sm:$0xff]  ;;  %v10020_v3 = vld [vmem:[#allocation131_spill] sm:$0xff]  ;;  %4091 = vst [vmem:[#allocation6 + $0xc8] sm:$0xff] %v4027_v46 }
 0xa29   :  { %v4035_v26 = vadd.f32 %v10018_v58, %v10017_v13  ;;  %v4036_v49 = vadd.f32 %v10020_v3, %v10019_v44  ;;  %v10021_v50 = vld [vmem:[#allocation25_spill] sm:$0xff]  ;;  %v10022_v18 = vld [vmem:[#allocation132_spill] sm:$0xff]  ;;  %v10023_v32 = vld [vmem:[#allocation91_spill] sm:$0xff]  ;;  %4092 = vst [vmem:[#allocation6 + $0xd0] sm:$0xff] %v4028_v19 }
 0xa2a   :  { %v4037_v55 = vadd.f32 %v10022_v18, %v10021_v50  ;;  %v10024_v10 = vld [vmem:[#allocation133_spill] sm:$0xff]  ;;  %4093 = vst [vmem:[#allocation6 + $0xd8] sm:$0xff] %v4029_v37  ;;  %4094 = vst [vmem:[#allocation6 + $0xe0] sm:$0xff] %v4030_v52  ;;  %v10025_v60 = vld [vmem:[#allocation111_spill] sm:$0xff] }
 0xa2b   :  { %v4038_v41 = vadd.f32 %v10024_v10, %v10023_v32  ;;  %v10026_v39 = vld [vmem:[#allocation134_spill] sm:$0xff]  ;;  %v10027_v43 = vld [vmem:[#allocation135_spill] sm:$0xff]  ;;  %v10028_v1 = vld [vmem:[#allocation136_spill] sm:$0xff]  ;;  %4095 = vst [vmem:[#allocation6 + $0xe8] sm:$0xff] %v4031_v36 }
 0xa2c   :  { %v4039_v33 = vadd.f32 %v10026_v39, %v10025_v60  ;;  %v4040_v6 = vadd.f32 %v10027_v43, %v8443_v20  ;;  %v4041_v14 = vadd.f32 %v10028_v1, %v8448_v31  ;;  %v10029_v12 = vld [vmem:[#allocation137_spill] sm:$0xff]  ;;  %4096 = vst [vmem:[#allocation6 + $0xf0] sm:$0xff] %v4032_v17  ;;  %4097 = vst [vmem:[#allocation6 + $0xf8] sm:$0xff] %v4033_v9  ;;  %v10030_v42 = vld [vmem:[#allocation80_spill] sm:$0xff] }
 0xa2d   :  { %v4042_v38 = vadd.f32 %v10029_v12, %v8453_v5  ;;  %4098 = vst [vmem:[#allocation6 + $0x100] sm:$0xff] %v4034_v22  ;;  %v4043_v48 = vadd.f32 %v10030_v42, %v8458_v35  ;;  %v10031_v61 = vld [vmem:[#allocation76_spill] sm:$0xff]  ;;  %v10032_v29 = vld [vmem:[#allocation138_spill] sm:$0xff]  ;;  %v10033_v59 = vld [vmem:[#allocation93_spill] sm:$0xff] }
 0xa2e   :  { %v4044_v30 = vadd.f32 %v10032_v29, %v10031_v61  ;;  %v4045_v34 = vadd.f32 %v10033_v59, %v8468_v57  ;;  %v10034_v20 = vld [vmem:[#allocation21_spill] sm:$0xff]  ;;  %v10035_v46 = vld [vmem:[#allocation139_spill] sm:$0xff]  ;;  %4099 = vst [vmem:[#allocation6 + $0x108] sm:$0xff] %v4035_v26  ;;  %4100 = vst [vmem:[#allocation6 + $0x110] sm:$0xff] %v4036_v49 }
 0xa2f   :  { %v4046_v63 = vadd.f32 %v10035_v46, %v10034_v20  ;;  %4101 = vst [vmem:[#allocation6 + $0x118] sm:$0xff] %v4037_v55  ;;  %4102 = vst [vmem:[#allocation6 + $0x120] sm:$0xff] %v4038_v41  ;;  %v10036_v31 = vld [vmem:[#allocation140_spill] sm:$0xff]  ;;  %v10037_v19 = vld [vmem:[#allocation101_spill] sm:$0xff] }
 0xa30   :  { %v4047_v5 = vadd.f32 %v10036_v31, %v8478_v27  ;;  %v10038_v4 = vld [vmem:[#allocation141_spill] sm:$0xff]  ;;  %v10039_v35 = vld [vmem:[#allocation142_spill] sm:$0xff]  ;;  %v10040_v52 = vld [vmem:[#allocation143_spill] sm:$0xff]  ;;  %4103 = vst [vmem:[#allocation6 + $0x128] sm:$0xff] %v4039_v33 }
 0xa31   :  { %v4048_v37 = vadd.f32 %v10038_v4, %v10037_v19  ;;  %v4049_v47 = vadd.f32 %v10039_v35, %v8488_v54  ;;  %v4050_v51 = vadd.f32 %v10040_v52, %v8493_v24  ;;  %4104 = vst [vmem:[#allocation6 + $0x130] sm:$0xff] %v4040_v6  ;;  %4105 = vst [vmem:[#allocation6 + $0x138] sm:$0xff] %v4041_v14  ;;  %v10041_v57 = vld [vmem:[#allocation114_spill] sm:$0xff]  ;;  %v10042_v36 = vld [vmem:[#allocation144_spill] sm:$0xff] }
 0xa32   :  { %4106 = vst [vmem:[#allocation6 + $0x140] sm:$0xff] %v4042_v38  ;;  %v4051_v2 = vadd.f32 %v10042_v36, %v10041_v57  ;;  %v10043_v23 = vld [vmem:[#allocation145_spill] sm:$0xff]  ;;  %v10044_v27 = vld [vmem:[#allocation146_spill] sm:$0xff]  ;;  %v10046_v53 = vld [vmem:[#allocation147_spill] sm:$0xff] }
 0xa33   :  { %v4052_v17 = vadd.f32 %v10043_v23, %v8503_v8  ;;  %v4053_v0 = vadd.f32 %v10044_v27, %v8508_v56  ;;  %v10045_v9 = vld [vmem:[#allocation70_spill] sm:$0xff]  ;;  %4107 = vst [vmem:[#allocation6 + $0x148] sm:$0xff] %v4043_v48  ;;  %4108 = vst [vmem:[#allocation6 + $0x150] sm:$0xff] %v4044_v30  ;;  %v10047_v54 = vld [vmem:[#allocation148_spill] sm:$0xff] }
 0xa34   :  { %v4054_v62 = vadd.f32 %v10046_v53, %v10045_v9  ;;  %4109 = vst [vmem:[#allocation6 + $0x158] sm:$0xff] %v4045_v34  ;;  %4110 = vst [vmem:[#allocation6 + $0x160] sm:$0xff] %v4046_v63  ;;  %v4055_v24 = vadd.f32 %v10047_v54, %v8518_v11  ;;  %v10048_v22 = vld [vmem:[#allocation149_spill] sm:$0xff]  ;;  %v10049_v8 = vld [vmem:[#allocation150_spill] sm:$0xff] }
 0xa35   :  { %v4056_v13 = vadd.f32 %v10048_v22, %v8523_v45  ;;  %v4057_v58 = vadd.f32 %v10049_v8, %v8528_v15  ;;  %v10050_v56 = vld [vmem:[#allocation151_spill] sm:$0xff]  ;;  %4111 = vst [vmem:[#allocation6 + $0x168] sm:$0xff] %v4047_v5  ;;  %4112 = vst [vmem:[#allocation6 + $0x170] sm:$0xff] %v4048_v37  ;;  %v10051_v44 = vld [vmem:[#allocation73_spill] sm:$0xff] }
 0xa36   :  { %v4058_v26 = vadd.f32 %v10050_v56, %v8532_v16  ;;  %4113 = vst [vmem:[#allocation6 + $0x178] sm:$0xff] %v4049_v47  ;;  %4114 = vst [vmem:[#allocation6 + $0x180] sm:$0xff] %v4050_v51  ;;  %v10052_v3 = vld [vmem:[#allocation152_spill] sm:$0xff]  ;;  %v10053_v11 = vld [vmem:[#allocation153_spill] sm:$0xff] }
 0xa37   :  { %v4059_v49 = vadd.f32 %v10052_v3, %v10051_v44  ;;  %v4060_v50 = vadd.f32 %v10053_v11, %v8541_v28  ;;  %v10054_v45 = vld [vmem:[#allocation154_spill] sm:$0xff]  ;;  %v10055_v15 = vld [vmem:[#allocation155_spill] sm:$0xff]  ;;  %4115 = vst [vmem:[#allocation6 + $0x188] sm:$0xff] %v4051_v2  ;;  %4116 = vst [vmem:[#allocation6 + $0x190] sm:$0xff] %v4052_v17 }
 0xa38   :  { %v4061_v18 = vadd.f32 %v10054_v45, %v8546_v21  ;;  %v4062_v55 = vadd.f32 %v10055_v15, %v8551_v40  ;;  %4117 = vst [vmem:[#allocation6 + $0x198] sm:$0xff] %v4053_v0  ;;  %4118 = vst [vmem:[#allocation6 + $0x1a0] sm:$0xff] %v4054_v62  ;;  %v10056_v16 = vld [vmem:[#allocation20_spill] sm:$0xff]  ;;  %v10057_v10 = vld [vmem:[#allocation35_spill] sm:$0xff] }
 0xa39   :  { %v4063_v32 = vadd.f32 %v10056_v16, %v8556_v25  ;;  %v10058_v41 = vld [vmem:[#allocation156_spill] sm:$0xff]  ;;  %v10059_v39 = vld [vmem:[#allocation102_spill] sm:$0xff]  ;;  %4119 = vst [vmem:[#allocation6 + $0x1a8] sm:$0xff] %v4055_v24  ;;  %4120 = vst [vmem:[#allocation6 + $0x1b0] sm:$0xff] %v4056_v13 }
 0xa3a   :  { %v4064_v60 = vadd.f32 %v10058_v41, %v10057_v10  ;;  %v4065_v33 = vadd.f32 %v10059_v39, %v8566_v7  ;;  %4121 = vst [vmem:[#allocation6 + $0x1b8] sm:$0xff] %v4057_v58  ;;  %4122 = vst [vmem:[#allocation6 + $0x1c0] sm:$0xff] %v4058_v26 }
 0xa3b   :  { %4123 = vst [vmem:[#allocation6 + $0x1c8] sm:$0xff] %v4059_v49  ;;  %4124 = vst [vmem:[#allocation6 + $0x1d0] sm:$0xff] %v4060_v50 }
 0xa3c   :  { %4125 = vst [vmem:[#allocation6 + $0x1d8] sm:$0xff] %v4061_v18  ;;  %4126 = vst [vmem:[#allocation6 + $0x1e0] sm:$0xff] %v4062_v55 }
 0xa3d   :  { %4127 = vst [vmem:[#allocation6 + $0x1e8] sm:$0xff] %v4063_v32  ;;  %4128 = vst [vmem:[#allocation6 + $0x1f0] sm:$0xff] %v4064_v60 }
 0xa3e   :  { %4129 = vst [vmem:[#allocation6 + $0x1f8] sm:$0xff] %v4065_v33 }
 0xa3f   :  { %4749 = shalt.err (!%p4746_p0)
}
 0xa40   :  { %s4750_s5 = scalar_lea.hbm %s8739_s9, 8192 }
 0xa41   :  { %p4751_p1 = scmp.ne.s32.totalorder %s8739_s9, %s4750_s5  ;;  %p4754_p2 = scmp.lt.u32.totalorder %s4750_s5, %s8739_s9 }
 0xa43   :  { %p4756_p3 = pnand %p4754_p2, %p4751_p1 }
 0xa45   :  { %4759 = shalt.err (!%p4756_p3)
}
 0xa46   :  { %4155 = dma.vmem_to_hbm [thread:$0]  %s4150_s11, 8192, %s8739_s9, [#allocation7], %s4791_s27, %s4791_s27, %s4792_s28  }
 0xa47   :  { %s4760_s3 = scalar_lea.vmem %s8696_s4, 128  ;;  %p4765_p5 = scmp.lt.s32.totalorder %s8696_s4, %s8696_s4 }
 0xa48   :  { %p4761_p4 = scmp.ne.s32.totalorder %s8696_s4, %s4760_s3  ;;  %p4766_p6 = scmp.lt.s32.totalorder %s4760_s3, %s4760_s3 }
 0xa4a   :  { %p4767_p7 = por %p4766_p6, %p4765_p5 }
 0xa4c   :  { %p4768_p8 = pnand %p4767_p7, %p4761_p4 }
 0xa4e   :  { %4771 = shalt.err (!%p4768_p8)
}
 0xa4f   :  { %s4772_s26 = scalar_lea.hbm %s8740_s10, 128 }
 0xa50   :  { %p4773_p9 = scmp.ne.s32.totalorder %s8740_s10, %s4772_s26  ;;  %p4776_p10 = scmp.lt.u32.totalorder %s4772_s26, %s8740_s10 }
 0xa52   :  { %p4778_p11 = pnand %p4776_p10, %p4773_p9 }
 0xa54   :  { %4781 = shalt.err (!%p4778_p11)
}
 0xa55   :  { %4165 = dma.vmem_to_hbm [thread:$0]  %s8696_s4, 128, %s8740_s10, [#allocation7]  }
 0xa56   :  { %4784 = dma.done.wait [#allocation4], 128  }
 0xa57   :  { %4785 = vsyncadd [#allocation4], 4294967168 }
 0xa58   :  { %4786 = dma.done.wait [#allocation7], 8320  }
 0xa59   :  { %4787 = vsyncadd [#allocation7], 4294958976 }
 0xa5a   :  { %4788 = dma.done.wait [#allocation10], 128  }
 0xa5b   :  { %4789 = vsyncadd [#allocation10], 4294967168 }
 0xa5c   :  { %4188 = vsyncpa [#allocation3], 1 }
 0xa5d   :  { %4189 = vsyncpa [#allocation4], 1 }
 0xa5e   :  { %4190 = vsyncpa [#allocation7], 1 }
 0xa5f   :  { %4191 = vsyncpa [#allocation10], 1 }

</bundles_post_ra>
